<compile_context>
chip_gen: v5e
topology: v5e:2x2
jax: 0.10.0
libtpu: 0.0.40
codegen_flags: <defaults>
</compile_context>

<pallas_src>
import functools

import jax
import jax.numpy as jnp
from jax.experimental import pallas as pl
from jax.experimental.pallas import tpu as pltpu


def _round_up(x, m):
    return (x + m - 1) // m * m


# ----------------------- generation-aware VMEM budgets -------------------------

_BUDGET_CACHE = None


def _vmem_budgets():
    """Returns (vmem_limit_bytes, per-kernel block-byte budget)."""
    global _BUDGET_CACHE
    if _BUDGET_CACHE is None:
        cap = None
        try:
            cap = int(pltpu.get_tpu_info().vmem_capacity_bytes)
        except Exception:
            cap = None
        if cap is None:
            cap = 64 * 1024 * 1024          # conservative (v7x-sized) fallback
        if cap >= 96 * 1024 * 1024:         # 128 MiB parts: v5e / v6e
            _BUDGET_CACHE = (96 * 1024 * 1024, 48 * 1024 * 1024)
        else:                               # 64 MiB parts: v7x
            _BUDGET_CACHE = (48 * 1024 * 1024, 22 * 1024 * 1024)
    return _BUDGET_CACHE


def _cparams(n_axes):
    limit, _ = _vmem_budgets()
    return pltpu.CompilerParams(
        dimension_semantics=tuple("parallel" for _ in range(n_axes)),
        vmem_limit_bytes=limit)


# ---------------------- 1x1 conv(s) as a tiled matmul --------------------------

def _make_pointwise_kernel(n_in):
    def kernel(*refs):
        xs = refs[:n_in]
        ws = refs[n_in:2 * n_in]
        scale_ref, shift_ref, o_ref = refs[2 * n_in:2 * n_in + 3]
        # bf16 MXU operands, f32 accumulation, f32 per-channel affine epilogue.
        acc = jnp.dot(xs[0][...], ws[0][...], preferred_element_type=jnp.float32)
        for i in range(1, n_in):
            acc = acc + jnp.dot(xs[i][...], ws[i][...],
                                preferred_element_type=jnp.float32)
        o_ref[...] = (acc * scale_ref[...] + shift_ref[...]).astype(o_ref.dtype)
    return kernel


def pointwise_conv(xs, ws, scale=None, shift=None, out_dtype=jnp.bfloat16):
    """sum_i xs[i] @ ws[i], then per-channel scale/shift (fused eval-mode BN).

    Used for the qkv conv (single input, bf16 out) and for the proj conv
    (two inputs = base/agg attention heads, which kills the channel concat).
    """
    n_in = len(xs)
    xs = [x if x.dtype == jnp.bfloat16 else x.astype(jnp.bfloat16) for x in xs]
    ws = [w if w.dtype == jnp.bfloat16 else w.astype(jnp.bfloat16) for w in ws]
    M = xs[0].shape[0]
    cins = [x.shape[1] for x in xs]
    Cout = ws[0].shape[1]
    if scale is None:
        scale = jnp.ones((1, Cout), jnp.float32)
    if shift is None:
        shift = jnp.zeros((1, Cout), jnp.float32)

    out_b = jnp.dtype(out_dtype).itemsize
    _, budget = _vmem_budgets()

    def blk_bytes(tm):
        return (2 * (sum(tm * c * 2 for c in cins) + tm * Cout * out_b)
                + sum(c * Cout * 2 for c in cins) + 2 * Cout * 4)

    TM = min(2048, _round_up(M, 16))
    while TM > 16 and blk_bytes(TM) > budget:
        TM = max(16, _round_up(TM // 2, 16))
    Mp = _round_up(M, TM)
    if Mp != M:
        xs = [jnp.pad(x, ((0, Mp - M), (0, 0))) for x in xs]

    in_specs = ([pl.BlockSpec((TM, c), lambda i: (i, 0)) for c in cins]
                + [pl.BlockSpec((c, Cout), lambda i: (0, 0)) for c in cins]
                + [pl.BlockSpec((1, Cout), lambda i: (0, 0)),
                   pl.BlockSpec((1, Cout), lambda i: (0, 0))])

    out = pl.pallas_call(
        _make_pointwise_kernel(n_in),
        out_shape=jax.ShapeDtypeStruct((Mp, Cout), out_dtype),
        grid=(Mp // TM,),
        in_specs=in_specs,
        out_specs=pl.BlockSpec((TM, Cout), lambda i: (i, 0)),
        compiler_params=_cparams(1),
    )(*xs, *ws, scale, shift)
    return out if Mp == M else out[:M]


# ----------------------------- 5x5 depthwise conv ------------------------------

def _depthwise5x5_kernel(x_ref, w_ref, o_ref, xpad_ref):
    # x_ref : (1, H, W, TC) bf16 (unpadded block)
    # w_ref : (25, 1, TC) f32 taps
    # o_ref : (1, H, W, TC) bf16
    # xpad  : (H+4, W+4, TC) bf16 VMEM scratch; in-kernel zero padding (no jnp.pad)
    H, W = o_ref.shape[1], o_ref.shape[2]
    Hp, Wp, TC = xpad_ref.shape
    zdt = xpad_ref.dtype
    # keep the 2-wide halo zero; the interior is fully rewritten every step
    xpad_ref[0:2, :, :] = jnp.zeros((2, Wp, TC), zdt)
    xpad_ref[Hp - 2:Hp, :, :] = jnp.zeros((2, Wp, TC), zdt)
    xpad_ref[:, 0:2, :] = jnp.zeros((Hp, 2, TC), zdt)
    xpad_ref[:, Wp - 2:Wp, :] = jnp.zeros((Hp, 2, TC), zdt)
    xpad_ref[2:H + 2, 2:W + 2, :] = x_ref[0]

    # 25 shifted in-VMEM views; bf16 loads, f32 accumulate (v5e has no bf16 VPU).
    acc = xpad_ref[0:H, 0:W, :].astype(jnp.float32) * w_ref[0]
    for t in range(1, 25):
        dh, dw_ = divmod(t, 5)
        acc = acc + xpad_ref[dh:dh + H, dw_:dw_ + W, :].astype(jnp.float32) * w_ref[t]
    o_ref[0] = acc.astype(o_ref.dtype)


def depthwise_conv5x5(x_nhwc, w_taps):
    """Same-padding 5x5 depthwise conv; bf16 in/out, channel tile budgeted for VMEM."""
    B, H, W, C = x_nhwc.shape
    _, budget = _vmem_budgets()

    def blk_bytes(tc):
        return (2 * 2 * (H * W * tc * 2)            # in+out blocks, double-buffered
                + (H + 4) * (W + 4) * tc * 2        # padded scratch
                + 2 * 25 * tc * 4)                  # taps

    # channel tile must be a multiple of 128 or the full C (BlockSpec tiling rule)
    cands = [c for c in range(C, 0, -1) if C % c == 0 and (c % 128 == 0 or c == C)]
    TC = cands[-1]
    for c in cands:
        if blk_bytes(c) <= budget:
            TC = c
            break
    # expose >=2 programs for megacore / pipelining when shapes allow
    if B * (C // TC) < 2:
        for c in cands:
            if c < TC and blk_bytes(c) <= budget:
                TC = c
                break
    # TODO(synk): add row-strip tiling with a manual halo DMA for spatial sizes
    # where even the smallest channel tile exceeds the VMEM budget.

    xb = x_nhwc if x_nhwc.dtype == jnp.bfloat16 else x_nhwc.astype(jnp.bfloat16)
    return pl.pallas_call(
        _depthwise5x5_kernel,
        out_shape=jax.ShapeDtypeStruct((B, H, W, C), jnp.bfloat16),
        grid=(B, C // TC),
        in_specs=[pl.BlockSpec((1, H, W, TC), lambda b, c: (b, 0, 0, c)),
                  pl.BlockSpec((25, 1, TC), lambda b, c: (0, 0, c))],
        out_specs=pl.BlockSpec((1, H, W, TC), lambda b, c: (b, 0, 0, c)),
        scratch_shapes=[pltpu.VMEM((H + 4, W + 4, TC), jnp.bfloat16)],
        compiler_params=_cparams(2),
    )(xb, w_taps)


# ------------- ReLU linear attention, token-major, fused grouped 1x1 -----------

def _mla_kernel(qkv_ref, dw_ref, gw_ref, ob_ref, oa_ref, *, dim, th, eps):
    # qkv_ref : (1, N, th*3*dim) bf16  raw qkv-conv channels for this head group
    # dw_ref  : (1, N, th*3*dim) bf16  depthwise-conv output, same channels
    # gw_ref  : (th, 3, dim, dim) bf16 grouped-1x1 weights (head, q/k/v, out, in)
    # ob_ref  : (1, N, th*dim) bf16    attention output, qkv (base) heads
    # oa_ref  : (1, N, th*dim) bf16    attention output, aggregated heads
    d = dim

    def attend(q, k, v, out_ref, c0):
        # q, k, v: (N, d).  ReLU kernel_func; den = q . sum_n(k)  (no ones-row scratch).
        q = jnp.maximum(q, 0)
        k = jnp.maximum(k, 0)
        qb = q.astype(jnp.bfloat16)
        kb = k.astype(jnp.bfloat16)
        vb = v.astype(jnp.bfloat16)
        kv = jnp.einsum('nd,ne->de', vb, kb,
                        preferred_element_type=jnp.float32)          # (d, d)
        ksum = jnp.sum(k.astype(jnp.float32), axis=0, keepdims=True)  # (1, d)
        num = jnp.einsum('ne,de->nd', qb, kv.astype(jnp.bfloat16),
                         preferred_element_type=jnp.float32)          # (N, d)
        den = jnp.sum(q.astype(jnp.float32) * ksum, axis=-1, keepdims=True)
        out_ref[0, :, c0:c0 + d] = (num * pl.reciprocal(den + eps, approx=True)
                                    ).astype(out_ref.dtype)

    for hh in range(th):
        base = 3 * d * hh
        # base (non-aggregated) heads: straight from the qkv slab
        attend(qkv_ref[0, :, base:base + d],
               qkv_ref[0, :, base + d:base + 2 * d],
               qkv_ref[0, :, base + 2 * d:base + 3 * d],
               ob_ref, hh * d)
        # aggregated heads: grouped 1x1 (per head, per q/k/v component) fused here,
        # ReLU applied after the group conv (matches the torch op order).
        dq = dw_ref[0, :, base:base + d]
        dk = dw_ref[0, :, base + d:base + 2 * d]
        dv = dw_ref[0, :, base + 2 * d:base + 3 * d]
        qa = jnp.einsum('ni,oi->no', dq, gw_ref[hh, 0],
                        preferred_element_type=jnp.float32)
        ka = jnp.einsum('ni,oi->no', dk, gw_ref[hh, 1],
                        preferred_element_type=jnp.float32)
        va = jnp.einsum('ni,oi->no', dv, gw_ref[hh, 2],
                        preferred_element_type=jnp.float32)
        attend(qa, ka, va, oa_ref, hh * d)


def relu_linear_att(qkv_tok, dw_tok, gw, dim, heads, eps):
    """(B, N, 3*total_dim) x2 + (heads, 3, dim, dim) -> two (B, N, total_dim) bf16."""
    B, N, _ = qkv_tok.shape
    total_dim = heads * dim
    _, budget = _vmem_budgets()

    def blk_bytes(th):
        return 2 * (2 * N * th * 3 * dim * 2      # qkv + dw blocks (bf16)
                    + 2 * N * th * dim * 2        # two output blocks (bf16)
                    + th * 3 * dim * dim * 2)     # grouped weights

    def aligned(th):
        # channel blocks smaller than the full axis must be 128-multiples
        return th == heads or ((th * 3 * dim) % 128 == 0 and (th * dim) % 128 == 0)

    TH = heads
    if blk_bytes(TH) > budget:
        for cand in range(heads - 1, 0, -1):
            if heads % cand == 0 and aligned(cand) and blk_bytes(cand) <= budget:
                TH = cand
                break
        # TODO(synk): two-pass kv accumulation over token tiles if no aligned head
        # grouping fits VMEM (very large N * channels).
    if B * (heads // TH) < 2:                      # keep both v7x cores busy if possible
        for cand in range(TH - 1, 0, -1):
            if heads % cand == 0 and aligned(cand) and blk_bytes(cand) <= budget:
                TH = cand
                break

    kern = functools.partial(_mla_kernel, dim=dim, th=TH, eps=eps)
    out_shape = (jax.ShapeDtypeStruct((B, N, total_dim), jnp.bfloat16),
                 jax.ShapeDtypeStruct((B, N, total_dim), jnp.bfloat16))
    return pl.pallas_call(
        kern,
        out_shape=out_shape,
        grid=(B, heads // TH),
        in_specs=[
            pl.BlockSpec((1, N, TH * 3 * dim), lambda b, j: (b, 0, j)),
            pl.BlockSpec((1, N, TH * 3 * dim), lambda b, j: (b, 0, j)),
            pl.BlockSpec((TH, 3, dim, dim), lambda b, j: (j, 0, 0, 0)),
        ],
        out_specs=(pl.BlockSpec((1, N, TH * dim), lambda b, j: (b, 0, j)),
                   pl.BlockSpec((1, N, TH * dim), lambda b, j: (b, 0, j))),
        compiler_params=_cparams(2),
    )(qkv_tok, dw_tok, gw)


# --------------------------- parameter initialization --------------------------

def init_lite_mla_params(key, in_channels, out_channels, dim=8, scales=(5,),
                         bn_eps=1e-5):
    heads = in_channels // dim
    total_dim = heads * dim
    td3 = 3 * total_dim
    ks = jax.random.split(key, 8)
    p = {"dim": dim, "heads": heads, "total_dim": total_dim}

    # qkv 1x1 conv (no bias/norm/act): torch (td3, Cin, 1, 1) -> (Cin, td3), bf16
    p["qkv_w"] = (0.1 * jax.random.normal(ks[0], (in_channels, td3), jnp.float32)
                  ).astype(jnp.bfloat16)

    # aggreg (scale=5) depthwise 5x5 (groups=td3): torch (td3, 1, 5, 5) -> (25, 1, td3)
    w_dw = 0.1 * jax.random.normal(ks[1], (td3, 1, 5, 5), jnp.float32)
    p["agg_dw_taps"] = jnp.transpose(w_dw[:, 0], (1, 2, 0)).reshape(25, 1, td3)

    # aggreg grouped 1x1 (groups = 3*heads, group size = dim): torch (td3, dim, 1, 1)
    w_pw = 0.1 * jax.random.normal(ks[2], (td3, dim), jnp.float32)
    p["agg_pw_w"] = w_pw.reshape(heads, 3, dim, dim).astype(jnp.bfloat16)

    # proj: 1x1 conv over cat([base, agg]) + eval-mode BatchNorm, no act.
    # Split the weight rows so proj == base @ W_top + agg @ W_bot (kills the concat).
    c_mid = total_dim * (1 + len(scales))
    proj_w = 0.1 * jax.random.normal(ks[3], (c_mid, out_channels), jnp.float32)
    p["proj_w_base"] = proj_w[:total_dim].astype(jnp.bfloat16)
    p["proj_w_agg"] = proj_w[total_dim:].astype(jnp.bfloat16)

    gamma = 1.0 + 0.1 * jax.random.normal(ks[4], (out_channels,), jnp.float32)
    beta = 0.1 * jax.random.normal(ks[5], (out_channels,), jnp.float32)
    mean = 0.1 * jax.random.normal(ks[6], (out_channels,), jnp.float32)
    var = jnp.abs(1.0 + 0.1 * jax.random.normal(ks[7], (out_channels,), jnp.float32))
    scale = gamma / jnp.sqrt(var + bn_eps)                 # fold BN once, at init
    p["proj_scale"] = scale.reshape(1, -1)
    p["proj_shift"] = (beta - mean * scale).reshape(1, -1)
    return p


# --------------------------------- forward pass --------------------------------

def lite_mla_forward(x_nchw, params, eps=1e-15):
    dim = params["dim"]
    heads = params["heads"]
    total_dim = params["total_dim"]
    td3 = 3 * total_dim
    B, Cin, H, W = x_nchw.shape
    N = H * W
    M = B * N

    # boundary layout change (the only XLA glue left): NCHW -> NHWC, cast to bf16
    x = jnp.transpose(x_nchw, (0, 2, 3, 1)).astype(jnp.bfloat16)

    # qkv = ConvLayer(Cin, 3*total_dim, 1)  (no bias / norm / act), bf16 output
    qkv2d = pointwise_conv([x.reshape(M, Cin)], [params["qkv_w"]],
                           out_dtype=jnp.bfloat16)                     # (M, td3)

    # multi-scale branch: 5x5 depthwise; the grouped 1x1 is fused into attention
    dw_img = depthwise_conv5x5(qkv2d.reshape(B, H, W, td3),
                               params["agg_dw_taps"])                  # (B,H,W,td3)

    # token-major attention: consumes the conv layout directly (no transposes)
    out_base, out_agg = relu_linear_att(qkv2d.reshape(B, N, td3),
                                        dw_img.reshape(B, N, td3),
                                        params["agg_pw_w"], dim, heads, eps)

    # proj = ConvLayer(2*total_dim, Cout, 1, norm='bn2d'): dual matmul + folded BN
    y2d = pointwise_conv(
        [out_base.reshape(M, total_dim), out_agg.reshape(M, total_dim)],
        [params["proj_w_base"], params["proj_w_agg"]],
        params["proj_scale"], params["proj_shift"],
        out_dtype=jnp.float32)                                         # (M, Cout)
    Cout = y2d.shape[1]
    return jnp.transpose(y2d.reshape(B, H, W, Cout), (0, 3, 1, 2))     # back to NCHW


# ------------------------------------ main --------------------------------------

if __name__ == "__main__":
    key = jax.random.PRNGKey(0)
    kx, kp = jax.random.split(key)

    # small shapes: B=2, in_channels=16 (dim=8 -> heads=2), H=W=8, out_channels=16
    B, Cin, H, W = 2, 16, 8, 8
    Cout = 16

    x = jax.random.normal(kx, (B, Cin, H, W), jnp.float32)
    params = init_lite_mla_params(kp, Cin, Cout, dim=8, scales=(5,))

    fwd = jax.jit(lambda inp: lite_mla_forward(inp, params))
    y = fwd(x)
    jax.block_until_ready(y)
    assert y.shape == (B, Cout, H, W)
    assert bool(jnp.all(jnp.isfinite(y)))
    print("KERNEL_OK")
</pallas_src>

<mosaic_0001>
module attributes {stable_mosaic.version = 11 : i64} {
  func.func @kernel(%arg0: i32, %arg1: memref<128x16xbf16, #tpu.memory_space<vmem>>, %arg2: memref<16x48xbf16, #tpu.memory_space<vmem>>, %arg3: memref<1x48xf32, #tpu.memory_space<vmem>>, %arg4: memref<1x48xf32, #tpu.memory_space<vmem>>, %arg5: memref<128x48xbf16, #tpu.memory_space<vmem>>) attributes {dimension_semantics = [#tpu.dimension_semantics<parallel>], iteration_bounds = array<i64: 1>, scalar_prefetch = 0 : i64, scratch_operands = 0 : i64, tpu.core_type = #tpu.core_type<tc>, window_params = [{transform_indices = @transform_0, window_bounds = array<i64: 128, 16>}, {pipeline_mode = #tpu.pipeline_mode<synchronous>, transform_indices = @transform_1, window_bounds = array<i64: 16, 48>}, {pipeline_mode = #tpu.pipeline_mode<synchronous>, transform_indices = @transform_2, window_bounds = array<i64: 1, 48>}, {pipeline_mode = #tpu.pipeline_mode<synchronous>, transform_indices = @transform_3, window_bounds = array<i64: 1, 48>}, {transform_indices = @transform_4, window_bounds = array<i64: 128, 48>}]} {
    %c0 = arith.constant 0 : index
    %c0_0 = arith.constant 0 : index
    %0 = vector.load %arg1[%c0, %c0_0] : memref<128x16xbf16, #tpu.memory_space<vmem>>, vector<128x16xbf16>
    %c0_1 = arith.constant 0 : index
    %c0_2 = arith.constant 0 : index
    %1 = vector.load %arg2[%c0_1, %c0_2] : memref<16x48xbf16, #tpu.memory_space<vmem>>, vector<16x48xbf16>
    %cst = arith.constant dense<0.000000e+00> : vector<128x48xf32>
    %2 = tpu.matmul %0, %1, %cst {dimension_numbers = #tpu.dot_dimension_numbers<[1], [0], [0], [1], [0, 0, 1, 1], [], []>} : vector<128x16xbf16>, vector<16x48xbf16>, vector<128x48xf32> -> vector<128x48xf32>
    %c0_3 = arith.constant 0 : index
    %c0_4 = arith.constant 0 : index
    %3 = vector.load %arg3[%c0_3, %c0_4] : memref<1x48xf32, #tpu.memory_space<vmem>>, vector<1x48xf32>
    %4 = vector.broadcast %3 : vector<1x48xf32> to vector<128x48xf32>
    %5 = arith.mulf %2, %4 : vector<128x48xf32>
    %c0_5 = arith.constant 0 : index
    %c0_6 = arith.constant 0 : index
    %6 = vector.load %arg4[%c0_5, %c0_6] : memref<1x48xf32, #tpu.memory_space<vmem>>, vector<1x48xf32>
    %7 = vector.broadcast %6 : vector<1x48xf32> to vector<128x48xf32>
    %8 = arith.addf %5, %7 : vector<128x48xf32>
    %9 = arith.truncf %8 : vector<128x48xf32> to vector<128x48xbf16>
    %c0_7 = arith.constant 0 : index
    %c0_8 = arith.constant 0 : index
    %10 = vector.load %arg5[%c0_7, %c0_8] : memref<128x48xbf16, #tpu.memory_space<vmem>>, vector<128x48xbf16>
    tpu.vector_store %arg5[%c0_7, %c0_8], %9 {strides = array<i32>} : memref<128x48xbf16, #tpu.memory_space<vmem>>, vector<128x48xbf16>,
    return
  }
  func.func @transform_0(%arg0: i32) -> (i32, i32) {
    %c0_i32 = arith.constant 0 : i32
    %c0_i32_0 = arith.constant 0 : i32
    return %arg0, %c0_i32 : i32, i32
  }
  func.func @transform_1(%arg0: i32) -> (i32, i32) {
    %c0_i32 = arith.constant 0 : i32
    %c0_i32_0 = arith.constant 0 : i32
    %c0_i32_1 = arith.constant 0 : i32
    return %c0_i32, %c0_i32_0 : i32, i32
  }
  func.func @transform_2(%arg0: i32) -> (i32, i32) {
    %c0_i32 = arith.constant 0 : i32
    %c0_i32_0 = arith.constant 0 : i32
    %c0_i32_1 = arith.constant 0 : i32
    return %c0_i32, %c0_i32_0 : i32, i32
  }
  func.func @transform_3(%arg0: i32) -> (i32, i32) {
    %c0_i32 = arith.constant 0 : i32
    %c0_i32_0 = arith.constant 0 : i32
    %c0_i32_1 = arith.constant 0 : i32
    return %c0_i32, %c0_i32_0 : i32, i32
  }
  func.func @transform_4(%arg0: i32) -> (i32, i32) {
    %c0_i32 = arith.constant 0 : i32
    %c0_i32_0 = arith.constant 0 : i32
    return %arg0, %c0_i32 : i32, i32
  }
}

module attributes {stable_mosaic.version = 11 : i64} {
  func.func @_depthwise5x5_kernel(%arg0: i32, %arg1: i32, %arg2: memref<1x8x8x48xbf16, #tpu.memory_space<vmem>>, %arg3: memref<25x1x48xf32, #tpu.memory_space<vmem>>, %arg4: memref<1x8x8x48xbf16, #tpu.memory_space<vmem>>, %arg5: memref<12x12x48xbf16, #tpu.memory_space<vmem>>) attributes {dimension_semantics = [#tpu.dimension_semantics<parallel>, #tpu.dimension_semantics<parallel>], iteration_bounds = array<i64: 2, 1>, scalar_prefetch = 0 : i64, scratch_operands = 1 : i64, tpu.core_type = #tpu.core_type<tc>, window_params = [{transform_indices = @transform_0, window_bounds = array<i64: 1, 8, 8, 48>}, {transform_indices = @transform_1, window_bounds = array<i64: 25, 1, 48>}, {transform_indices = @transform_2, window_bounds = array<i64: 1, 8, 8, 48>}]} {
    %cst = arith.constant 0.000000e+00 : bf16
    %0 = vector.broadcast %cst : bf16 to vector<2x12x48xbf16>
    %c0 = arith.constant 0 : index
    %c0_0 = arith.constant 0 : index
    %c0_1 = arith.constant 0 : index
    %1 = vector.load %arg5[%c0, %c0_0, %c0_1] : memref<12x12x48xbf16, #tpu.memory_space<vmem>>, vector<2x12x48xbf16>
    tpu.vector_store %arg5[%c0, %c0_0, %c0_1], %0 {strides = array<i32>} : memref<12x12x48xbf16, #tpu.memory_space<vmem>>, vector<2x12x48xbf16>,
    %cst_2 = arith.constant 0.000000e+00 : bf16
    %2 = vector.broadcast %cst_2 : bf16 to vector<2x12x48xbf16>
    %c10 = arith.constant 10 : index
    %c0_3 = arith.constant 0 : index
    %c0_4 = arith.constant 0 : index
    %3 = vector.load %arg5[%c10, %c0_3, %c0_4] : memref<12x12x48xbf16, #tpu.memory_space<vmem>>, vector<2x12x48xbf16>
    tpu.vector_store %arg5[%c10, %c0_3, %c0_4], %2 {strides = array<i32>} : memref<12x12x48xbf16, #tpu.memory_space<vmem>>, vector<2x12x48xbf16>,
    %cst_5 = arith.constant 0.000000e+00 : bf16
    %4 = vector.broadcast %cst_5 : bf16 to vector<12x2x48xbf16>
    %c0_6 = arith.constant 0 : index
    %c0_7 = arith.constant 0 : index
    %c0_8 = arith.constant 0 : index
    %5 = vector.load %arg5[%c0_6, %c0_7, %c0_8] : memref<12x12x48xbf16, #tpu.memory_space<vmem>>, vector<12x2x48xbf16>
    tpu.vector_store %arg5[%c0_6, %c0_7, %c0_8], %4 {strides = array<i32>} : memref<12x12x48xbf16, #tpu.memory_space<vmem>>, vector<12x2x48xbf16>,
    %cst_9 = arith.constant 0.000000e+00 : bf16
    %6 = vector.broadcast %cst_9 : bf16 to vector<12x2x48xbf16>
    %c0_10 = arith.constant 0 : index
    %c10_11 = arith.constant 10 : index
    %c0_12 = arith.constant 0 : index
    %7 = vector.load %arg5[%c0_10, %c10_11, %c0_12] : memref<12x12x48xbf16, #tpu.memory_space<vmem>>, vector<12x2x48xbf16>
    tpu.vector_store %arg5[%c0_10, %c10_11, %c0_12], %6 {strides = array<i32>} : memref<12x12x48xbf16, #tpu.memory_space<vmem>>, vector<12x2x48xbf16>,
    %c0_13 = arith.constant 0 : index
    %c0_14 = arith.constant 0 : index
    %c0_15 = arith.constant 0 : index
    %c0_16 = arith.constant 0 : index
    %8 = vector.load %arg2[%c0_13, %c0_14, %c0_15, %c0_16] : memref<1x8x8x48xbf16, #tpu.memory_space<vmem>>, vector<1x8x8x48xbf16>
    %9 = vector.shape_cast %8 : vector<1x8x8x48xbf16> to vector<8x8x48xbf16>
    %c2 = arith.constant 2 : index
    %c2_17 = arith.constant 2 : index
    %c0_18 = arith.constant 0 : index
    %10 = vector.load %arg5[%c2, %c2_17, %c0_18] : memref<12x12x48xbf16, #tpu.memory_space<vmem>>, vector<8x8x48xbf16>
    tpu.vector_store %arg5[%c2, %c2_17, %c0_18], %9 {strides = array<i32>} : memref<12x12x48xbf16, #tpu.memory_space<vmem>>, vector<8x8x48xbf16>,
    %c0_19 = arith.constant 0 : index
    %c0_20 = arith.constant 0 : index
    %c0_21 = arith.constant 0 : index
    %11 = vector.load %arg5[%c0_19, %c0_20, %c0_21] : memref<12x12x48xbf16, #tpu.memory_space<vmem>>, vector<8x8x48xbf16>
    %12 = arith.extf %11 : vector<8x8x48xbf16> to vector<8x8x48xf32>
    %c0_22 = arith.constant 0 : index
    %c0_23 = arith.constant 0 : index
    %c0_24 = arith.constant 0 : index
    %13 = vector.load %arg3[%c0_22, %c0_23, %c0_24] : memref<25x1x48xf32, #tpu.memory_space<vmem>>, vector<1x1x48xf32>
    %14 = vector.shape_cast %13 : vector<1x1x48xf32> to vector<1x48xf32>
    %15 = vector.shape_cast %14 : vector<1x48xf32> to vector<1x1x48xf32>
    %16 = vector.broadcast %15 : vector<1x1x48xf32> to vector<8x8x48xf32>
    %17 = arith.mulf %12, %16 : vector<8x8x48xf32>
    %c0_25 = arith.constant 0 : index
    %c1 = arith.constant 1 : index
    %c0_26 = arith.constant 0 : index
    %18 = vector.load %arg5[%c0_25, %c1, %c0_26] : memref<12x12x48xbf16, #tpu.memory_space<vmem>>, vector<8x8x48xbf16>
    %19 = arith.extf %18 : vector<8x8x48xbf16> to vector<8x8x48xf32>
    %c1_27 = arith.constant 1 : index
    %c0_28 = arith.constant 0 : index
    %c0_29 = arith.constant 0 : index
    %20 = vector.load %arg3[%c1_27, %c0_28, %c0_29] : memref<25x1x48xf32, #tpu.memory_space<vmem>>, vector<1x1x48xf32>
    %21 = vector.shape_cast %20 : vector<1x1x48xf32> to vector<1x48xf32>
    %22 = vector.shape_cast %21 : vector<1x48xf32> to vector<1x1x48xf32>
    %23 = vector.broadcast %22 : vector<1x1x48xf32> to vector<8x8x48xf32>
    %24 = arith.mulf %19, %23 : vector<8x8x48xf32>
    %25 = arith.addf %17, %24 : vector<8x8x48xf32>
    %c0_30 = arith.constant 0 : index
    %c2_31 = arith.constant 2 : index
    %c0_32 = arith.constant 0 : index
    %26 = vector.load %arg5[%c0_30, %c2_31, %c0_32] : memref<12x12x48xbf16, #tpu.memory_space<vmem>>, vector<8x8x48xbf16>
    %27 = arith.extf %26 : vector<8x8x48xbf16> to vector<8x8x48xf32>
    %c2_33 = arith.constant 2 : index
    %c0_34 = arith.constant 0 : index
    %c0_35 = arith.constant 0 : index
    %28 = vector.load %arg3[%c2_33, %c0_34, %c0_35] : memref<25x1x48xf32, #tpu.memory_space<vmem>>, vector<1x1x48xf32>
    %29 = vector.shape_cast %28 : vector<1x1x48xf32> to vector<1x48xf32>
    %30 = vector.shape_cast %29 : vector<1x48xf32> to vector<1x1x48xf32>
    %31 = vector.broadcast %30 : vector<1x1x48xf32> to vector<8x8x48xf32>
    %32 = arith.mulf %27, %31 : vector<8x8x48xf32>
    %33 = arith.addf %25, %32 : vector<8x8x48xf32>
    %c0_36 = arith.constant 0 : index
    %c3 = arith.constant 3 : index
    %c0_37 = arith.constant 0 : index
    %34 = vector.load %arg5[%c0_36, %c3, %c0_37] : memref<12x12x48xbf16, #tpu.memory_space<vmem>>, vector<8x8x48xbf16>
    %35 = arith.extf %34 : vector<8x8x48xbf16> to vector<8x8x48xf32>
    %c3_38 = arith.constant 3 : index
    %c0_39 = arith.constant 0 : index
    %c0_40 = arith.constant 0 : index
    %36 = vector.load %arg3[%c3_38, %c0_39, %c0_40] : memref<25x1x48xf32, #tpu.memory_space<vmem>>, vector<1x1x48xf32>
    %37 = vector.shape_cast %36 : vector<1x1x48xf32> to vector<1x48xf32>
    %38 = vector.shape_cast %37 : vector<1x48xf32> to vector<1x1x48xf32>
    %39 = vector.broadcast %38 : vector<1x1x48xf32> to vector<8x8x48xf32>
    %40 = arith.mulf %35, %39 : vector<8x8x48xf32>
    %41 = arith.addf %33, %40 : vector<8x8x48xf32>
    %c0_41 = arith.constant 0 : index
    %c4 = arith.constant 4 : index
    %c0_42 = arith.constant 0 : index
    %42 = vector.load %arg5[%c0_41, %c4, %c0_42] : memref<12x12x48xbf16, #tpu.memory_space<vmem>>, vector<8x8x48xbf16>
    %43 = arith.extf %42 : vector<8x8x48xbf16> to vector<8x8x48xf32>
    %c4_43 = arith.constant 4 : index
    %c0_44 = arith.constant 0 : index
    %c0_45 = arith.constant 0 : index
    %44 = vector.load %arg3[%c4_43, %c0_44, %c0_45] : memref<25x1x48xf32, #tpu.memory_space<vmem>>, vector<1x1x48xf32>
    %45 = vector.shape_cast %44 : vector<1x1x48xf32> to vector<1x48xf32>
    %46 = vector.shape_cast %45 : vector<1x48xf32> to vector<1x1x48xf32>
    %47 = vector.broadcast %46 : vector<1x1x48xf32> to vector<8x8x48xf32>
    %48 = arith.mulf %43, %47 : vector<8x8x48xf32>
    %49 = arith.addf %41, %48 : vector<8x8x48xf32>
    %c1_46 = arith.constant 1 : index
    %c0_47 = arith.constant 0 : index
    %c0_48 = arith.constant 0 : index
    %50 = vector.load %arg5[%c1_46, %c0_47, %c0_48] : memref<12x12x48xbf16, #tpu.memory_space<vmem>>, vector<8x8x48xbf16>
    %51 = arith.extf %50 : vector<8x8x48xbf16> to vector<8x8x48xf32>
    %c5 = arith.constant 5 : index
    %c0_49 = arith.constant 0 : index
    %c0_50 = arith.constant 0 : index
    %52 = vector.load %arg3[%c5, %c0_49, %c0_50] : memref<25x1x48xf32, #tpu.memory_space<vmem>>, vector<1x1x48xf32>
    %53 = vector.shape_cast %52 : vector<1x1x48xf32> to vector<1x48xf32>
    %54 = vector.shape_cast %53 : vector<1x48xf32> to vector<1x1x48xf32>
    %55 = vector.broadcast %54 : vector<1x1x48xf32> to vector<8x8x48xf32>
    %56 = arith.mulf %51, %55 : vector<8x8x48xf32>
    %57 = arith.addf %49, %56 : vector<8x8x48xf32>
    %c1_51 = arith.constant 1 : index
    %c1_52 = arith.constant 1 : index
    %c0_53 = arith.constant 0 : index
    %58 = vector.load %arg5[%c1_51, %c1_52, %c0_53] : memref<12x12x48xbf16, #tpu.memory_space<vmem>>, vector<8x8x48xbf16>
    %59 = arith.extf %58 : vector<8x8x48xbf16> to vector<8x8x48xf32>
    %c6 = arith.constant 6 : index
    %c0_54 = arith.constant 0 : index
    %c0_55 = arith.constant 0 : index
    %60 = vector.load %arg3[%c6, %c0_54, %c0_55] : memref<25x1x48xf32, #tpu.memory_space<vmem>>, vector<1x1x48xf32>
    %61 = vector.shape_cast %60 : vector<1x1x48xf32> to vector<1x48xf32>
    %62 = vector.shape_cast %61 : vector<1x48xf32> to vector<1x1x48xf32>
    %63 = vector.broadcast %62 : vector<1x1x48xf32> to vector<8x8x48xf32>
    %64 = arith.mulf %59, %63 : vector<8x8x48xf32>
    %65 = arith.addf %57, %64 : vector<8x8x48xf32>
    %c1_56 = arith.constant 1 : index
    %c2_57 = arith.constant 2 : index
    %c0_58 = arith.constant 0 : index
    %66 = vector.load %arg5[%c1_56, %c2_57, %c0_58] : memref<12x12x48xbf16, #tpu.memory_space<vmem>>, vector<8x8x48xbf16>
    %67 = arith.extf %66 : vector<8x8x48xbf16> to vector<8x8x48xf32>
    %c7 = arith.constant 7 : index
    %c0_59 = arith.constant 0 : index
    %c0_60 = arith.constant 0 : index
    %68 = vector.load %arg3[%c7, %c0_59, %c0_60] : memref<25x1x48xf32, #tpu.memory_space<vmem>>, vector<1x1x48xf32>
    %69 = vector.shape_cast %68 : vector<1x1x48xf32> to vector<1x48xf32>
    %70 = vector.shape_cast %69 : vector<1x48xf32> to vector<1x1x48xf32>
    %71 = vector.broadcast %70 : vector<1x1x48xf32> to vector<8x8x48xf32>
    %72 = arith.mulf %67, %71 : vector<8x8x48xf32>
    %73 = arith.addf %65, %72 : vector<8x8x48xf32>
    %c1_61 = arith.constant 1 : index
    %c3_62 = arith.constant 3 : index
    %c0_63 = arith.constant 0 : index
    %74 = vector.load %arg5[%c1_61, %c3_62, %c0_63] : memref<12x12x48xbf16, #tpu.memory_space<vmem>>, vector<8x8x48xbf16>
    %75 = arith.extf %74 : vector<8x8x48xbf16> to vector<8x8x48xf32>
    %c8 = arith.constant 8 : index
    %c0_64 = arith.constant 0 : index
    %c0_65 = arith.constant 0 : index
    %76 = vector.load %arg3[%c8, %c0_64, %c0_65] : memref<25x1x48xf32, #tpu.memory_space<vmem>>, vector<1x1x48xf32>
    %77 = vector.shape_cast %76 : vector<1x1x48xf32> to vector<1x48xf32>
    %78 = vector.shape_cast %77 : vector<1x48xf32> to vector<1x1x48xf32>
    %79 = vector.broadcast %78 : vector<1x1x48xf32> to vector<8x8x48xf32>
    %80 = arith.mulf %75, %79 : vector<8x8x48xf32>
    %81 = arith.addf %73, %80 : vector<8x8x48xf32>
    %c1_66 = arith.constant 1 : index
    %c4_67 = arith.constant 4 : index
    %c0_68 = arith.constant 0 : index
    %82 = vector.load %arg5[%c1_66, %c4_67, %c0_68] : memref<12x12x48xbf16, #tpu.memory_space<vmem>>, vector<8x8x48xbf16>
    %83 = arith.extf %82 : vector<8x8x48xbf16> to vector<8x8x48xf32>
    %c9 = arith.constant 9 : index
    %c0_69 = arith.constant 0 : index
    %c0_70 = arith.constant 0 : index
    %84 = vector.load %arg3[%c9, %c0_69, %c0_70] : memref<25x1x48xf32, #tpu.memory_space<vmem>>, vector<1x1x48xf32>
    %85 = vector.shape_cast %84 : vector<1x1x48xf32> to vector<1x48xf32>
    %86 = vector.shape_cast %85 : vector<1x48xf32> to vector<1x1x48xf32>
    %87 = vector.broadcast %86 : vector<1x1x48xf32> to vector<8x8x48xf32>
    %88 = arith.mulf %83, %87 : vector<8x8x48xf32>
    %89 = arith.addf %81, %88 : vector<8x8x48xf32>
    %c2_71 = arith.constant 2 : index
    %c0_72 = arith.constant 0 : index
    %c0_73 = arith.constant 0 : index
    %90 = vector.load %arg5[%c2_71, %c0_72, %c0_73] : memref<12x12x48xbf16, #tpu.memory_space<vmem>>, vector<8x8x48xbf16>
    %91 = arith.extf %90 : vector<8x8x48xbf16> to vector<8x8x48xf32>
    %c10_74 = arith.constant 10 : index
    %c0_75 = arith.constant 0 : index
    %c0_76 = arith.constant 0 : index
    %92 = vector.load %arg3[%c10_74, %c0_75, %c0_76] : memref<25x1x48xf32, #tpu.memory_space<vmem>>, vector<1x1x48xf32>
    %93 = vector.shape_cast %92 : vector<1x1x48xf32> to vector<1x48xf32>
    %94 = vector.shape_cast %93 : vector<1x48xf32> to vector<1x1x48xf32>
    %95 = vector.broadcast %94 : vector<1x1x48xf32> to vector<8x8x48xf32>
    %96 = arith.mulf %91, %95 : vector<8x8x48xf32>
    %97 = arith.addf %89, %96 : vector<8x8x48xf32>
    %c2_77 = arith.constant 2 : index
    %c1_78 = arith.constant 1 : index
    %c0_79 = arith.constant 0 : index
    %98 = vector.load %arg5[%c2_77, %c1_78, %c0_79] : memref<12x12x48xbf16, #tpu.memory_space<vmem>>, vector<8x8x48xbf16>
    %99 = arith.extf %98 : vector<8x8x48xbf16> to vector<8x8x48xf32>
    %c11 = arith.constant 11 : index
    %c0_80 = arith.constant 0 : index
    %c0_81 = arith.constant 0 : index
    %100 = vector.load %arg3[%c11, %c0_80, %c0_81] : memref<25x1x48xf32, #tpu.memory_space<vmem>>, vector<1x1x48xf32>
    %101 = vector.shape_cast %100 : vector<1x1x48xf32> to vector<1x48xf32>
    %102 = vector.shape_cast %101 : vector<1x48xf32> to vector<1x1x48xf32>
    %103 = vector.broadcast %102 : vector<1x1x48xf32> to vector<8x8x48xf32>
    %104 = arith.mulf %99, %103 : vector<8x8x48xf32>
    %105 = arith.addf %97, %104 : vector<8x8x48xf32>
    %c2_82 = arith.constant 2 : index
    %c2_83 = arith.constant 2 : index
    %c0_84 = arith.constant 0 : index
    %106 = vector.load %arg5[%c2_82, %c2_83, %c0_84] : memref<12x12x48xbf16, #tpu.memory_space<vmem>>, vector<8x8x48xbf16>
    %107 = arith.extf %106 : vector<8x8x48xbf16> to vector<8x8x48xf32>
    %c12 = arith.constant 12 : index
    %c0_85 = arith.constant 0 : index
    %c0_86 = arith.constant 0 : index
    %108 = vector.load %arg3[%c12, %c0_85, %c0_86] : memref<25x1x48xf32, #tpu.memory_space<vmem>>, vector<1x1x48xf32>
    %109 = vector.shape_cast %108 : vector<1x1x48xf32> to vector<1x48xf32>
    %110 = vector.shape_cast %109 : vector<1x48xf32> to vector<1x1x48xf32>
    %111 = vector.broadcast %110 : vector<1x1x48xf32> to vector<8x8x48xf32>
    %112 = arith.mulf %107, %111 : vector<8x8x48xf32>
    %113 = arith.addf %105, %112 : vector<8x8x48xf32>
    %c2_87 = arith.constant 2 : index
    %c3_88 = arith.constant 3 : index
    %c0_89 = arith.constant 0 : index
    %114 = vector.load %arg5[%c2_87, %c3_88, %c0_89] : memref<12x12x48xbf16, #tpu.memory_space<vmem>>, vector<8x8x48xbf16>
    %115 = arith.extf %114 : vector<8x8x48xbf16> to vector<8x8x48xf32>
    %c13 = arith.constant 13 : index
    %c0_90 = arith.constant 0 : index
    %c0_91 = arith.constant 0 : index
    %116 = vector.load %arg3[%c13, %c0_90, %c0_91] : memref<25x1x48xf32, #tpu.memory_space<vmem>>, vector<1x1x48xf32>
    %117 = vector.shape_cast %116 : vector<1x1x48xf32> to vector<1x48xf32>
    %118 = vector.shape_cast %117 : vector<1x48xf32> to vector<1x1x48xf32>
    %119 = vector.broadcast %118 : vector<1x1x48xf32> to vector<8x8x48xf32>
    %120 = arith.mulf %115, %119 : vector<8x8x48xf32>
    %121 = arith.addf %113, %120 : vector<8x8x48xf32>
    %c2_92 = arith.constant 2 : index
    %c4_93 = arith.constant 4 : index
    %c0_94 = arith.constant 0 : index
    %122 = vector.load %arg5[%c2_92, %c4_93, %c0_94] : memref<12x12x48xbf16, #tpu.memory_space<vmem>>, vector<8x8x48xbf16>
    %123 = arith.extf %122 : vector<8x8x48xbf16> to vector<8x8x48xf32>
    %c14 = arith.constant 14 : index
    %c0_95 = arith.constant 0 : index
    %c0_96 = arith.constant 0 : index
    %124 = vector.load %arg3[%c14, %c0_95, %c0_96] : memref<25x1x48xf32, #tpu.memory_space<vmem>>, vector<1x1x48xf32>
    %125 = vector.shape_cast %124 : vector<1x1x48xf32> to vector<1x48xf32>
    %126 = vector.shape_cast %125 : vector<1x48xf32> to vector<1x1x48xf32>
    %127 = vector.broadcast %126 : vector<1x1x48xf32> to vector<8x8x48xf32>
    %128 = arith.mulf %123, %127 : vector<8x8x48xf32>
    %129 = arith.addf %121, %128 : vector<8x8x48xf32>
    %c3_97 = arith.constant 3 : index
    %c0_98 = arith.constant 0 : index
    %c0_99 = arith.constant 0 : index
    %130 = vector.load %arg5[%c3_97, %c0_98, %c0_99] : memref<12x12x48xbf16, #tpu.memory_space<vmem>>, vector<8x8x48xbf16>
    %131 = arith.extf %130 : vector<8x8x48xbf16> to vector<8x8x48xf32>
    %c15 = arith.constant 15 : index
    %c0_100 = arith.constant 0 : index
    %c0_101 = arith.constant 0 : index
    %132 = vector.load %arg3[%c15, %c0_100, %c0_101] : memref<25x1x48xf32, #tpu.memory_space<vmem>>, vector<1x1x48xf32>
    %133 = vector.shape_cast %132 : vector<1x1x48xf32> to vector<1x48xf32>
    %134 = vector.shape_cast %133 : vector<1x48xf32> to vector<1x1x48xf32>
    %135 = vector.broadcast %134 : vector<1x1x48xf32> to vector<8x8x48xf32>
    %136 = arith.mulf %131, %135 : vector<8x8x48xf32>
    %137 = arith.addf %129, %136 : vector<8x8x48xf32>
    %c3_102 = arith.constant 3 : index
    %c1_103 = arith.constant 1 : index
    %c0_104 = arith.constant 0 : index
    %138 = vector.load %arg5[%c3_102, %c1_103, %c0_104] : memref<12x12x48xbf16, #tpu.memory_space<vmem>>, vector<8x8x48xbf16>
    %139 = arith.extf %138 : vector<8x8x48xbf16> to vector<8x8x48xf32>
    %c16 = arith.constant 16 : index
    %c0_105 = arith.constant 0 : index
    %c0_106 = arith.constant 0 : index
    %140 = vector.load %arg3[%c16, %c0_105, %c0_106] : memref<25x1x48xf32, #tpu.memory_space<vmem>>, vector<1x1x48xf32>
    %141 = vector.shape_cast %140 : vector<1x1x48xf32> to vector<1x48xf32>
    %142 = vector.shape_cast %141 : vector<1x48xf32> to vector<1x1x48xf32>
    %143 = vector.broadcast %142 : vector<1x1x48xf32> to vector<8x8x48xf32>
    %144 = arith.mulf %139, %143 : vector<8x8x48xf32>
    %145 = arith.addf %137, %144 : vector<8x8x48xf32>
    %c3_107 = arith.constant 3 : index
    %c2_108 = arith.constant 2 : index
    %c0_109 = arith.constant 0 : index
    %146 = vector.load %arg5[%c3_107, %c2_108, %c0_109] : memref<12x12x48xbf16, #tpu.memory_space<vmem>>, vector<8x8x48xbf16>
    %147 = arith.extf %146 : vector<8x8x48xbf16> to vector<8x8x48xf32>
    %c17 = arith.constant 17 : index
    %c0_110 = arith.constant 0 : index
    %c0_111 = arith.constant 0 : index
    %148 = vector.load %arg3[%c17, %c0_110, %c0_111] : memref<25x1x48xf32, #tpu.memory_space<vmem>>, vector<1x1x48xf32>
    %149 = vector.shape_cast %148 : vector<1x1x48xf32> to vector<1x48xf32>
    %150 = vector.shape_cast %149 : vector<1x48xf32> to vector<1x1x48xf32>
    %151 = vector.broadcast %150 : vector<1x1x48xf32> to vector<8x8x48xf32>
    %152 = arith.mulf %147, %151 : vector<8x8x48xf32>
    %153 = arith.addf %145, %152 : vector<8x8x48xf32>
    %c3_112 = arith.constant 3 : index
    %c3_113 = arith.constant 3 : index
    %c0_114 = arith.constant 0 : index
    %154 = vector.load %arg5[%c3_112, %c3_113, %c0_114] : memref<12x12x48xbf16, #tpu.memory_space<vmem>>, vector<8x8x48xbf16>
    %155 = arith.extf %154 : vector<8x8x48xbf16> to vector<8x8x48xf32>
    %c18 = arith.constant 18 : index
    %c0_115 = arith.constant 0 : index
    %c0_116 = arith.constant 0 : index
    %156 = vector.load %arg3[%c18, %c0_115, %c0_116] : memref<25x1x48xf32, #tpu.memory_space<vmem>>, vector<1x1x48xf32>
    %157 = vector.shape_cast %156 : vector<1x1x48xf32> to vector<1x48xf32>
    %158 = vector.shape_cast %157 : vector<1x48xf32> to vector<1x1x48xf32>
    %159 = vector.broadcast %158 : vector<1x1x48xf32> to vector<8x8x48xf32>
    %160 = arith.mulf %155, %159 : vector<8x8x48xf32>
    %161 = arith.addf %153, %160 : vector<8x8x48xf32>
    %c3_117 = arith.constant 3 : index
    %c4_118 = arith.constant 4 : index
    %c0_119 = arith.constant 0 : index
    %162 = vector.load %arg5[%c3_117, %c4_118, %c0_119] : memref<12x12x48xbf16, #tpu.memory_space<vmem>>, vector<8x8x48xbf16>
    %163 = arith.extf %162 : vector<8x8x48xbf16> to vector<8x8x48xf32>
    %c19 = arith.constant 19 : index
    %c0_120 = arith.constant 0 : index
    %c0_121 = arith.constant 0 : index
    %164 = vector.load %arg3[%c19, %c0_120, %c0_121] : memref<25x1x48xf32, #tpu.memory_space<vmem>>, vector<1x1x48xf32>
    %165 = vector.shape_cast %164 : vector<1x1x48xf32> to vector<1x48xf32>
    %166 = vector.shape_cast %165 : vector<1x48xf32> to vector<1x1x48xf32>
    %167 = vector.broadcast %166 : vector<1x1x48xf32> to vector<8x8x48xf32>
    %168 = arith.mulf %163, %167 : vector<8x8x48xf32>
    %169 = arith.addf %161, %168 : vector<8x8x48xf32>
    %c4_122 = arith.constant 4 : index
    %c0_123 = arith.constant 0 : index
    %c0_124 = arith.constant 0 : index
    %170 = vector.load %arg5[%c4_122, %c0_123, %c0_124] : memref<12x12x48xbf16, #tpu.memory_space<vmem>>, vector<8x8x48xbf16>
    %171 = arith.extf %170 : vector<8x8x48xbf16> to vector<8x8x48xf32>
    %c20 = arith.constant 20 : index
    %c0_125 = arith.constant 0 : index
    %c0_126 = arith.constant 0 : index
    %172 = vector.load %arg3[%c20, %c0_125, %c0_126] : memref<25x1x48xf32, #tpu.memory_space<vmem>>, vector<1x1x48xf32>
    %173 = vector.shape_cast %172 : vector<1x1x48xf32> to vector<1x48xf32>
    %174 = vector.shape_cast %173 : vector<1x48xf32> to vector<1x1x48xf32>
    %175 = vector.broadcast %174 : vector<1x1x48xf32> to vector<8x8x48xf32>
    %176 = arith.mulf %171, %175 : vector<8x8x48xf32>
    %177 = arith.addf %169, %176 : vector<8x8x48xf32>
    %c4_127 = arith.constant 4 : index
    %c1_128 = arith.constant 1 : index
    %c0_129 = arith.constant 0 : index
    %178 = vector.load %arg5[%c4_127, %c1_128, %c0_129] : memref<12x12x48xbf16, #tpu.memory_space<vmem>>, vector<8x8x48xbf16>
    %179 = arith.extf %178 : vector<8x8x48xbf16> to vector<8x8x48xf32>
    %c21 = arith.constant 21 : index
    %c0_130 = arith.constant 0 : index
    %c0_131 = arith.constant 0 : index
    %180 = vector.load %arg3[%c21, %c0_130, %c0_131] : memref<25x1x48xf32, #tpu.memory_space<vmem>>, vector<1x1x48xf32>
    %181 = vector.shape_cast %180 : vector<1x1x48xf32> to vector<1x48xf32>
    %182 = vector.shape_cast %181 : vector<1x48xf32> to vector<1x1x48xf32>
    %183 = vector.broadcast %182 : vector<1x1x48xf32> to vector<8x8x48xf32>
    %184 = arith.mulf %179, %183 : vector<8x8x48xf32>
    %185 = arith.addf %177, %184 : vector<8x8x48xf32>
    %c4_132 = arith.constant 4 : index
    %c2_133 = arith.constant 2 : index
    %c0_134 = arith.constant 0 : index
    %186 = vector.load %arg5[%c4_132, %c2_133, %c0_134] : memref<12x12x48xbf16, #tpu.memory_space<vmem>>, vector<8x8x48xbf16>
    %187 = arith.extf %186 : vector<8x8x48xbf16> to vector<8x8x48xf32>
    %c22 = arith.constant 22 : index
    %c0_135 = arith.constant 0 : index
    %c0_136 = arith.constant 0 : index
    %188 = vector.load %arg3[%c22, %c0_135, %c0_136] : memref<25x1x48xf32, #tpu.memory_space<vmem>>, vector<1x1x48xf32>
    %189 = vector.shape_cast %188 : vector<1x1x48xf32> to vector<1x48xf32>
    %190 = vector.shape_cast %189 : vector<1x48xf32> to vector<1x1x48xf32>
    %191 = vector.broadcast %190 : vector<1x1x48xf32> to vector<8x8x48xf32>
    %192 = arith.mulf %187, %191 : vector<8x8x48xf32>
    %193 = arith.addf %185, %192 : vector<8x8x48xf32>
    %c4_137 = arith.constant 4 : index
    %c3_138 = arith.constant 3 : index
    %c0_139 = arith.constant 0 : index
    %194 = vector.load %arg5[%c4_137, %c3_138, %c0_139] : memref<12x12x48xbf16, #tpu.memory_space<vmem>>, vector<8x8x48xbf16>
    %195 = arith.extf %194 : vector<8x8x48xbf16> to vector<8x8x48xf32>
    %c23 = arith.constant 23 : index
    %c0_140 = arith.constant 0 : index
    %c0_141 = arith.constant 0 : index
    %196 = vector.load %arg3[%c23, %c0_140, %c0_141] : memref<25x1x48xf32, #tpu.memory_space<vmem>>, vector<1x1x48xf32>
    %197 = vector.shape_cast %196 : vector<1x1x48xf32> to vector<1x48xf32>
    %198 = vector.shape_cast %197 : vector<1x48xf32> to vector<1x1x48xf32>
    %199 = vector.broadcast %198 : vector<1x1x48xf32> to vector<8x8x48xf32>
    %200 = arith.mulf %195, %199 : vector<8x8x48xf32>
    %201 = arith.addf %193, %200 : vector<8x8x48xf32>
    %c4_142 = arith.constant 4 : index
    %c4_143 = arith.constant 4 : index
    %c0_144 = arith.constant 0 : index
    %202 = vector.load %arg5[%c4_142, %c4_143, %c0_144] : memref<12x12x48xbf16, #tpu.memory_space<vmem>>, vector<8x8x48xbf16>
    %203 = arith.extf %202 : vector<8x8x48xbf16> to vector<8x8x48xf32>
    %c24 = arith.constant 24 : index
    %c0_145 = arith.constant 0 : index
    %c0_146 = arith.constant 0 : index
    %204 = vector.load %arg3[%c24, %c0_145, %c0_146] : memref<25x1x48xf32, #tpu.memory_space<vmem>>, vector<1x1x48xf32>
    %205 = vector.shape_cast %204 : vector<1x1x48xf32> to vector<1x48xf32>
    %206 = vector.shape_cast %205 : vector<1x48xf32> to vector<1x1x48xf32>
    %207 = vector.broadcast %206 : vector<1x1x48xf32> to vector<8x8x48xf32>
    %208 = arith.mulf %203, %207 : vector<8x8x48xf32>
    %209 = arith.addf %201, %208 : vector<8x8x48xf32>
    %210 = arith.truncf %209 : vector<8x8x48xf32> to vector<8x8x48xbf16>
    %c0_147 = arith.constant 0 : index
    %c0_148 = arith.constant 0 : index
    %c0_149 = arith.constant 0 : index
    %c0_150 = arith.constant 0 : index
    %211 = vector.load %arg4[%c0_147, %c0_148, %c0_149, %c0_150] : memref<1x8x8x48xbf16, #tpu.memory_space<vmem>>, vector<1x8x8x48xbf16>
    %212 = vector.shape_cast %211 : vector<1x8x8x48xbf16> to vector<8x8x48xbf16>
    %213 = vector.shape_cast %210 : vector<8x8x48xbf16> to vector<1x8x8x48xbf16>
    tpu.vector_store %arg4[%c0_147, %c0_148, %c0_149, %c0_150], %213 {strides = array<i32>} : memref<1x8x8x48xbf16, #tpu.memory_space<vmem>>, vector<1x8x8x48xbf16>,
    return
  }
  func.func @transform_0(%arg0: i32, %arg1: i32) -> (i32, i32, i32, i32) {
    %c0_i32 = arith.constant 0 : i32
    %c0_i32_0 = arith.constant 0 : i32
    %c0_i32_1 = arith.constant 0 : i32
    return %arg0, %c0_i32, %c0_i32_0, %arg1 : i32, i32, i32, i32
  }
  func.func @transform_1(%arg0: i32, %arg1: i32) -> (i32, i32, i32) {
    %c0_i32 = arith.constant 0 : i32
    %c0_i32_0 = arith.constant 0 : i32
    %c0_i32_1 = arith.constant 0 : i32
    return %c0_i32, %c0_i32_0, %arg1 : i32, i32, i32
  }
  func.func @transform_2(%arg0: i32, %arg1: i32) -> (i32, i32, i32, i32) {
    %c0_i32 = arith.constant 0 : i32
    %c0_i32_0 = arith.constant 0 : i32
    %c0_i32_1 = arith.constant 0 : i32
    return %arg0, %c0_i32, %c0_i32_0, %arg1 : i32, i32, i32, i32
  }
}

module attributes {stable_mosaic.version = 11 : i64} {
  func.func @kernel(%arg0: i32, %arg1: memref<128x16xbf16, #tpu.memory_space<vmem>>, %arg2: memref<128x16xbf16, #tpu.memory_space<vmem>>, %arg3: memref<16x16xbf16, #tpu.memory_space<vmem>>, %arg4: memref<16x16xbf16, #tpu.memory_space<vmem>>, %arg5: memref<1x16xf32, #tpu.memory_space<vmem>>, %arg6: memref<1x16xf32, #tpu.memory_space<vmem>>, %arg7: memref<128x16xf32, #tpu.memory_space<vmem>>) attributes {dimension_semantics = [#tpu.dimension_semantics<parallel>], iteration_bounds = array<i64: 1>, scalar_prefetch = 0 : i64, scratch_operands = 0 : i64, tpu.core_type = #tpu.core_type<tc>, window_params = [{transform_indices = @transform_0, window_bounds = array<i64: 128, 16>}, {transform_indices = @transform_1, window_bounds = array<i64: 128, 16>}, {pipeline_mode = #tpu.pipeline_mode<synchronous>, transform_indices = @transform_2, window_bounds = array<i64: 16, 16>}, {pipeline_mode = #tpu.pipeline_mode<synchronous>, transform_indices = @transform_3, window_bounds = array<i64: 16, 16>}, {pipeline_mode = #tpu.pipeline_mode<synchronous>, transform_indices = @transform_4, window_bounds = array<i64: 1, 16>}, {pipeline_mode = #tpu.pipeline_mode<synchronous>, transform_indices = @transform_5, window_bounds = array<i64: 1, 16>}, {transform_indices = @transform_6, window_bounds = array<i64: 128, 16>}]} {
    %c0 = arith.constant 0 : index
    %c0_0 = arith.constant 0 : index
    %0 = vector.load %arg1[%c0, %c0_0] : memref<128x16xbf16, #tpu.memory_space<vmem>>, vector<128x16xbf16>
    %c0_1 = arith.constant 0 : index
    %c0_2 = arith.constant 0 : index
    %1 = vector.load %arg3[%c0_1, %c0_2] : memref<16x16xbf16, #tpu.memory_space<vmem>>, vector<16x16xbf16>
    %cst = arith.constant dense<0.000000e+00> : vector<128x16xf32>
    %2 = tpu.matmul %0, %1, %cst {dimension_numbers = #tpu.dot_dimension_numbers<[1], [0], [0], [1], [0, 0, 1, 1], [], []>} : vector<128x16xbf16>, vector<16x16xbf16>, vector<128x16xf32> -> vector<128x16xf32>
    %c0_3 = arith.constant 0 : index
    %c0_4 = arith.constant 0 : index
    %3 = vector.load %arg2[%c0_3, %c0_4] : memref<128x16xbf16, #tpu.memory_space<vmem>>, vector<128x16xbf16>
    %c0_5 = arith.constant 0 : index
    %c0_6 = arith.constant 0 : index
    %4 = vector.load %arg4[%c0_5, %c0_6] : memref<16x16xbf16, #tpu.memory_space<vmem>>, vector<16x16xbf16>
    %cst_7 = arith.constant dense<0.000000e+00> : vector<128x16xf32>
    %5 = tpu.matmul %3, %4, %cst_7 {dimension_numbers = #tpu.dot_dimension_numbers<[1], [0], [0], [1], [0, 0, 1, 1], [], []>} : vector<128x16xbf16>, vector<16x16xbf16>, vector<128x16xf32> -> vector<128x16xf32>
    %6 = arith.addf %2, %5 : vector<128x16xf32>
    %c0_8 = arith.constant 0 : index
    %c0_9 = arith.constant 0 : index
    %7 = vector.load %arg5[%c0_8, %c0_9] : memref<1x16xf32, #tpu.memory_space<vmem>>, vector<1x16xf32>
    %8 = vector.broadcast %7 : vector<1x16xf32> to vector<128x16xf32>
    %9 = arith.mulf %6, %8 : vector<128x16xf32>
    %c0_10 = arith.constant 0 : index
    %c0_11 = arith.constant 0 : index
    %10 = vector.load %arg6[%c0_10, %c0_11] : memref<1x16xf32, #tpu.memory_space<vmem>>, vector<1x16xf32>
    %11 = vector.broadcast %10 : vector<1x16xf32> to vector<128x16xf32>
    %12 = arith.addf %9, %11 : vector<128x16xf32>
    %c0_12 = arith.constant 0 : index
    %c0_13 = arith.constant 0 : index
    %13 = vector.load %arg7[%c0_12, %c0_13] : memref<128x16xf32, #tpu.memory_space<vmem>>, vector<128x16xf32>
    tpu.vector_store %arg7[%c0_12, %c0_13], %12 {strides = array<i32>} : memref<128x16xf32, #tpu.memory_space<vmem>>, vector<128x16xf32>,
    return
  }
  func.func @transform_0(%arg0: i32) -> (i32, i32) {
    %c0_i32 = arith.constant 0 : i32
    %c0_i32_0 = arith.constant 0 : i32
    return %arg0, %c0_i32 : i32, i32
  }
  func.func @transform_1(%arg0: i32) -> (i32, i32) {
    %c0_i32 = arith.constant 0 : i32
    %c0_i32_0 = arith.constant 0 : i32
    return %arg0, %c0_i32 : i32, i32
  }
  func.func @transform_2(%arg0: i32) -> (i32, i32) {
    %c0_i32 = arith.constant 0 : i32
    %c0_i32_0 = arith.constant 0 : i32
    %c0_i32_1 = arith.constant 0 : i32
    return %c0_i32, %c0_i32_0 : i32, i32
  }
  func.func @transform_3(%arg0: i32) -> (i32, i32) {
    %c0_i32 = arith.constant 0 : i32
    %c0_i32_0 = arith.constant 0 : i32
    %c0_i32_1 = arith.constant 0 : i32
    return %c0_i32, %c0_i32_0 : i32, i32
  }
  func.func @transform_4(%arg0: i32) -> (i32, i32) {
    %c0_i32 = arith.constant 0 : i32
    %c0_i32_0 = arith.constant 0 : i32
    %c0_i32_1 = arith.constant 0 : i32
    return %c0_i32, %c0_i32_0 : i32, i32
  }
  func.func @transform_5(%arg0: i32) -> (i32, i32) {
    %c0_i32 = arith.constant 0 : i32
    %c0_i32_0 = arith.constant 0 : i32
    %c0_i32_1 = arith.constant 0 : i32
    return %c0_i32, %c0_i32_0 : i32, i32
  }
  func.func @transform_6(%arg0: i32) -> (i32, i32) {
    %c0_i32 = arith.constant 0 : i32
    %c0_i32_0 = arith.constant 0 : i32
    return %arg0, %c0_i32 : i32, i32
  }
}

module attributes {stable_mosaic.version = 11 : i64} {
  func.func @_mla_kernel(%arg0: i32, %arg1: i32, %arg2: memref<1x64x48xbf16, #tpu.memory_space<vmem>>, %arg3: memref<1x64x48xbf16, #tpu.memory_space<vmem>>, %arg4: memref<2x3x8x8xbf16, #tpu.memory_space<vmem>>, %arg5: memref<1x64x16xbf16, #tpu.memory_space<vmem>>, %arg6: memref<1x64x16xbf16, #tpu.memory_space<vmem>>) attributes {dimension_semantics = [#tpu.dimension_semantics<parallel>, #tpu.dimension_semantics<parallel>], iteration_bounds = array<i64: 2, 1>, scalar_prefetch = 0 : i64, scratch_operands = 0 : i64, tpu.core_type = #tpu.core_type<tc>, window_params = [{transform_indices = @transform_0, window_bounds = array<i64: 1, 64, 48>}, {transform_indices = @transform_1, window_bounds = array<i64: 1, 64, 48>}, {transform_indices = @transform_2, window_bounds = array<i64: 2, 3, 8, 8>}, {transform_indices = @transform_3, window_bounds = array<i64: 1, 64, 16>}, {transform_indices = @transform_4, window_bounds = array<i64: 1, 64, 16>}]} {
    %c0 = arith.constant 0 : index
    %c0_0 = arith.constant 0 : index
    %c0_1 = arith.constant 0 : index
    %0 = vector.load %arg2[%c0, %c0_0, %c0_1] : memref<1x64x48xbf16, #tpu.memory_space<vmem>>, vector<1x64x8xbf16>
    %1 = vector.shape_cast %0 : vector<1x64x8xbf16> to vector<64x8xbf16>
    %c0_2 = arith.constant 0 : index
    %c0_3 = arith.constant 0 : index
    %c8 = arith.constant 8 : index
    %2 = vector.load %arg2[%c0_2, %c0_3, %c8] : memref<1x64x48xbf16, #tpu.memory_space<vmem>>, vector<1x64x8xbf16>
    %3 = vector.shape_cast %2 : vector<1x64x8xbf16> to vector<64x8xbf16>
    %c0_4 = arith.constant 0 : index
    %c0_5 = arith.constant 0 : index
    %c16 = arith.constant 16 : index
    %4 = vector.load %arg2[%c0_4, %c0_5, %c16] : memref<1x64x48xbf16, #tpu.memory_space<vmem>>, vector<1x64x8xbf16>
    %5 = vector.shape_cast %4 : vector<1x64x8xbf16> to vector<64x8xbf16>
    %cst = arith.constant 0.000000e+00 : bf16
    %6 = vector.broadcast %cst : bf16 to vector<64x8xbf16>
    %7 = arith.maximumf %1, %6 : vector<64x8xbf16>
    %cst_6 = arith.constant 0.000000e+00 : bf16
    %8 = vector.broadcast %cst_6 : bf16 to vector<64x8xbf16>
    %9 = arith.maximumf %3, %8 : vector<64x8xbf16>
    "tpu.trace_start"() <{level = 10 : i32, message = "nd,ne->de"}> : () -> ()
    %cst_7 = arith.constant dense<0.000000e+00> : vector<8x8xf32>
    %10 = tpu.matmul %5, %9, %cst_7 {dimension_numbers = #tpu.dot_dimension_numbers<[0], [0], [1], [1], [0, 1, 1, 1], [], []>} : vector<64x8xbf16>, vector<64x8xbf16>, vector<8x8xf32> -> vector<8x8xf32>
    "tpu.trace_stop"() : () -> ()
    %11 = arith.extf %9 : vector<64x8xbf16> to vector<64x8xf32>
    %cst_8 = arith.constant dense<0.000000e+00> : vector<8xf32>
    %12 = vector.multi_reduction <add>, %11, %cst_8 [0] : vector<64x8xf32> to vector<8xf32>
    %13 = vector.shape_cast %12 : vector<8xf32> to vector<1x8xf32>
    %14 = arith.truncf %10 : vector<8x8xf32> to vector<8x8xbf16>
    "tpu.trace_start"() <{level = 10 : i32, message = "ne,de->nd"}> : () -> ()
    %cst_9 = arith.constant dense<0.000000e+00> : vector<64x8xf32>
    %15 = tpu.matmul %7, %14, %cst_9 {dimension_numbers = #tpu.dot_dimension_numbers<[1], [1], [0], [0], [0, 0, 1, 0], [], []>} : vector<64x8xbf16>, vector<8x8xbf16>, vector<64x8xf32> -> vector<64x8xf32>
    "tpu.trace_stop"() : () -> ()
    %16 = arith.extf %7 : vector<64x8xbf16> to vector<64x8xf32>
    %17 = vector.broadcast %13 : vector<1x8xf32> to vector<64x8xf32>
    %18 = arith.mulf %16, %17 : vector<64x8xf32>
    %cst_10 = arith.constant dense<0.000000e+00> : vector<64xf32>
    %19 = vector.multi_reduction <add>, %18, %cst_10 [1] : vector<64x8xf32> to vector<64xf32>
    %20 = vector.shape_cast %19 : vector<64xf32> to vector<64x1xf32>
    %cst_11 = arith.constant 1.000000e-15 : f32
    %21 = vector.broadcast %cst_11 : f32 to vector<64x1xf32>
    %22 = arith.addf %20, %21 : vector<64x1xf32>
    %23 = tpu.reciprocal %22 {approx = true} : vector<64x1xf32> -> vector<64x1xf32>
    %24 = vector.broadcast %23 : vector<64x1xf32> to vector<64x8xf32>
    %25 = arith.mulf %15, %24 : vector<64x8xf32>
    %26 = arith.truncf %25 : vector<64x8xf32> to vector<64x8xbf16>
    %c0_12 = arith.constant 0 : index
    %c0_13 = arith.constant 0 : index
    %c0_14 = arith.constant 0 : index
    %27 = vector.load %arg5[%c0_12, %c0_13, %c0_14] : memref<1x64x16xbf16, #tpu.memory_space<vmem>>, vector<1x64x8xbf16>
    %28 = vector.shape_cast %27 : vector<1x64x8xbf16> to vector<64x8xbf16>
    %29 = vector.shape_cast %26 : vector<64x8xbf16> to vector<1x64x8xbf16>
    tpu.vector_store %arg5[%c0_12, %c0_13, %c0_14], %29 {strides = array<i32>} : memref<1x64x16xbf16, #tpu.memory_space<vmem>>, vector<1x64x8xbf16>,
    %c0_15 = arith.constant 0 : index
    %c0_16 = arith.constant 0 : index
    %c0_17 = arith.constant 0 : index
    %30 = vector.load %arg3[%c0_15, %c0_16, %c0_17] : memref<1x64x48xbf16, #tpu.memory_space<vmem>>, vector<1x64x8xbf16>
    %31 = vector.shape_cast %30 : vector<1x64x8xbf16> to vector<64x8xbf16>
    %c0_18 = arith.constant 0 : index
    %c0_19 = arith.constant 0 : index
    %c8_20 = arith.constant 8 : index
    %32 = vector.load %arg3[%c0_18, %c0_19, %c8_20] : memref<1x64x48xbf16, #tpu.memory_space<vmem>>, vector<1x64x8xbf16>
    %33 = vector.shape_cast %32 : vector<1x64x8xbf16> to vector<64x8xbf16>
    %c0_21 = arith.constant 0 : index
    %c0_22 = arith.constant 0 : index
    %c16_23 = arith.constant 16 : index
    %34 = vector.load %arg3[%c0_21, %c0_22, %c16_23] : memref<1x64x48xbf16, #tpu.memory_space<vmem>>, vector<1x64x8xbf16>
    %35 = vector.shape_cast %34 : vector<1x64x8xbf16> to vector<64x8xbf16>
    %c0_24 = arith.constant 0 : index
    %c0_25 = arith.constant 0 : index
    %c0_26 = arith.constant 0 : index
    %c0_27 = arith.constant 0 : index
    %36 = vector.load %arg4[%c0_24, %c0_25, %c0_26, %c0_27] : memref<2x3x8x8xbf16, #tpu.memory_space<vmem>>, vector<1x1x8x8xbf16>
    %37 = vector.shape_cast %36 : vector<1x1x8x8xbf16> to vector<8x8xbf16>
    "tpu.trace_start"() <{level = 10 : i32, message = "ni,oi->no"}> : () -> ()
    %cst_28 = arith.constant dense<0.000000e+00> : vector<64x8xf32>
    %38 = tpu.matmul %31, %37, %cst_28 {dimension_numbers = #tpu.dot_dimension_numbers<[1], [1], [0], [0], [0, 0, 1, 0], [], []>} : vector<64x8xbf16>, vector<8x8xbf16>, vector<64x8xf32> -> vector<64x8xf32>
    "tpu.trace_stop"() : () -> ()
    %c0_29 = arith.constant 0 : index
    %c1 = arith.constant 1 : index
    %c0_30 = arith.constant 0 : index
    %c0_31 = arith.constant 0 : index
    %39 = vector.load %arg4[%c0_29, %c1, %c0_30, %c0_31] : memref<2x3x8x8xbf16, #tpu.memory_space<vmem>>, vector<1x1x8x8xbf16>
    %40 = vector.shape_cast %39 : vector<1x1x8x8xbf16> to vector<8x8xbf16>
    "tpu.trace_start"() <{level = 10 : i32, message = "ni,oi->no"}> : () -> ()
    %cst_32 = arith.constant dense<0.000000e+00> : vector<64x8xf32>
    %41 = tpu.matmul %33, %40, %cst_32 {dimension_numbers = #tpu.dot_dimension_numbers<[1], [1], [0], [0], [0, 0, 1, 0], [], []>} : vector<64x8xbf16>, vector<8x8xbf16>, vector<64x8xf32> -> vector<64x8xf32>
    "tpu.trace_stop"() : () -> ()
    %c0_33 = arith.constant 0 : index
    %c2 = arith.constant 2 : index
    %c0_34 = arith.constant 0 : index
    %c0_35 = arith.constant 0 : index
    %42 = vector.load %arg4[%c0_33, %c2, %c0_34, %c0_35] : memref<2x3x8x8xbf16, #tpu.memory_space<vmem>>, vector<1x1x8x8xbf16>
    %43 = vector.shape_cast %42 : vector<1x1x8x8xbf16> to vector<8x8xbf16>
    "tpu.trace_start"() <{level = 10 : i32, message = "ni,oi->no"}> : () -> ()
    %cst_36 = arith.constant dense<0.000000e+00> : vector<64x8xf32>
    %44 = tpu.matmul %35, %43, %cst_36 {dimension_numbers = #tpu.dot_dimension_numbers<[1], [1], [0], [0], [0, 0, 1, 0], [], []>} : vector<64x8xbf16>, vector<8x8xbf16>, vector<64x8xf32> -> vector<64x8xf32>
    "tpu.trace_stop"() : () -> ()
    %cst_37 = arith.constant 0.000000e+00 : f32
    %45 = vector.broadcast %cst_37 : f32 to vector<64x8xf32>
    %46 = arith.maximumf %38, %45 : vector<64x8xf32>
    %cst_38 = arith.constant 0.000000e+00 : f32
    %47 = vector.broadcast %cst_38 : f32 to vector<64x8xf32>
    %48 = arith.maximumf %41, %47 : vector<64x8xf32>
    %49 = arith.truncf %46 : vector<64x8xf32> to vector<64x8xbf16>
    %50 = arith.truncf %48 : vector<64x8xf32> to vector<64x8xbf16>
    %51 = arith.truncf %44 : vector<64x8xf32> to vector<64x8xbf16>
    "tpu.trace_start"() <{level = 10 : i32, message = "nd,ne->de"}> : () -> ()
    %cst_39 = arith.constant dense<0.000000e+00> : vector<8x8xf32>
    %52 = tpu.matmul %51, %50, %cst_39 {dimension_numbers = #tpu.dot_dimension_numbers<[0], [0], [1], [1], [0, 1, 1, 1], [], []>} : vector<64x8xbf16>, vector<64x8xbf16>, vector<8x8xf32> -> vector<8x8xf32>
    "tpu.trace_stop"() : () -> ()
    %cst_40 = arith.constant dense<0.000000e+00> : vector<8xf32>
    %53 = vector.multi_reduction <add>, %48, %cst_40 [0] : vector<64x8xf32> to vector<8xf32>
    %54 = vector.shape_cast %53 : vector<8xf32> to vector<1x8xf32>
    %55 = arith.truncf %52 : vector<8x8xf32> to vector<8x8xbf16>
    "tpu.trace_start"() <{level = 10 : i32, message = "ne,de->nd"}> : () -> ()
    %cst_41 = arith.constant dense<0.000000e+00> : vector<64x8xf32>
    %56 = tpu.matmul %49, %55, %cst_41 {dimension_numbers = #tpu.dot_dimension_numbers<[1], [1], [0], [0], [0, 0, 1, 0], [], []>} : vector<64x8xbf16>, vector<8x8xbf16>, vector<64x8xf32> -> vector<64x8xf32>
    "tpu.trace_stop"() : () -> ()
    %57 = vector.broadcast %54 : vector<1x8xf32> to vector<64x8xf32>
    %58 = arith.mulf %46, %57 : vector<64x8xf32>
    %cst_42 = arith.constant dense<0.000000e+00> : vector<64xf32>
    %59 = vector.multi_reduction <add>, %58, %cst_42 [1] : vector<64x8xf32> to vector<64xf32>
    %60 = vector.shape_cast %59 : vector<64xf32> to vector<64x1xf32>
    %cst_43 = arith.constant 1.000000e-15 : f32
    %61 = vector.broadcast %cst_43 : f32 to vector<64x1xf32>
    %62 = arith.addf %60, %61 : vector<64x1xf32>
    %63 = tpu.reciprocal %62 {approx = true} : vector<64x1xf32> -> vector<64x1xf32>
    %64 = vector.broadcast %63 : vector<64x1xf32> to vector<64x8xf32>
    %65 = arith.mulf %56, %64 : vector<64x8xf32>
    %66 = arith.truncf %65 : vector<64x8xf32> to vector<64x8xbf16>
    %c0_44 = arith.constant 0 : index
    %c0_45 = arith.constant 0 : index
    %c0_46 = arith.constant 0 : index
    %67 = vector.load %arg6[%c0_44, %c0_45, %c0_46] : memref<1x64x16xbf16, #tpu.memory_space<vmem>>, vector<1x64x8xbf16>
    %68 = vector.shape_cast %67 : vector<1x64x8xbf16> to vector<64x8xbf16>
    %69 = vector.shape_cast %66 : vector<64x8xbf16> to vector<1x64x8xbf16>
    tpu.vector_store %arg6[%c0_44, %c0_45, %c0_46], %69 {strides = array<i32>} : memref<1x64x16xbf16, #tpu.memory_space<vmem>>, vector<1x64x8xbf16>,
    %c0_47 = arith.constant 0 : index
    %c0_48 = arith.constant 0 : index
    %c24 = arith.constant 24 : index
    %70 = vector.load %arg2[%c0_47, %c0_48, %c24] : memref<1x64x48xbf16, #tpu.memory_space<vmem>>, vector<1x64x8xbf16>
    %71 = vector.shape_cast %70 : vector<1x64x8xbf16> to vector<64x8xbf16>
    %c0_49 = arith.constant 0 : index
    %c0_50 = arith.constant 0 : index
    %c32 = arith.constant 32 : index
    %72 = vector.load %arg2[%c0_49, %c0_50, %c32] : memref<1x64x48xbf16, #tpu.memory_space<vmem>>, vector<1x64x8xbf16>
    %73 = vector.shape_cast %72 : vector<1x64x8xbf16> to vector<64x8xbf16>
    %c0_51 = arith.constant 0 : index
    %c0_52 = arith.constant 0 : index
    %c40 = arith.constant 40 : index
    %74 = vector.load %arg2[%c0_51, %c0_52, %c40] : memref<1x64x48xbf16, #tpu.memory_space<vmem>>, vector<1x64x8xbf16>
    %75 = vector.shape_cast %74 : vector<1x64x8xbf16> to vector<64x8xbf16>
    %cst_53 = arith.constant 0.000000e+00 : bf16
    %76 = vector.broadcast %cst_53 : bf16 to vector<64x8xbf16>
    %77 = arith.maximumf %71, %76 : vector<64x8xbf16>
    %cst_54 = arith.constant 0.000000e+00 : bf16
    %78 = vector.broadcast %cst_54 : bf16 to vector<64x8xbf16>
    %79 = arith.maximumf %73, %78 : vector<64x8xbf16>
    "tpu.trace_start"() <{level = 10 : i32, message = "nd,ne->de"}> : () -> ()
    %cst_55 = arith.constant dense<0.000000e+00> : vector<8x8xf32>
    %80 = tpu.matmul %75, %79, %cst_55 {dimension_numbers = #tpu.dot_dimension_numbers<[0], [0], [1], [1], [0, 1, 1, 1], [], []>} : vector<64x8xbf16>, vector<64x8xbf16>, vector<8x8xf32> -> vector<8x8xf32>
    "tpu.trace_stop"() : () -> ()
    %81 = arith.extf %79 : vector<64x8xbf16> to vector<64x8xf32>
    %cst_56 = arith.constant dense<0.000000e+00> : vector<8xf32>
    %82 = vector.multi_reduction <add>, %81, %cst_56 [0] : vector<64x8xf32> to vector<8xf32>
    %83 = vector.shape_cast %82 : vector<8xf32> to vector<1x8xf32>
    %84 = arith.truncf %80 : vector<8x8xf32> to vector<8x8xbf16>
    "tpu.trace_start"() <{level = 10 : i32, message = "ne,de->nd"}> : () -> ()
    %cst_57 = arith.constant dense<0.000000e+00> : vector<64x8xf32>
    %85 = tpu.matmul %77, %84, %cst_57 {dimension_numbers = #tpu.dot_dimension_numbers<[1], [1], [0], [0], [0, 0, 1, 0], [], []>} : vector<64x8xbf16>, vector<8x8xbf16>, vector<64x8xf32> -> vector<64x8xf32>
    "tpu.trace_stop"() : () -> ()
    %86 = arith.extf %77 : vector<64x8xbf16> to vector<64x8xf32>
    %87 = vector.broadcast %83 : vector<1x8xf32> to vector<64x8xf32>
    %88 = arith.mulf %86, %87 : vector<64x8xf32>
    %cst_58 = arith.constant dense<0.000000e+00> : vector<64xf32>
    %89 = vector.multi_reduction <add>, %88, %cst_58 [1] : vector<64x8xf32> to vector<64xf32>
    %90 = vector.shape_cast %89 : vector<64xf32> to vector<64x1xf32>
    %cst_59 = arith.constant 1.000000e-15 : f32
    %91 = vector.broadcast %cst_59 : f32 to vector<64x1xf32>
    %92 = arith.addf %90, %91 : vector<64x1xf32>
    %93 = tpu.reciprocal %92 {approx = true} : vector<64x1xf32> -> vector<64x1xf32>
    %94 = vector.broadcast %93 : vector<64x1xf32> to vector<64x8xf32>
    %95 = arith.mulf %85, %94 : vector<64x8xf32>
    %96 = arith.truncf %95 : vector<64x8xf32> to vector<64x8xbf16>
    %c0_60 = arith.constant 0 : index
    %c0_61 = arith.constant 0 : index
    %c8_62 = arith.constant 8 : index
    %97 = vector.load %arg5[%c0_60, %c0_61, %c8_62] : memref<1x64x16xbf16, #tpu.memory_space<vmem>>, vector<1x64x8xbf16>
    %98 = vector.shape_cast %97 : vector<1x64x8xbf16> to vector<64x8xbf16>
    %99 = vector.shape_cast %96 : vector<64x8xbf16> to vector<1x64x8xbf16>
    tpu.vector_store %arg5[%c0_60, %c0_61, %c8_62], %99 {strides = array<i32>} : memref<1x64x16xbf16, #tpu.memory_space<vmem>>, vector<1x64x8xbf16>,
    %c0_63 = arith.constant 0 : index
    %c0_64 = arith.constant 0 : index
    %c24_65 = arith.constant 24 : index
    %100 = vector.load %arg3[%c0_63, %c0_64, %c24_65] : memref<1x64x48xbf16, #tpu.memory_space<vmem>>, vector<1x64x8xbf16>
    %101 = vector.shape_cast %100 : vector<1x64x8xbf16> to vector<64x8xbf16>
    %c0_66 = arith.constant 0 : index
    %c0_67 = arith.constant 0 : index
    %c32_68 = arith.constant 32 : index
    %102 = vector.load %arg3[%c0_66, %c0_67, %c32_68] : memref<1x64x48xbf16, #tpu.memory_space<vmem>>, vector<1x64x8xbf16>
    %103 = vector.shape_cast %102 : vector<1x64x8xbf16> to vector<64x8xbf16>
    %c0_69 = arith.constant 0 : index
    %c0_70 = arith.constant 0 : index
    %c40_71 = arith.constant 40 : index
    %104 = vector.load %arg3[%c0_69, %c0_70, %c40_71] : memref<1x64x48xbf16, #tpu.memory_space<vmem>>, vector<1x64x8xbf16>
    %105 = vector.shape_cast %104 : vector<1x64x8xbf16> to vector<64x8xbf16>
    %c1_72 = arith.constant 1 : index
    %c0_73 = arith.constant 0 : index
    %c0_74 = arith.constant 0 : index
    %c0_75 = arith.constant 0 : index
    %106 = vector.load %arg4[%c1_72, %c0_73, %c0_74, %c0_75] : memref<2x3x8x8xbf16, #tpu.memory_space<vmem>>, vector<1x1x8x8xbf16>
    %107 = vector.shape_cast %106 : vector<1x1x8x8xbf16> to vector<8x8xbf16>
    "tpu.trace_start"() <{level = 10 : i32, message = "ni,oi->no"}> : () -> ()
    %cst_76 = arith.constant dense<0.000000e+00> : vector<64x8xf32>
    %108 = tpu.matmul %101, %107, %cst_76 {dimension_numbers = #tpu.dot_dimension_numbers<[1], [1], [0], [0], [0, 0, 1, 0], [], []>} : vector<64x8xbf16>, vector<8x8xbf16>, vector<64x8xf32> -> vector<64x8xf32>
    "tpu.trace_stop"() : () -> ()
    %c1_77 = arith.constant 1 : index
    %c1_78 = arith.constant 1 : index
    %c0_79 = arith.constant 0 : index
    %c0_80 = arith.constant 0 : index
    %109 = vector.load %arg4[%c1_77, %c1_78, %c0_79, %c0_80] : memref<2x3x8x8xbf16, #tpu.memory_space<vmem>>, vector<1x1x8x8xbf16>
    %110 = vector.shape_cast %109 : vector<1x1x8x8xbf16> to vector<8x8xbf16>
    "tpu.trace_start"() <{level = 10 : i32, message = "ni,oi->no"}> : () -> ()
    %cst_81 = arith.constant dense<0.000000e+00> : vector<64x8xf32>
    %111 = tpu.matmul %103, %110, %cst_81 {dimension_numbers = #tpu.dot_dimension_numbers<[1], [1], [0], [0], [0, 0, 1, 0], [], []>} : vector<64x8xbf16>, vector<8x8xbf16>, vector<64x8xf32> -> vector<64x8xf32>
    "tpu.trace_stop"() : () -> ()
    %c1_82 = arith.constant 1 : index
    %c2_83 = arith.constant 2 : index
    %c0_84 = arith.constant 0 : index
    %c0_85 = arith.constant 0 : index
    %112 = vector.load %arg4[%c1_82, %c2_83, %c0_84, %c0_85] : memref<2x3x8x8xbf16, #tpu.memory_space<vmem>>, vector<1x1x8x8xbf16>
    %113 = vector.shape_cast %112 : vector<1x1x8x8xbf16> to vector<8x8xbf16>
    "tpu.trace_start"() <{level = 10 : i32, message = "ni,oi->no"}> : () -> ()
    %cst_86 = arith.constant dense<0.000000e+00> : vector<64x8xf32>
    %114 = tpu.matmul %105, %113, %cst_86 {dimension_numbers = #tpu.dot_dimension_numbers<[1], [1], [0], [0], [0, 0, 1, 0], [], []>} : vector<64x8xbf16>, vector<8x8xbf16>, vector<64x8xf32> -> vector<64x8xf32>
    "tpu.trace_stop"() : () -> ()
    %cst_87 = arith.constant 0.000000e+00 : f32
    %115 = vector.broadcast %cst_87 : f32 to vector<64x8xf32>
    %116 = arith.maximumf %108, %115 : vector<64x8xf32>
    %cst_88 = arith.constant 0.000000e+00 : f32
    %117 = vector.broadcast %cst_88 : f32 to vector<64x8xf32>
    %118 = arith.maximumf %111, %117 : vector<64x8xf32>
    %119 = arith.truncf %116 : vector<64x8xf32> to vector<64x8xbf16>
    %120 = arith.truncf %118 : vector<64x8xf32> to vector<64x8xbf16>
    %121 = arith.truncf %114 : vector<64x8xf32> to vector<64x8xbf16>
    "tpu.trace_start"() <{level = 10 : i32, message = "nd,ne->de"}> : () -> ()
    %cst_89 = arith.constant dense<0.000000e+00> : vector<8x8xf32>
    %122 = tpu.matmul %121, %120, %cst_89 {dimension_numbers = #tpu.dot_dimension_numbers<[0], [0], [1], [1], [0, 1, 1, 1], [], []>} : vector<64x8xbf16>, vector<64x8xbf16>, vector<8x8xf32> -> vector<8x8xf32>
    "tpu.trace_stop"() : () -> ()
    %cst_90 = arith.constant dense<0.000000e+00> : vector<8xf32>
    %123 = vector.multi_reduction <add>, %118, %cst_90 [0] : vector<64x8xf32> to vector<8xf32>
    %124 = vector.shape_cast %123 : vector<8xf32> to vector<1x8xf32>
    %125 = arith.truncf %122 : vector<8x8xf32> to vector<8x8xbf16>
    "tpu.trace_start"() <{level = 10 : i32, message = "ne,de->nd"}> : () -> ()
    %cst_91 = arith.constant dense<0.000000e+00> : vector<64x8xf32>
    %126 = tpu.matmul %119, %125, %cst_91 {dimension_numbers = #tpu.dot_dimension_numbers<[1], [1], [0], [0], [0, 0, 1, 0], [], []>} : vector<64x8xbf16>, vector<8x8xbf16>, vector<64x8xf32> -> vector<64x8xf32>
    "tpu.trace_stop"() : () -> ()
    %127 = vector.broadcast %124 : vector<1x8xf32> to vector<64x8xf32>
    %128 = arith.mulf %116, %127 : vector<64x8xf32>
    %cst_92 = arith.constant dense<0.000000e+00> : vector<64xf32>
    %129 = vector.multi_reduction <add>, %128, %cst_92 [1] : vector<64x8xf32> to vector<64xf32>
    %130 = vector.shape_cast %129 : vector<64xf32> to vector<64x1xf32>
    %cst_93 = arith.constant 1.000000e-15 : f32
    %131 = vector.broadcast %cst_93 : f32 to vector<64x1xf32>
    %132 = arith.addf %130, %131 : vector<64x1xf32>
    %133 = tpu.reciprocal %132 {approx = true} : vector<64x1xf32> -> vector<64x1xf32>
    %134 = vector.broadcast %133 : vector<64x1xf32> to vector<64x8xf32>
    %135 = arith.mulf %126, %134 : vector<64x8xf32>
    %136 = arith.truncf %135 : vector<64x8xf32> to vector<64x8xbf16>
    %c0_94 = arith.constant 0 : index
    %c0_95 = arith.constant 0 : index
    %c8_96 = arith.constant 8 : index
    %137 = vector.load %arg6[%c0_94, %c0_95, %c8_96] : memref<1x64x16xbf16, #tpu.memory_space<vmem>>, vector<1x64x8xbf16>
    %138 = vector.shape_cast %137 : vector<1x64x8xbf16> to vector<64x8xbf16>
    %139 = vector.shape_cast %136 : vector<64x8xbf16> to vector<1x64x8xbf16>
    tpu.vector_store %arg6[%c0_94, %c0_95, %c8_96], %139 {strides = array<i32>} : memref<1x64x16xbf16, #tpu.memory_space<vmem>>, vector<1x64x8xbf16>,
    return
  }
  func.func @transform_0(%arg0: i32, %arg1: i32) -> (i32, i32, i32) {
    %c0_i32 = arith.constant 0 : i32
    %c0_i32_0 = arith.constant 0 : i32
    return %arg0, %c0_i32, %arg1 : i32, i32, i32
  }
  func.func @transform_1(%arg0: i32, %arg1: i32) -> (i32, i32, i32) {
    %c0_i32 = arith.constant 0 : i32
    %c0_i32_0 = arith.constant 0 : i32
    return %arg0, %c0_i32, %arg1 : i32, i32, i32
  }
  func.func @transform_2(%arg0: i32, %arg1: i32) -> (i32, i32, i32, i32) {
    %c0_i32 = arith.constant 0 : i32
    %c0_i32_0 = arith.constant 0 : i32
    %c0_i32_1 = arith.constant 0 : i32
    %c0_i32_2 = arith.constant 0 : i32
    return %arg1, %c0_i32, %c0_i32_0, %c0_i32_1 : i32, i32, i32, i32
  }
  func.func @transform_3(%arg0: i32, %arg1: i32) -> (i32, i32, i32) {
    %c0_i32 = arith.constant 0 : i32
    %c0_i32_0 = arith.constant 0 : i32
    return %arg0, %c0_i32, %arg1 : i32, i32, i32
  }
  func.func @transform_4(%arg0: i32, %arg1: i32) -> (i32, i32, i32) {
    %c0_i32 = arith.constant 0 : i32
    %c0_i32_0 = arith.constant 0 : i32
    return %arg0, %c0_i32, %arg1 : i32, i32, i32
  }
}

</mosaic_0001>

<bundles_post_ra>
// kernel: _lambda_.4
= control target key start
LH: loop header
LB: loop body
LE: loop exit
PB: predicated region body
PF: predicated region fallthrough
CT: control target
= control target key end

     0   :  { %vm82_vm0 = vcmask 130048   ;;  %vm212_vm1 = vcmask 388096   ;;  %s457_s1 = inlined_call_operand.vmem [shape: bf16[16,48], index: 1, kind: input, shape index: {}]   ;;  %s458_s0 = inlined_call_operand.vmem [shape: bf16[128,16], index: 0, kind: input, shape index: {}]   ;;  %s459_s2 = inlined_call_operand.vmem [shape: f32[1,48], index: 2, kind: input, shape index: {}]   ;;  %s460_s3 = inlined_call_operand.vmem [shape: f32[1,48], index: 3, kind: input, shape index: {}]   ;;  %s461_s4 = inlined_call_operand.vmem [shape: bf16[128,48], index: 4, kind: output, shape index: {}]  }
   0x1   :  { %v285_v0 = vld [vmem:[%s457_s1] sm:$0xff]  ;;  %v279_v2 = vld [vmem:[%s458_s0 + $0x10] sm:$0xff]  ;;  %v278_v5 = vld [vmem:[%s458_s0 + $0x8] sm:$0xff] }
   0x2   :  { %v277_v1 = vld [vmem:[%s458_s0] sm:$0xff]  ;;  %114 = vmatpush.bf16.msra.mxu0 %v285_v0  ;;  %286 = vmatpush.bf16.msra.mxu1 %v285_v0  ;;  %v283_v4 = vld [vmem:[%s458_s0 + $0x30] sm:$0xff]  ;;  %v280_v6 = vld [vmem:[%s458_s0 + $0x18] sm:$0xff] }
   0x3   :  { %v281_v3 = vld [vmem:[%s458_s0 + $0x20] sm:$0xff]  ;;  %287 = vmatpush.bf16.msra.mxu2 %v285_v0  ;;  %288 = vmatpush.bf16.msra.mxu3 %v285_v0  ;;  %v282_v7 = vld [vmem:[%s458_s0 + $0x28] sm:$0xff]  ;;  %v284_v8 = vld [vmem:[%s458_s0 + $0x38] sm:$0xff] }
   0x4   :  { %v354_v9 = vld [vmem:[%s459_s2] ss:$0 sm:$0xff] }
   0x5   :  { %269 = vmatmul.msk.bf16.vlgmr.msra.gmra.mxu0 %vm82_vm0, %v277_v1  ;;  %271 = vmatmul.msk.bf16.vlgmr.msra.gmra.mxu1 %vm82_vm0, %v279_v2  ;;  %v359_v10 = vld [vmem:[%s460_s3] ss:$0 sm:$0xff] }
   0x6   :  { %273 = vmatmul.msk.bf16.vlgmr.msra.gmra.mxu2 %vm82_vm0, %v281_v3  ;;  %275 = vmatmul.msk.bf16.vlgmr.msra.gmra.mxu3 %vm82_vm0, %v283_v4 }
  0x15   :  { %270 = vmatmul.msk.bf16.gmra.mxu0 %vm82_vm0, %v278_v5  ;;  %272 = vmatmul.msk.bf16.gmra.mxu1 %vm82_vm0, %v280_v6 }
  0x16   :  { %274 = vmatmul.msk.bf16.gmra.mxu2 %vm82_vm0, %v282_v7  ;;  %276 = vmatmul.msk.bf16.gmra.mxu3 %vm82_vm0, %v284_v8 }
  0x82   :  { %v116_v11 = vpop.f32.mrf.mxu0  ;;  %v126_v12 = vpop.f32.mrf.mxu1 }
  0x83   :  { %v160_v13 = vmul.f32 %v354_v9, %v116_v11  ;;  %v164_v14 = vmul.f32 %v354_v9, %v126_v12 }
  0x85   :  { %v180_v15 = vadd.f32 %v359_v10, %v160_v13  ;;  %v184_v16 = vadd.f32 %v359_v10, %v164_v14 }
  0x87   :  { %v196_v17 = vpack.c.bf16 %v180_v15, %v180_v15  ;;  %v200_v18 = vpack.c.bf16 %v184_v16, %v184_v16 }
  0x89   :  { %213 = vst.msk [vmem:[%s461_s4] sm:$0xf] %vm212_vm1, %v196_v17  ;;  %v136_v19 = vpop.f32.mrf.mxu2  ;;  %v146_v20 = vpop.f32.mrf.mxu3 }
  0x8a   :  { %217 = vst.msk [vmem:[%s461_s4 + $0x10] sm:$0xf] %vm212_vm1, %v200_v18  ;;  %v168_v21 = vmul.f32 %v354_v9, %v136_v19  ;;  %v172_v22 = vmul.f32 %v354_v9, %v146_v20  ;;  %v118_v23 = vpop.f32.mrf.mxu0  ;;  %v128_v24 = vpop.f32.mrf.mxu1 }
  0x8b   :  { %v161_v25 = vmul.f32 %v354_v9, %v118_v23  ;;  %v165_v26 = vmul.f32 %v354_v9, %v128_v24 }
  0x8c   :  { %v188_v27 = vadd.f32 %v359_v10, %v168_v21  ;;  %v192_v28 = vadd.f32 %v359_v10, %v172_v22 }
  0x8d   :  { %v181_v29 = vadd.f32 %v359_v10, %v161_v25  ;;  %v185_v30 = vadd.f32 %v359_v10, %v165_v26 }
  0x8e   :  { %v204_v31 = vpack.c.bf16 %v188_v27, %v188_v27  ;;  %v208_v32 = vpack.c.bf16 %v192_v28, %v192_v28 }
  0x8f   :  { %v197_v33 = vpack.c.bf16 %v181_v29, %v181_v29  ;;  %v201_v34 = vpack.c.bf16 %v185_v30, %v185_v30 }
  0x90   :  { %221 = vst.msk [vmem:[%s461_s4 + $0x20] sm:$0xf] %vm212_vm1, %v204_v31 }
  0x91   :  { %225 = vst.msk [vmem:[%s461_s4 + $0x30] sm:$0xf] %vm212_vm1, %v208_v32  ;;  %v138_v35 = vpop.f32.mrf.mxu2  ;;  %v148_v36 = vpop.f32.mrf.mxu3 }
  0x92   :  { %214 = vst.msk [vmem:[%s461_s4 + $0x4] sm:$0xf] %vm212_vm1, %v197_v33  ;;  %v169_v37 = vmul.f32 %v354_v9, %v138_v35  ;;  %v173_v38 = vmul.f32 %v354_v9, %v148_v36  ;;  %v121_v39 = vpop.f32.mrf.mxu0  ;;  %v131_v40 = vpop.f32.mrf.mxu1 }
  0x93   :  { %218 = vst.msk [vmem:[%s461_s4 + $0x14] sm:$0xf] %vm212_vm1, %v201_v34  ;;  %v162_v41 = vmul.f32 %v354_v9, %v121_v39  ;;  %v166_v42 = vmul.f32 %v354_v9, %v131_v40 }
  0x94   :  { %v189_v43 = vadd.f32 %v359_v10, %v169_v37  ;;  %v193_v44 = vadd.f32 %v359_v10, %v173_v38 }
  0x95   :  { %v182_v45 = vadd.f32 %v359_v10, %v162_v41  ;;  %v186_v46 = vadd.f32 %v359_v10, %v166_v42 }
  0x96   :  { %v205_v47 = vpack.c.bf16 %v189_v43, %v189_v43  ;;  %v209_v48 = vpack.c.bf16 %v193_v44, %v193_v44 }
  0x97   :  { %v198_v49 = vpack.c.bf16 %v182_v45, %v182_v45  ;;  %v202_v50 = vpack.c.bf16 %v186_v46, %v186_v46 }
  0x98   :  { %222 = vst.msk [vmem:[%s461_s4 + $0x24] sm:$0xf] %vm212_vm1, %v205_v47 }
  0x99   :  { %226 = vst.msk [vmem:[%s461_s4 + $0x34] sm:$0xf] %vm212_vm1, %v209_v48  ;;  %v141_v51 = vpop.f32.mrf.mxu2  ;;  %v151_v52 = vpop.f32.mrf.mxu3 }
  0x9a   :  { %215 = vst.msk [vmem:[%s461_s4 + $0x8] sm:$0xf] %vm212_vm1, %v198_v49  ;;  %v170_v53 = vmul.f32 %v354_v9, %v141_v51  ;;  %v174_v54 = vmul.f32 %v354_v9, %v151_v52  ;;  %v123_v55 = vpop.f32.mrf.mxu0  ;;  %v133_v56 = vpop.f32.mrf.mxu1 }
  0x9b   :  { %219 = vst.msk [vmem:[%s461_s4 + $0x18] sm:$0xf] %vm212_vm1, %v202_v50  ;;  %v163_v57 = vmul.f32 %v354_v9, %v123_v55  ;;  %v167_v58 = vmul.f32 %v354_v9, %v133_v56 }
  0x9c   :  { %v190_v59 = vadd.f32 %v359_v10, %v170_v53  ;;  %v194_v60 = vadd.f32 %v359_v10, %v174_v54 }
  0x9d   :  { %v183_v61 = vadd.f32 %v359_v10, %v163_v57  ;;  %v187_v62 = vadd.f32 %v359_v10, %v167_v58 }
  0x9e   :  { %v206_v63 = vpack.c.bf16 %v190_v59, %v190_v59  ;;  %v210_v0 = vpack.c.bf16 %v194_v60, %v194_v60 }
  0x9f   :  { %v199_v1 = vpack.c.bf16 %v183_v61, %v183_v61  ;;  %v203_v2 = vpack.c.bf16 %v187_v62, %v187_v62 }
  0xa0   :  { %223 = vst.msk [vmem:[%s461_s4 + $0x28] sm:$0xf] %vm212_vm1, %v206_v63 }
  0xa1   :  { %227 = vst.msk [vmem:[%s461_s4 + $0x38] sm:$0xf] %vm212_vm1, %v210_v0  ;;  %v143_v3 = vpop.f32.mrf.mxu2  ;;  %v153_v4 = vpop.f32.mrf.mxu3 }
  0xa2   :  { %216 = vst.msk [vmem:[%s461_s4 + $0xc] sm:$0xf] %vm212_vm1, %v199_v1  ;;  %v171_v5 = vmul.f32 %v354_v9, %v143_v3  ;;  %v175_v6 = vmul.f32 %v354_v9, %v153_v4 }
  0xa3   :  { %220 = vst.msk [vmem:[%s461_s4 + $0x1c] sm:$0xf] %vm212_vm1, %v203_v2 }
  0xa4   :  { %v191_v7 = vadd.f32 %v359_v10, %v171_v5  ;;  %v195_v8 = vadd.f32 %v359_v10, %v175_v6 }
  0xa6   :  { %v207_v11 = vpack.c.bf16 %v191_v7, %v191_v7  ;;  %v211_v12 = vpack.c.bf16 %v195_v8, %v195_v8 }
  0xa8   :  { %224 = vst.msk [vmem:[%s461_s4 + $0x2c] sm:$0xf] %vm212_vm1, %v207_v11 }
  0xa9   :  { %228 = vst.msk [vmem:[%s461_s4 + $0x3c] sm:$0xf] %vm212_vm1, %v211_v12 }

// kernel: _lambda_.7
= control target key start
LH: loop header
LB: loop body
LE: loop exit
PB: predicated region body
PF: predicated region fallthrough
CT: control target
= control target key end

     0   :  { %vm107_vm0 = vcmask 130048   ;;  %s682_s0 = inlined_call_operand.vmem [shape: bf16[128,16], index: 0, kind: input, shape index: {}]   ;;  %s683_s1 = inlined_call_operand.vmem [shape: bf16[128,16], index: 1, kind: input, shape index: {}]   ;;  %s684_s2 = inlined_call_operand.vmem [shape: bf16[16,16], index: 2, kind: input, shape index: {}]   ;;  %s685_s3 = inlined_call_operand.vmem [shape: bf16[16,16], index: 3, kind: input, shape index: {}]   ;;  %s686_s4 = inlined_call_operand.vmem [shape: f32[1,16], index: 4, kind: input, shape index: {}]   ;;  %s687_s5 = inlined_call_operand.vmem [shape: f32[1,16], index: 5, kind: input, shape index: {}]   ;;  %s688_s6 = inlined_call_operand.hbm [shape: f32[128,16], index: 6, kind: output, shape index: {}]  }
   0x1   :  { %v479_v0 = vld [vmem:[%s685_s3] sm:$0xff] }
   0x2   :  { %v470_v1 = vld [vmem:[%s684_s2] sm:$0xff]  ;;  %139 = vmatpush.bf16.msra.mxu0 %v479_v0  ;;  %480 = vmatpush.bf16.msra.mxu2 %v479_v0 }
   0x3   :  { %v471_v2 = vld [vmem:[%s683_s1] sm:$0xff]  ;;  %258 = vmatpush.bf16.msra.mxu1 %v470_v1  ;;  %481 = vmatpush.bf16.msra.mxu3 %v470_v1 }
   0x4   :  { %v475_v3 = vld [vmem:[%s683_s1 + $0x20] sm:$0xff] }
   0x5   :  { %v462_v4 = vld [vmem:[%s682_s0] sm:$0xff]  ;;  %410 = vmatmul.msk.bf16.vlgmr.msra.gmra.mxu0 %vm107_vm0, %v471_v2  ;;  %414 = vmatmul.msk.bf16.vlgmr.msra.gmra.mxu2 %vm107_vm0, %v475_v3 }
   0x6   :  { %v466_v5 = vld [vmem:[%s682_s0 + $0x20] sm:$0xff] }
   0x7   :  { %11 = vsyncpa [#allocation3], 0  ;;  %454 = vmatmul.msk.bf16.vlgmr.msra.gmra.mxu1 %vm107_vm0, %v462_v4  ;;  %458 = vmatmul.msk.bf16.vlgmr.msra.gmra.mxu3 %vm107_vm0, %v466_v5  ;;  %v472_v6 = vld [vmem:[%s683_s1 + $0x8] sm:$0xff]  ;;  %v473_v10 = vld [vmem:[%s683_s1 + $0x10] sm:$0xff]  ;;  %s362_s9 = sshll.u32 %s688_s6, 4  ;;  %s514_s10 = smov 128   ;;  %s363_s9 = int_to_ptr.hbm [resolvable:$true] %s362_s9 }
   0x8   :  { %v476_v7 = vld [vmem:[%s683_s1 + $0x28] sm:$0xff]  ;;  %v477_v11 = vld [vmem:[%s683_s1 + $0x30] sm:$0xff]  ;;  %v474_v14 = vld [vmem:[%s683_s1 + $0x18] sm:$0xff]  ;;  %s515_s11 = smov 8  }
   0x9   :  { %v463_v8 = vld [vmem:[%s682_s0 + $0x8] sm:$0xff]  ;;  %v464_v12 = vld [vmem:[%s682_s0 + $0x10] sm:$0xff]  ;;  %v478_v15 = vld [vmem:[%s683_s1 + $0x38] sm:$0xff] }
   0xa   :  { %v467_v9 = vld [vmem:[%s682_s0 + $0x28] sm:$0xff]  ;;  %v468_v13 = vld [vmem:[%s682_s0 + $0x30] sm:$0xff]  ;;  %v465_v16 = vld [vmem:[%s682_s0 + $0x18] sm:$0xff] }
   0xb   :  { %v469_v17 = vld [vmem:[%s682_s0 + $0x38] sm:$0xff]  ;;  %v624_v19 = vld [vmem:[%s686_s4] ss:$0 sm:$0xff]  ;;  %s513_s0 = smov [#allocation2]  }
   0xc   :  { %v629_v22 = vld [vmem:[%s687_s5] ss:$0 sm:$0xff]  ;;  %s360_s4 = sshll.u32 %s513_s0, 4  ;;  %s361_s4 = int_to_ptr.vmem [resolvable:$true] %s360_s4 }
  0x15   :  { %411 = vmatmul.msk.bf16.gmra.mxu0 %vm107_vm0, %v472_v6  ;;  %415 = vmatmul.msk.bf16.gmra.mxu2 %vm107_vm0, %v476_v7 }
  0x17   :  { %455 = vmatmul.msk.bf16.gmra.mxu1 %vm107_vm0, %v463_v8  ;;  %459 = vmatmul.msk.bf16.gmra.mxu3 %vm107_vm0, %v467_v9 }
  0x25   :  { %412 = vmatmul.msk.bf16.gmra.mxu0 %vm107_vm0, %v473_v10  ;;  %416 = vmatmul.msk.bf16.gmra.mxu2 %vm107_vm0, %v477_v11 }
  0x27   :  { %456 = vmatmul.msk.bf16.gmra.mxu1 %vm107_vm0, %v464_v12  ;;  %460 = vmatmul.msk.bf16.gmra.mxu3 %vm107_vm0, %v468_v13 }
  0x35   :  { %413 = vmatmul.msk.bf16.gmra.mxu0 %vm107_vm0, %v474_v14  ;;  %417 = vmatmul.msk.bf16.gmra.mxu2 %vm107_vm0, %v478_v15 }
  0x37   :  { %457 = vmatmul.msk.bf16.gmra.mxu1 %vm107_vm0, %v465_v16  ;;  %461 = vmatmul.msk.bf16.gmra.mxu3 %vm107_vm0, %v469_v17 }
  0x82   :  { %v141_v18 = vpop.f32.mrf.mxu0 }
  0x84   :  { %v260_v20 = vpop.f32.mrf.mxu1 }
  0x85   :  { %v261_v21 = vadd.f32 %v260_v20, %v141_v18 }
  0x87   :  { %v304_v23 = vmul.f32 %v624_v19, %v261_v21 }
  0x88   :  { %v161_v25 = vpop.f32.mrf.mxu2 }
  0x89   :  { %v324_v24 = vadd.f32 %v629_v22, %v304_v23 }
  0x8a   :  { %v280_v26 = vpop.f32.mrf.mxu3  ;;  %v143_v28 = vpop.f32.mrf.mxu0 }
  0x8b   :  { %340 = vst.msk [vmem:[#allocation2] sm:$0xff] %vm107_vm0, %v324_v24  ;;  %v281_v27 = vadd.f32 %v280_v26, %v161_v25 }
  0x8c   :  { %v262_v29 = vpop.f32.mrf.mxu1 }
  0x8d   :  { %v312_v30 = vmul.f32 %v624_v19, %v281_v27  ;;  %v263_v31 = vadd.f32 %v262_v29, %v143_v28 }
  0x8f   :  { %v332_v32 = vadd.f32 %v629_v22, %v312_v30  ;;  %v305_v33 = vmul.f32 %v624_v19, %v263_v31 }
  0x90   :  { %v163_v35 = vpop.f32.mrf.mxu2 }
  0x91   :  { %348 = vst.msk [vmem:[#allocation2 + $0x40] sm:$0xff] %vm107_vm0, %v332_v32  ;;  %v325_v34 = vadd.f32 %v629_v22, %v305_v33 }
  0x92   :  { %v282_v36 = vpop.f32.mrf.mxu3  ;;  %v146_v38 = vpop.f32.mrf.mxu0 }
  0x93   :  { %341 = vst.msk [vmem:[#allocation2 + $0x8] sm:$0xff] %vm107_vm0, %v325_v34  ;;  %v283_v37 = vadd.f32 %v282_v36, %v163_v35 }
  0x94   :  { %v265_v39 = vpop.f32.mrf.mxu1 }
  0x95   :  { %v313_v40 = vmul.f32 %v624_v19, %v283_v37  ;;  %v266_v41 = vadd.f32 %v265_v39, %v146_v38 }
  0x97   :  { %v333_v42 = vadd.f32 %v629_v22, %v313_v40  ;;  %v306_v43 = vmul.f32 %v624_v19, %v266_v41 }
  0x98   :  { %v166_v45 = vpop.f32.mrf.mxu2 }
  0x99   :  { %349 = vst.msk [vmem:[#allocation2 + $0x48] sm:$0xff] %vm107_vm0, %v333_v42  ;;  %v326_v44 = vadd.f32 %v629_v22, %v306_v43 }
  0x9a   :  { %v285_v46 = vpop.f32.mrf.mxu3  ;;  %v148_v48 = vpop.f32.mrf.mxu0 }
  0x9b   :  { %342 = vst.msk [vmem:[#allocation2 + $0x10] sm:$0xff] %vm107_vm0, %v326_v44  ;;  %v286_v47 = vadd.f32 %v285_v46, %v166_v45 }
  0x9c   :  { %v267_v49 = vpop.f32.mrf.mxu1 }
  0x9d   :  { %v314_v50 = vmul.f32 %v624_v19, %v286_v47  ;;  %v268_v51 = vadd.f32 %v267_v49, %v148_v48 }
  0x9f   :  { %v334_v52 = vadd.f32 %v629_v22, %v314_v50  ;;  %v307_v53 = vmul.f32 %v624_v19, %v268_v51 }
  0xa0   :  { %v168_v55 = vpop.f32.mrf.mxu2 }
  0xa1   :  { %350 = vst.msk [vmem:[#allocation2 + $0x50] sm:$0xff] %vm107_vm0, %v334_v52  ;;  %v327_v54 = vadd.f32 %v629_v22, %v307_v53 }
  0xa2   :  { %v287_v56 = vpop.f32.mrf.mxu3  ;;  %v151_v58 = vpop.f32.mrf.mxu0 }
  0xa3   :  { %343 = vst.msk [vmem:[#allocation2 + $0x18] sm:$0xff] %vm107_vm0, %v327_v54  ;;  %v288_v57 = vadd.f32 %v287_v56, %v168_v55 }
  0xa4   :  { %v270_v59 = vpop.f32.mrf.mxu1 }
  0xa5   :  { %v315_v60 = vmul.f32 %v624_v19, %v288_v57  ;;  %v271_v61 = vadd.f32 %v270_v59, %v151_v58 }
  0xa7   :  { %v335_v62 = vadd.f32 %v629_v22, %v315_v60  ;;  %v308_v63 = vmul.f32 %v624_v19, %v271_v61 }
  0xa8   :  { %v171_v1 = vpop.f32.mrf.mxu2 }
  0xa9   :  { %351 = vst.msk [vmem:[#allocation2 + $0x58] sm:$0xff] %vm107_vm0, %v335_v62  ;;  %v328_v0 = vadd.f32 %v629_v22, %v308_v63 }
  0xaa   :  { %v290_v2 = vpop.f32.mrf.mxu3  ;;  %v153_v4 = vpop.f32.mrf.mxu0 }
  0xab   :  { %344 = vst.msk [vmem:[#allocation2 + $0x20] sm:$0xff] %vm107_vm0, %v328_v0  ;;  %v291_v3 = vadd.f32 %v290_v2, %v171_v1 }
  0xac   :  { %v272_v5 = vpop.f32.mrf.mxu1 }
  0xad   :  { %v316_v6 = vmul.f32 %v624_v19, %v291_v3  ;;  %v273_v7 = vadd.f32 %v272_v5, %v153_v4 }
  0xaf   :  { %v336_v8 = vadd.f32 %v629_v22, %v316_v6  ;;  %v309_v9 = vmul.f32 %v624_v19, %v273_v7 }
  0xb0   :  { %v173_v11 = vpop.f32.mrf.mxu2 }
  0xb1   :  { %352 = vst.msk [vmem:[#allocation2 + $0x60] sm:$0xff] %vm107_vm0, %v336_v8  ;;  %v329_v10 = vadd.f32 %v629_v22, %v309_v9 }
  0xb2   :  { %v292_v12 = vpop.f32.mrf.mxu3  ;;  %v156_v14 = vpop.f32.mrf.mxu0 }
  0xb3   :  { %345 = vst.msk [vmem:[#allocation2 + $0x28] sm:$0xff] %vm107_vm0, %v329_v10  ;;  %v293_v13 = vadd.f32 %v292_v12, %v173_v11 }
  0xb4   :  { %v275_v15 = vpop.f32.mrf.mxu1 }
  0xb5   :  { %v317_v16 = vmul.f32 %v624_v19, %v293_v13  ;;  %v276_v17 = vadd.f32 %v275_v15, %v156_v14 }
  0xb7   :  { %v337_v18 = vadd.f32 %v629_v22, %v317_v16  ;;  %v310_v20 = vmul.f32 %v624_v19, %v276_v17 }
  0xb8   :  { %v176_v23 = vpop.f32.mrf.mxu2 }
  0xb9   :  { %353 = vst.msk [vmem:[#allocation2 + $0x68] sm:$0xff] %vm107_vm0, %v337_v18  ;;  %v330_v21 = vadd.f32 %v629_v22, %v310_v20 }
  0xba   :  { %v295_v24 = vpop.f32.mrf.mxu3  ;;  %v158_v26 = vpop.f32.mrf.mxu0 }
  0xbb   :  { %346 = vst.msk [vmem:[#allocation2 + $0x30] sm:$0xff] %vm107_vm0, %v330_v21  ;;  %v296_v25 = vadd.f32 %v295_v24, %v176_v23 }
  0xbc   :  { %v277_v27 = vpop.f32.mrf.mxu1 }
  0xbd   :  { %v318_v28 = vmul.f32 %v624_v19, %v296_v25  ;;  %v278_v29 = vadd.f32 %v277_v27, %v158_v26 }
  0xbf   :  { %v338_v30 = vadd.f32 %v629_v22, %v318_v28  ;;  %v311_v31 = vmul.f32 %v624_v19, %v278_v29 }
  0xc0   :  { %v178_v33 = vpop.f32.mrf.mxu2 }
  0xc1   :  { %354 = vst.msk [vmem:[#allocation2 + $0x70] sm:$0xff] %vm107_vm0, %v338_v30  ;;  %v331_v32 = vadd.f32 %v629_v22, %v311_v31 }
  0xc2   :  { %v297_v34 = vpop.f32.mrf.mxu3 }
  0xc3   :  { %347 = vst.msk [vmem:[#allocation2 + $0x38] sm:$0xff] %vm107_vm0, %v331_v32  ;;  %v298_v35 = vadd.f32 %v297_v34, %v178_v33 }
  0xc5   :  { %v319_v36 = vmul.f32 %v624_v19, %v298_v35 }
  0xc7   :  { %v339_v37 = vadd.f32 %v629_v22, %v319_v36 }
  0xc9   :  { %355 = vst.msk [vmem:[#allocation2 + $0x78] sm:$0xff] %vm107_vm0, %v339_v37 }
  0xca   :  { %368 = dma.vmem_to_hbm [thread:$0]  %s361_s4, 2048, %s363_s9, [#allocation3], %s514_s10, %s514_s10, %s515_s11  }
  0xcb   :  { %511 = dma.done.wait [#allocation3], 2048  }
  0xcc   :  { %512 = vsyncadd [#allocation3], 4294965248 }
  0xcd   :  { %373 = vsyncpa [#allocation3], 1 }

// kernel: _lambda_.6
= control target key start
LH: loop header
LB: loop body
LE: loop exit
PB: predicated region body
PF: predicated region fallthrough
CT: control target
= control target key end

     0   :  { %s2236_s15 = smov 0   ;;  %s2238_s16 = smov 0   ;;  %s3035_s0 = inlined_call_operand.vmem [shape: bf16[2,64,48], index: 0, kind: input, shape index: {}]   ;;  %s3036_s1 = inlined_call_operand.vmem [shape: bf16[2,64,48], index: 1, kind: input, shape index: {}]   ;;  %s3037_s2 = inlined_call_operand.vmem [shape: bf16[2,3,8,8], index: 2, kind: input, shape index: {}]   ;;  %s3038_s3 = inlined_call_operand.vmem [shape: bf16[2,64,16], index: 3, kind: output, shape index: {0}]   ;;  %s3039_s4 = inlined_call_operand.vmem [shape: bf16[2,64,16], index: 4, kind: output, shape index: {1}]  }
   0x1   :  { %s2240_s17 = smov 0  }
   0x2 LB: > { %s27_s18 = sadd.s32 1, %s2199_s16  ;;  %p1941_p0 = scmp.ge.s32.totalorder %s2203_s17, 1  ;;  %s2203_s17 = sphi %s2240_s17, %s15_s17   ;;  %s2199_s16 = sphi %s2238_s16, %s3052_s16   ;;  %s2195_s15 = sphi %s2236_s15, %s3051_s15  }
   0x3   : > { %p29_p1 = scmp.ge.s32.totalorder %s27_s18, 2  ;;  %p213_p2 = scmp.lt.s32.totalorder %s2203_s17, 3 }
   0x5   : > { %s3054_s18 = smov (%p29_p1, %s27_s18), 0  ;;  %p214_p3 = pnand %p1941_p0, %p213_p2 }
   0x7   : > { %217 = sbr.rel (%p214_p3) target bundleno = 1595 (0x63b), region = 32 }
   0xc   : > { %p267_p4 = scmp.lt.s32.totalorder %s2195_s15, 1  ;;  %s2205_s23 = smov 112   ;;  %vm432_vm0 = vcmask 130112   ;;  %vm1108_vm1 = vcmask 326912   ;;  %vm475_vm2 = vcmask 64512   ;;  %vm407_vm3 = vcmask 523264  }
   0xd   : > { %s2206_s24 = smov 120   ;;  %s2207_s28 = smov 88   ;;  %vm596_vm4 = vcmask 60416   ;;  %vm1343_vm5 = vcmask 126016  }
   0xe   : > { %s3056_s15 = smov (!%p267_p4, %s2195_s15), 1  ;;  %s2208_s29 = smov 96  }
   0xf   : > { %s2254_s19 = sshll.u32 %s3056_s15, 5  ;;  %s2209_s8 = smov 104  }
  0x10   : > { %s2260_s22 = scalar_lea.vmem %s3035_s0, %s2254_s19  ;;  %s2315_s27 = scalar_lea.vmem %s3036_s1, %s2254_s19 }
  0x11   : > { %v2069_v0 = vld [vmem:[%s2260_s22] sm:$0xff]  ;;  %v2071_v1 = vld [vmem:[%s2260_s22 + $0x10] sm:$0xff]  ;;  %v309_v2 = vld [vmem:[%s2260_s22 + $0x8] sm:$0xff]   ;;  %s2677_s13 = scalar_lea.vmem %s3038_s3, %s2254_s19  ;;  %s2826_s26 = scalar_lea.vmem %s3039_s4, %s2254_s19 }
  0x12   : > { %v307_v3 = vld [vmem:[%s2260_s22] sm:$0xff]   ;;  %363 = vrot.lane.b32.xlu0 %v2069_v0, %s2205_s23  ;;  %367 = vrot.lane.b32.xlu1 %v2071_v1, %s2205_s23  ;;  %v317_v4 = vunpack.c.l.bf16 %v309_v2  ;;  %v318_v5 = vunpack.c.h.bf16 %v309_v2  ;;  %v313_v8 = vld [vmem:[%s2260_s22 + $0x18] sm:$0xff]   ;;  %s2210_s19 = smov 8  }
  0x13   : > { %v315_v6 = vunpack.c.l.bf16 %v307_v3  ;;  %v316_v7 = vunpack.c.h.bf16 %v307_v3  ;;  %v321_v9 = vunpack.c.l.bf16 %v313_v8  ;;  %v322_v10 = vunpack.c.h.bf16 %v313_v8  ;;  %v311_v11 = vld [vmem:[%s2260_s22 + $0x10] sm:$0xff]   ;;  %v2070_v20 = vld [vmem:[%s2260_s22 + $0x8] sm:$0xff]  ;;  %v2072_v21 = vld [vmem:[%s2260_s22 + $0x18] sm:$0xff] }
  0x14   : > { %v2270_v12 = vmax.f32 %v317_v4, 0.0  ;;  %v2272_v13 = vmax.f32 %v318_v5, 0.0  ;;  %v319_v18 = vunpack.c.l.bf16 %v311_v11  ;;  %v320_v19 = vunpack.c.h.bf16 %v311_v11  ;;  %v2320_v45 = vld [vmem:[%s2315_s27] sm:$0xff]  ;;  %v2327_v46 = vld [vmem:[%s2315_s27 + $0x8] sm:$0xff]  ;;  %v2334_v47 = vld [vmem:[%s2315_s27 + $0x10] sm:$0xff] }
  0x15   : > { %v2274_v14 = vmax.f32 %v315_v6, 0.0  ;;  %v2276_v15 = vmax.f32 %v316_v7, 0.0  ;;  %v2278_v16 = vmax.f32 %v321_v9, 0.0  ;;  %v2280_v17 = vmax.f32 %v322_v10, 0.0  ;;  %v2341_v48 = vld [vmem:[%s2315_s27 + $0x18] sm:$0xff]  ;;  %v2077_v49 = vld [vmem:[%s2260_s22] sm:$0xff] }
  0x16   : > { %v340_v22 = vpack.c.bf16 %v2272_v13, %v2270_v12  ;;  %v2292_v25 = vmax.f32 %v319_v18, 0.0  ;;  %v2294_v26 = vmax.f32 %v320_v19, 0.0  ;;  %v2078_v50 = vld [vmem:[%s2260_s22 + $0x8] sm:$0xff]  ;;  %v2079_v51 = vld [vmem:[%s2260_s22 + $0x10] sm:$0xff]  ;;  %v2080_v53 = vld [vmem:[%s2260_s22 + $0x18] sm:$0xff] }
  0x17   : > { %v339_v23 = vpack.c.bf16 %v2276_v15, %v2274_v14  ;;  %v2290_v24 = vpack.c.bf16 %v2280_v17, %v2278_v16  ;;  %v990_v54 = vld [vmem:[%s2260_s22 + $0x18] sm:$0xff]   ;;  %v988_v61 = vld [vmem:[%s2260_s22 + $0x10] sm:$0xff]   ;;  %v986_v1 = vld [vmem:[%s2260_s22 + $0x8] sm:$0xff]  }
  0x18   : > { %v426_v27 = vunpack.c.l.bf16 %v340_v22  ;;  %v427_v28 = vunpack.c.h.bf16 %v340_v22  ;;  %v341_v31 = vpack.c.bf16 %v2294_v26, %v2292_v25  ;;  %v998_v55 = vunpack.c.l.bf16 %v990_v54  ;;  %v984_v3 = vld [vmem:[%s2260_s22] sm:$0xff]  }
  0x19   : > { %v424_v29 = vunpack.c.l.bf16 %v339_v23  ;;  %v425_v30 = vunpack.c.h.bf16 %v339_v23  ;;  %401 = vrot.lane.b32.xlu2 %v2290_v24, %s2206_s24  ;;  %v999_v56 = vunpack.c.h.bf16 %v990_v54  ;;  %v996_v62 = vunpack.c.l.bf16 %v988_v61 }
  0x1a   : > { %365 = vrot.lane.b32.xlu0 %v2070_v20, %s2205_s23  ;;  %369 = vrot.lane.b32.xlu1 %v2072_v21, %s2205_s23  ;;  %v436_v32 = vsel %vm432_vm0, %v426_v27, 0.0  ;;  %v428_v36 = vunpack.c.l.bf16 %v341_v31  ;;  %v438_v37 = vsel %vm432_vm0, %v427_v28, 0.0  ;;  %v429_v38 = vunpack.c.h.bf16 %v341_v31 }
  0x1b   : > { %v433_v33 = vsel %vm432_vm0, %v424_v29, 0.0  ;;  %v434_v34 = vsel %vm432_vm0, %v425_v30, 0.0  ;;  %v2356_v57 = vmax.f32 %v998_v55, 0.0  ;;  %v2358_v58 = vmax.f32 %v999_v56, 0.0  ;;  %v2084_v56 = vld [vmem:[%s2315_s27 + $0x18] sm:$0xff] }
  0x1c   : > { %v435_v35 = vadd.f32 %v434_v34, %v433_v33  ;;  %v440_v40 = vsel %vm432_vm0, %v428_v36, 0.0  ;;  %v442_v42 = vsel %vm432_vm0, %v429_v38, 0.0  ;;  %v997_v63 = vunpack.c.h.bf16 %v988_v61 }
  0x1d   : > { %v2362_v59 = vpack.c.bf16 %v2358_v58, %v2356_v57  ;;  %v2369_v4 = vmax.f32 %v996_v62, 0.0  ;;  %v994_v6 = vunpack.c.l.bf16 %v986_v1  ;;  %v995_v7 = vunpack.c.h.bf16 %v986_v1  ;;  %v613_v62 = vld [vmem:[%s3037_s2] sm:$0xf] }
  0x1e   : > { %v437_v39 = vadd.f32 %v436_v32, %v435_v35  ;;  %v2371_v5 = vmax.f32 %v997_v63, 0.0  ;;  %v992_v8 = vunpack.c.l.bf16 %v984_v3  ;;  %v993_v9 = vunpack.c.h.bf16 %v984_v3 }
  0x1f   : > { %v2377_v11 = vmax.f32 %v994_v6, 0.0  ;;  %v2379_v18 = vmax.f32 %v995_v7, 0.0  ;;  %v647_v63 = vsel %vm475_vm2, %v613_v62, 0 }
  0x20   : > { %v439_v41 = vadd.f32 %v438_v37, %v437_v39  ;;  %v2375_v10 = vpack.c.bf16 %v2371_v5, %v2369_v4  ;;  %v1000_v19 = vmax.f32 %v992_v8, 0.0  ;;  %v1001_v20 = vmax.f32 %v993_v9, 0.0  ;;  %656 = vmatpush.bf16.xpose.msra.mxu2 %v647_v63 }
  0x21   : > { %399 = vrot.lane.b32.xlu2 %v341_v31, %s2206_s24  ;;  %v1017_v21 = vpack.c.bf16 %v2379_v18, %v2377_v11  ;;  %v2439_v8 = vpack.c.bf16 %v2377_v11, %v2377_v11  ;;  %v2443_v9 = vpack.c.bf16 %v2379_v18, %v2379_v18  ;;  %v2453_v11 = vpack.c.bf16 %v2369_v4, %v2369_v4 }
  0x22   : > { %v441_v43 = vadd.f32 %v440_v40, %v439_v41  ;;  %397 = vrot.lane.b32.xlu0 %v340_v22, %s2206_s24  ;;  %395 = vrot.lane.b32.xlu1 %v339_v23, %s2206_s24  ;;  %v1016_v22 = vpack.c.bf16 %v1001_v20, %v1000_v19  ;;  %v2394_v41 = vld [vmem:[%s2315_s27] sm:$0xff]  ;;  %v2428_v1 = vpack.c.bf16 %v1001_v20, %v1001_v20 }
  0x23   : > { %v1102_v23 = vunpack.c.l.bf16 %v1017_v21  ;;  %v1103_v28 = vunpack.c.h.bf16 %v1017_v21  ;;  %3043 = vst [vmem:[#allocation2_spill] sm:$0xff] %v2439_v8  ;;  %v1141_v20 = vunpack.c.l.b16 %v2439_v8  ;;  %v2457_v18 = vpack.c.bf16 %v2371_v5, %v2371_v5 }
  0x24   : > { %v2317_v44 = vadd.f32 %v442_v42, %v441_v43  ;;  %v1100_v29 = vunpack.c.l.bf16 %v1016_v22  ;;  %v1101_v30 = vunpack.c.h.bf16 %v1016_v22  ;;  %v2082_v42 = vld [vmem:[%s2315_s27 + $0x8] sm:$0xff]  ;;  %v1140_v6 = vunpack.c.l.b16 %v2428_v1 }
  0x25   : > { %v1112_v32 = vsel %vm1108_vm1, %v1102_v23, 0.0  ;;  %v1114_v37 = vsel %vm1108_vm1, %v1103_v28, 0.0  ;;  %v1144_v28 = vunpack.c.l.b16 %v2457_v18  ;;  %v430_v5 = vunpack.c.l.bf16 %v2290_v24 }
  0x26   : > { %v1109_v33 = vsel %vm1108_vm1, %v1100_v29, 0.0  ;;  %v1110_v34 = vsel %vm1108_vm1, %v1101_v30, 0.0 }
  0x27   : > { %v1111_v36 = vadd.f32 %v1110_v34, %v1109_v33  ;;  %1987 = vmatmul.msk.bf16.vlgmr.msra.gmra.mxu2 %vm475_vm2, %v2320_v45 }
  0x29   : > { %680 = vrot.lane.b32.xlu2 %v2320_v45, %s2206_s24  ;;  %v1113_v38 = vadd.f32 %v1112_v32, %v1111_v36  ;;  %v444_v32 = vsel %vm432_vm0, %v430_v5, 0.0 }
  0x2a   : > { %734 = vrot.lane.b32.xlu1 %v2320_v45, %s2205_s23  ;;  %v445_v34 = vadd.f32 %v444_v32, %v2317_v44  ;;  %v2554_v32 = vpack.c.bf16 %v2276_v15, %v2276_v15 }
  0x2b   : > { %v2390_v39 = vadd.f32 %v1114_v37, %v1113_v38 }
  0x31   : > { %682 = vrot.lane.b32.xlu2 %v2327_v46, %s2206_s24 }
  0x32   : > { %736 = vrot.lane.b32.xlu1 %v2327_v46, %s2205_s23 }
  0x37   : > { %1988 = vmatmul.msk.bf16.gmra.mxu2 %vm475_vm2, %v2327_v46  ;;  %v431_v46 = vunpack.c.h.bf16 %v2290_v24 }
  0x39   : > { %684 = vrot.lane.b32.xlu2 %v2334_v47, %s2206_s24  ;;  %v446_v33 = vsel %vm432_vm0, %v431_v46, 0.0 }
  0x3a   : > { %738 = vrot.lane.b32.xlu1 %v2334_v47, %s2205_s23 }
  0x41   : > { %686 = vrot.lane.b32.xlu2 %v2341_v48, %s2206_s24 }
  0x42   : > { %740 = vrot.lane.b32.xlu1 %v2341_v48, %s2205_s23 }
  0x47   : > { %1989 = vmatmul.msk.bf16.gmra.mxu2 %vm475_vm2, %v2334_v47 }
  0x4a   : > { %1040 = vrot.lane.b32.xlu1 %v2077_v49, %s2207_s28 }
  0x52   : > { %1042 = vrot.lane.b32.xlu1 %v2078_v50, %s2207_s28  ;;  %v1991_v50 = vld [vmem:[%s3037_s2 + $0x4] sm:$0xf] }
  0x57   : > { %1990 = vmatmul.msk.bf16.gmra.mxu2 %vm475_vm2, %v2341_v48 }
  0x5a   : > { %1044 = vrot.lane.b32.xlu1 %v2079_v51, %s2207_s28  ;;  %v701_v51 = vsel %vm475_vm2, %v1991_v50, 0 }
  0x5b   : > { %2085 = vmatpush.bf16.xpose.msra.mxu3 %v701_v51 }
  0x62   : > { %1046 = vrot.lane.b32.xlu1 %v2080_v53, %s2207_s28  ;;  %v2083_v53 = vld [vmem:[%s2315_s27 + $0x10] sm:$0xff] }
  0x6a   : > { %1078 = vrot.lane.b32.xlu1 %v2362_v59, %s2208_s29 }
  0x72   : > { %1076 = vrot.lane.b32.xlu1 %v2375_v10, %s2208_s29 }
  0x73   : > { %v402_v2 = vpop.permute.xlu2 %401 }
  0x74   : > { %415 = vmatpush.bf16.msra.mxu0 %v402_v2 }
  0x7a   : > { %1074 = vrot.lane.b32.xlu1 %v1017_v21, %s2208_s29  ;;  %v1142_v21 = vunpack.c.l.b16 %v2443_v9 }
  0x7b   : > { %v400_v31 = vpop.permute.xlu2 %399 }
  0x7c   : > { %416 = vmatpush.bf16.msra.mxu0 %v400_v31  ;;  %v1148_v45 = vpack.c.b16 %v1142_v21, %v1141_v20 }
  0x82   : > { %1072 = vrot.lane.b32.xlu1 %v1016_v22, %s2208_s29 }
  0x83   : > { %v2403_v49 = vpop.permute.xlu2 %680 }
  0x84   : > { %v364_v52 = vpop.permute.xlu0 %363  ;;  %v368_v0 = vpop.permute.xlu1 %367 }
  0x85   : > { %375 = vxpose.xlu0.c.b16.start [1/4] (short) (narrow) %v364_v52, 16 }
  0x8a   : > { %1436 = vrot.lane.b32.xlu1 %v2394_v41, %s2208_s29 }
  0x8b   : > { %v683_v54 = vpop.permute.xlu2 %682 }
  0x8c   : > { %v366_v60 = vpop.permute.xlu0 %365  ;;  %v370_v27 = vpop.permute.xlu1 %369  ;;  %1993 = vmatmul.msk.bf16.vlgmr.msra.gmra.mxu3 %vm475_vm2, %v683_v54 }
  0x92   : > { %1492 = vrot.lane.b32.xlu1 %v2082_v42, %s2207_s28 }
  0x93   : > { %v685_v61 = vpop.permute.xlu2 %684 }
  0x94   : > { %v398_v35 = vpop.permute.xlu0 %397  ;;  %v396_v40 = vpop.permute.xlu1 %395 }
  0x95   : > { %376 = vxpose.xlu0.c.b16.cont [2/4] (short) (narrow) %v366_v60, 16  ;;  %417 = vmatpush.bf16.msra.mxu0 %v398_v35  ;;  %v447_v35 = vadd.f32 %v446_v33, %v445_v34 }
  0x97   : > { %v448_v36 = vrot.slane %v447_v35, 4 }
  0x99   : > { %418 = vmatpush.bf16.msra.mxu0 %v396_v40  ;;  %v449_v37 = vadd.f32 %v448_v36, %v447_v35  ;;  %v2563_v35 = vpack.c.bf16 %v2270_v12, %v2270_v12 }
  0x9a   : > { %1438 = vrot.lane.b32.xlu1 %v2082_v42, %s2208_s29 }
  0x9b   : > { %v687_v22 = vpop.permute.xlu2 %686  ;;  %v450_v24 = vrot.slane %v449_v37, 2 }
  0x9c   : > { %v2400_v43 = vpop.permute.xlu1 %734  ;;  %1994 = vmatmul.msk.bf16.gmra.mxu3 %vm475_vm2, %v685_v61 }
  0x9d   : > { %710 = vmatpush.bf16.xpose.msrb.mxu0 %v701_v51  ;;  %v451_v40 = vadd.f32 %v450_v24, %v449_v37  ;;  %v1996_v51 = vld [vmem:[%s3037_s2 + $0x8] sm:$0xf]  ;;  %v522_v24 = vunpack.c.l.bf16 %v2563_v35 }
  0xa2   : > { %1494 = vrot.lane.b32.xlu1 %v2083_v53, %s2207_s28 }
  0xa4   : > { %v2409_v52 = vpop.permute.xlu1 %736 }
  0xa5   : > { %377 = vxpose.xlu0.c.b16.cont [3/4] (short) (narrow) %v368_v0, 16  ;;  %v2426_v0 = vpack.c.bf16 %v1000_v19, %v1000_v19 }
  0xa7   : > { %v1139_v3 = vunpack.c.l.b16 %v2426_v0 }
  0xa9   : > { %v1147_v7 = vpack.c.b16 %v1140_v6, %v1139_v3 }
  0xaa   : > { %1440 = vrot.lane.b32.xlu1 %v2083_v53, %s2208_s29 }
  0xac   : > { %v2414_v55 = vpop.permute.xlu1 %738  ;;  %1995 = vmatmul.msk.bf16.gmra.mxu3 %vm475_vm2, %v687_v22 }
  0xb2   : > { %1496 = vrot.lane.b32.xlu1 %v2084_v56, %s2207_s28 }
  0xb4   : > { %v2418_v60 = vpop.permute.xlu1 %740 }
  0xb5   : > { %378 = vxpose.xlu0.c.b16.end [4/4] (short) (narrow) %v370_v27, 16  ;;  %v1143_v27 = vunpack.c.l.b16 %v2453_v11 }
  0xb7   : > { %v1149_v29 = vpack.c.b16 %v1144_v28, %v1143_v27  ;;  %v2541_v28 = vpack.c.bf16 %v2274_v14, %v2274_v14  ;;  %v521_v14 = vunpack.c.l.bf16 %v2554_v32 }
  0xba   : > { %1442 = vrot.lane.b32.xlu1 %v2084_v56, %s2208_s29 }
  0xbc   : > { %v2430_v2 = vpop.permute.xlu1 %1040 }
  0xc2   : > { %1151 = vrot.lane.b32.xlu1 %v1147_v7, %s2209_s8 }
  0xc4   : > { %v2445_v19 = vpop.permute.xlu1 %1042 }
  0xca   : > { %1153 = vrot.lane.b32.xlu1 %v1148_v45, %s2209_s8 }
  0xcc   : > { %v2459_v23 = vpop.permute.xlu1 %1044 }
  0xd2   : > { %1155 = vrot.lane.b32.xlu1 %v1149_v29, %s2209_s8  ;;  %v520_v29 = vunpack.c.l.bf16 %v2541_v28 }
  0xd4   : > { %v2466_v30 = vpop.permute.xlu1 %1046 }
  0xda   : > { %1382 = vrot.lane.b32.xlu1 %v2394_v41, %s2209_s8 }
  0xdc   : > { %v1079_v4 = vpop.permute.xlu1 %1078 }
  0xdd   : > { %1091 = vmatpush.bf16.msrb.mxu3 %v1079_v4 }
  0xe2   : > { %1384 = vrot.lane.b32.xlu1 %v2082_v42, %s2209_s8  ;;  %v452_v42 = vrot.slane %v451_v40, 1 }
  0xe4   : > { %v1077_v31 = vpop.permute.xlu1 %1076  ;;  %v453_v50 = vadd.f32 %v452_v42, %v451_v40 }
  0xe5   : > { %1092 = vmatpush.bf16.msrb.mxu3 %v1077_v31 }
  0xea   : > { %1386 = vrot.lane.b32.xlu1 %v2083_v53, %s2209_s8  ;;  %v755_v53 = vsel %vm475_vm2, %v1996_v51, 0 }
  0xec   : > { %v1075_v47 = vpop.permute.xlu1 %1074 }
  0xed   : > { %1093 = vmatpush.bf16.msrb.mxu3 %v1075_v47 }
  0xf2   : > { %1388 = vrot.lane.b32.xlu1 %v2084_v56, %s2209_s8 }
  0xf4   : > { %v1073_v38 = vpop.permute.xlu1 %1072 }
  0xf5   : > { %1094 = vmatpush.bf16.msrb.mxu3 %v1073_v38 }
  0xfa   : > { %529 = vrot.lane.b32.xlu1 %v453_v50, %s2206_s24  ;;  %v2582_v50 = vpack.c.bf16 %v2292_v25, %v2292_v25  ;;  %v2593_v25 = vpack.c.bf16 %v2278_v16, %v2278_v16  ;;  %v2603_v16 = vpack.c.bf16 %v2280_v17, %v2280_v17 }
  0xfc   : > { %v2486_v44 = vpop.permute.xlu1 %1436  ;;  %v524_v51 = vunpack.c.l.bf16 %v2582_v50 }
 0x104   : > { %v2488_v48 = vpop.permute.xlu1 %1492 }
 0x10c   : > { %v2495_v56 = vpop.permute.xlu1 %1438 }
 0x10f   : > { %v2521_v20 = vpop.f32.mrf.mxu3 }
 0x114   : > { %v2497_v61 = vpop.permute.xlu1 %1494 }
 0x123   : > { %1490 = vrot.lane.b32.xlu0 %v2394_v41, %s2207_s28  ;;  %v2501_v41 = vpop.permute.xlu1 %1440 }
 0x12b   : > { %v2503_v62 = vpop.permute.xlu1 %1496 }
 0x131   : > { %v383_v54 = vpop.trf.xlu0 }
 0x132   : > { %1966 = vmatmul.msk.bf16.vlgmr.msra.gmra.mxu0 %vm407_vm3, %v383_v54 }
 0x133   : > { %764 = vmatpush.bf16.xpose.msra.mxu0 %v755_v53  ;;  %v2507_v63 = vpop.permute.xlu1 %1442 }
 0x13b   : > { %v2509_v3 = vpop.permute.xlu1 %1151 }
 0x142   : > { %1992 = vmatmul.msk.bf16.vlgmr.msrb.gmra.mxu0 %vm475_vm2, %v2403_v49 }
 0x143   : > { %v2513_v6 = vpop.permute.xlu1 %1153 }
 0x144   : > { %3044 = vst [vmem:[#allocation3_spill] sm:$0xff] %v2513_v6 }
 0x14b   : > { %v2515_v7 = vpop.permute.xlu1 %1155 }
 0x14c   : > { %3045 = vst [vmem:[#allocation4_spill] sm:$0xff] %v2515_v7 }
 0x152   : > { %1997 = vmatmul.msk.bf16.vlgmr.msra.gmra.mxu0 %vm475_vm2, %v2400_v43  ;;  %v2525_v43 = vpop.f32.mrf.mxu3 }
 0x153   : > { %v2519_v49 = vpop.permute.xlu1 %1382 }
 0x15a   : > { %v2533_v45 = vpop.f32.mrf.mxu3 }
 0x15b   : > { %v2523_v21 = vpop.permute.xlu1 %1384 }
 0x162   : > { %1998 = vmatmul.msk.bf16.gmra.mxu0 %vm475_vm2, %v2409_v52  ;;  %v2531_v52 = vpop.f32.mrf.mxu2  ;;  %v2546_v5 = vpop.f32.mrf.mxu3 }
 0x163   : > { %v2529_v22 = vpop.permute.xlu1 %1386 }
 0x16a   : > { %v2558_v34 = vpop.f32.mrf.mxu3 }
 0x16b   : > { %v2535_v27 = vpop.permute.xlu1 %1388  ;;  %v800_v53 = vmax.f32 %v2558_v34, 0.0 }
 0x172   : > { %1999 = vmatmul.msk.bf16.gmra.mxu0 %vm475_vm2, %v2414_v55  ;;  %v2537_v55 = vpop.f32.mrf.mxu2  ;;  %v2578_v12 = vpop.f32.mrf.mxu3 }
 0x173   : > { %v2544_v4 = vpop.permute.xlu1 %529  ;;  %v801_v54 = vmax.f32 %v2578_v12, 0.0  ;;  %v797_v12 = vmax.f32 %v2525_v43, 0.0 }
 0x174   : > { %v533_v33 = vmul.f32 %v2544_v4, %v521_v14  ;;  %v534_v40 = vmul.f32 %v2544_v4, %v522_v24  ;;  %v798_v14 = vmax.f32 %v2533_v45, 0.0 }
 0x175   : > { %v809_v24 = vpack.c.bf16 %v801_v54, %v800_v53 }
 0x176   : > { %v543_v47 = vsel %vm475_vm2, %v533_v33, 0.0  ;;  %v546_v42 = vsel %vm475_vm2, %v534_v40, 0.0  ;;  %v799_v33 = vmax.f32 %v2546_v5, 0.0  ;;  %v526_v40 = vunpack.c.l.bf16 %v2593_v25 }
 0x178   : > { %v808_v45 = vpack.c.bf16 %v799_v33, %v798_v14  ;;  %v538_v5 = vmul.f32 %v2544_v4, %v526_v40 }
 0x17a   : > { %v2550_v46 = vpop.f32.mrf.mxu2 }
 0x17b   : > { %v3041_v37 = vmax.f32 %v2550_v46, 0.0 }
 0x182   : > { %2000 = vmatmul.msk.bf16.gmra.mxu0 %vm475_vm2, %v2418_v60  ;;  %v532_v60 = vmul.f32 %v2544_v4, %v520_v29  ;;  %v2565_v36 = vpop.f32.mrf.mxu2  ;;  %v536_v29 = vmul.f32 %v2544_v4, %v524_v51 }
 0x183   : > { %v3040_v15 = vmax.f32 %v2565_v36, 0.0 }
 0x184   : > { %v540_v31 = vsel %vm475_vm2, %v532_v60, 0.0 }
 0x185   : > { %541 = vadd.xlane.f32.xlu1 %v540_v31  ;;  %v2574_v38 = vpack.c.bf16 %v3040_v15, %v3041_v37  ;;  %v552_v31 = vsel %vm475_vm2, %v536_v29, 0.0  ;;  %v558_v29 = vsel %vm475_vm2, %v538_v5, 0.0  ;;  %v851_v37 = vsel %vm475_vm2, %v797_v12, 0.0 }
 0x18d   : > { %544 = vadd.xlane.f32.xlu1 %v543_v47 }
 0x195   : > { %547 = vadd.xlane.f32.xlu1 %v546_v42  ;;  %v796_v42 = vmax.f32 %v2521_v20, 0.0 }
 0x19d   : > { %553 = vadd.xlane.f32.xlu1 %v552_v31  ;;  %v527_v31 = vunpack.c.l.bf16 %v2603_v16 }
 0x19f   : > { %v539_v20 = vmul.f32 %v2544_v4, %v527_v31 }
 0x1a5   : > { %559 = vadd.xlane.f32.xlu1 %v558_v29  ;;  %v849_v29 = vsel %vm475_vm2, %v796_v42, 0.0 }
 0x1af   : > { %v420_v60 = vpop.f32.mrf.mxu0 }
 0x1b0   : > { %v454_v47 = vpack.c.bf16 %v420_v60, %v420_v60  ;;  %v807_v60 = vpack.c.bf16 %v797_v12, %v796_v42  ;;  %v853_v42 = vsel %vm475_vm2, %v798_v14, 0.0 }
 0x1b2   : > { %v489_v34 = vsel %vm475_vm2, %v454_v47, 0  ;;  %v561_v47 = vsel %vm475_vm2, %v539_v20, 0.0 }
 0x1b3   : > { %498 = vmatpush.bf16.xpose.msra.mxu1 %v489_v34  ;;  %562 = vadd.xlane.f32.xlu1 %v561_v47  ;;  %v1107_v47 = vunpack.c.h.bf16 %v2362_v59 }
 0x1b7   : > { %v422_v51 = vpop.f32.mrf.mxu0 }
 0x1b8   : > { %v1106_v51 = vunpack.c.l.bf16 %v2362_v59 }
 0x1bb   : > { %837 = vmatpush.bf16.msrb.mxu1 %v809_v24  ;;  %v1104_v24 = vunpack.c.l.bf16 %v2375_v10 }
 0x1bd   : > { %v1116_v17 = vsel %vm1108_vm1, %v1104_v24, 0.0  ;;  %v1120_v24 = vsel %vm1108_vm1, %v1106_v51, 0.0 }
 0x1bf   : > { %838 = vmatpush.bf16.msrb.mxu1 %v808_v45  ;;  %v712_v43 = vpop.f32.mrf.mxu0  ;;  %v1105_v45 = vunpack.c.h.bf16 %v2375_v10 }
 0x1c0   : > { %v794_v34 = vmax.f32 %v712_v43, 0.0 }
 0x1c1   : > { %v1118_v43 = vsel %vm1108_vm1, %v1105_v45, 0.0  ;;  %v857_v45 = vsel %vm475_vm2, %v800_v53, 0.0 }
 0x1c3   : > { %839 = vmatpush.bf16.msrb.mxu1 %v807_v60  ;;  %v846_v60 = vsel %vm475_vm2, %v794_v34, 0.0 }
 0x1c7   : > { %v714_v40 = vpop.f32.mrf.mxu0 }
 0x1c8   : > { %v795_v5 = vmax.f32 %v714_v40, 0.0  ;;  %v1117_v40 = vadd.f32 %v1116_v17, %v2390_v39 }
 0x1ca   : > { %v847_v31 = vsel %vm475_vm2, %v795_v5, 0.0  ;;  %v806_v15 = vpack.c.bf16 %v795_v5, %v794_v34  ;;  %v1119_v6 = vadd.f32 %v1118_v43, %v1117_v40  ;;  %v1122_v34 = vsel %vm1108_vm1, %v1107_v47, 0.0 }
 0x1cb   : > { %v848_v20 = vadd.f32 %v847_v31, %v846_v60  ;;  %v855_v5 = vsel %vm475_vm2, %v799_v33, 0.0  ;;  %v786_v33 = vmax.f32 %v2531_v52, 0.0  ;;  %v2053_v52 = vld [vmem:[%s3037_s2 + $0x14] sm:$0xf] }
 0x1cc   : > { %840 = vmatpush.bf16.msrb.mxu1 %v806_v15  ;;  %v1121_v60 = vadd.f32 %v1120_v24, %v1119_v6 }
 0x1cd   : > { %v850_v10 = vadd.f32 %v849_v29, %v848_v20  ;;  %v859_v29 = vsel %vm475_vm2, %v801_v54, 0.0 }
 0x1ce   : > { %v1123_v15 = vadd.f32 %v1122_v34, %v1121_v60 }
 0x1cf   : > { %v852_v8 = vadd.f32 %v851_v37, %v850_v10  ;;  %v766_v7 = vpop.f32.mrf.mxu0  ;;  %v3046_v10 = vmax.f32 %v2550_v46, 0.0 }
 0x1d1   : > { %v854_v59 = vadd.f32 %v853_v42, %v852_v8  ;;  %v787_v8 = vmax.f32 %v2537_v55, 0.0 }
 0x1d3   : > { %v856_v12 = vadd.f32 %v855_v5, %v854_v59  ;;  %v1124_v5 = vrot.slane %v1123_v15, 4 }
 0x1d5   : > { %v858_v39 = vadd.f32 %v857_v45, %v856_v12  ;;  %v1125_v59 = vadd.f32 %v1124_v5, %v1123_v15  ;;  %v2650_v15 = vpack.c.bf16 %v2272_v13, %v2272_v13  ;;  %v467_v13 = vunpack.c.l.b16 %v2582_v50 }
 0x1d7   : > { %v860_v17 = vadd.f32 %v859_v29, %v858_v39  ;;  %v768_v51 = vpop.f32.mrf.mxu0  ;;  %v1126_v45 = vrot.slane %v1125_v59, 2 }
 0x1d8   : > { %v810_v31 = vpack.c.bf16 %v768_v51, %v766_v7 }
 0x1d9   : > { %v861_v14 = vrot.slane %v860_v17, 4  ;;  %v1127_v12 = vadd.f32 %v1126_v45, %v1125_v59 }
 0x1da   : > { %814 = vxpose.xlu2.c.b16.start [1/4] (short) (narrow) %v810_v31, 16 }
 0x1db   : > { %v862_v37 = vadd.f32 %v861_v14, %v860_v17  ;;  %v1128_v17 = vrot.slane %v1127_v12, 1 }
 0x1dd   : > { %v863_v20 = vrot.slane %v862_v37, 2  ;;  %v1129_v51 = vadd.f32 %v1128_v17, %v1127_v12 }
 0x1df   : > { %v864_v43 = vadd.f32 %v863_v20, %v862_v37  ;;  %v771_v47 = vpop.f32.mrf.mxu0  ;;  %v463_v37 = vunpack.c.l.b16 %v2541_v28  ;;  %v464_v20 = vunpack.c.l.b16 %v2554_v32  ;;  %v3047_v28 = vmax.f32 %v2565_v36, 0.0 }
 0x1e0   : > { %v469_v36 = vunpack.c.l.b16 %v2593_v25 }
 0x1e1   : > { %v865_v6 = vrot.slane %v864_v43, 1 }
 0x1e3   : > { %v2627_v53 = vadd.f32 %v865_v6, %v864_v43  ;;  %v471_v43 = vpack.c.b16 %v464_v20, %v463_v37  ;;  %v466_v6 = vunpack.c.l.b16 %v2650_v15 }
 0x1e5   : > { %v912_v54 = vmul.f32 %v2627_v53, %v786_v33  ;;  %v2635_v7 = vmul.f32 %v2627_v53, %v787_v8  ;;  %v2640_v40 = vmul.f32 %v2627_v53, %v3046_v10  ;;  %1967 = vmatmul.msk.bf16.vlgmr.msra.gmra.mxu1 %vm475_vm2, %v471_v43  ;;  %v915_v32 = vmul.f32 %v2627_v53, %v3047_v28 }
 0x1e7   : > { %v773_v24 = vpop.f32.mrf.mxu0  ;;  %v920_v42 = vsel %vm475_vm2, %v912_v54, 0.0  ;;  %v929_v10 = vsel %vm475_vm2, %v915_v32, 0.0 }
 0x1e8   : > { %v811_v34 = vpack.c.bf16 %v773_v24, %v771_v47  ;;  %921 = vadd.xlane.f32.xlu1 %v920_v42  ;;  %v465_v47 = vunpack.c.l.b16 %v2563_v35 }
 0x1ea   : > { %815 = vxpose.xlu2.c.b16.cont [2/4] (short) (narrow) %v811_v34, 16  ;;  %v472_v54 = vpack.c.b16 %v466_v6, %v465_v47  ;;  %v2689_v47 = vpack.c.bf16 %v2356_v57, %v2356_v57  ;;  %v2693_v6 = vpack.c.bf16 %v2358_v58, %v2358_v58 }
 0x1ec   : > { %v1145_v28 = vunpack.c.l.b16 %v2689_v47  ;;  %v1146_v32 = vunpack.c.l.b16 %v2693_v6 }
 0x1ef   : > { %v776_v60 = vpop.f32.mrf.mxu0 }
 0x1f5   : > { %1968 = vmatmul.msk.bf16.gmra.mxu1 %vm475_vm2, %v472_v54 }
 0x1f7   : > { %v778_v29 = vpop.f32.mrf.mxu0 }
 0x1f8   : > { %v812_v39 = vpack.c.bf16 %v778_v29, %v776_v60  ;;  %v542_v50 = vpop.xlane.xlu1 %541 }
 0x1f9   : > { %v564_v34 = vadd.f32 1e-15, %v542_v50 }
 0x1fa   : > { %816 = vxpose.xlu2.c.b16.cont [3/4] (short) (narrow) %v812_v39, 16 }
 0x1fb   : > { %2117 = vrcp.f32 %v564_v34 }
 0x1ff   : > { %v781_v46 = vpop.f32.mrf.mxu0 }
 0x200   : > { %v545_v5 = vpop.xlane.xlu1 %544 }
 0x201   : > { %1212 = vrot.lane.b32.xlu1 %v1129_v51, %s2206_s24  ;;  %v565_v59 = vadd.f32 1e-15, %v545_v5  ;;  %v2118_v60 = vpop.eup %2117 }
 0x203   : > { %2119 = vrcp.f32 %v565_v59 }
 0x207   : > { %v783_v31 = vpop.f32.mrf.mxu0 }
 0x208   : > { %v813_v14 = vpack.c.bf16 %v783_v31, %v781_v46 }
 0x209   : > { %v2120_v12 = vpop.eup %2119 }
 0x20a   : > { %817 = vxpose.xlu2.c.b16.end [4/4] (short) (narrow) %v813_v14, 16 }
 0x21a   : > { %1052 = vxpose.xlu2.c.b16.start [1/4] (short) (narrow) %v2430_v2, 16  ;;  %v2662_v2 = vpack.c.bf16 %v2294_v26, %v2294_v26 }
 0x21c   : > { %v468_v35 = vunpack.c.l.b16 %v2662_v2 }
 0x21e   : > { %v473_v24 = vpack.c.b16 %v468_v35, %v467_v13  ;;  %v1150_v35 = vpack.c.b16 %v1146_v32, %v1145_v28 }
 0x220   : > { %1969 = vmatmul.msk.bf16.gmra.mxu1 %vm475_vm2, %v473_v24 }
 0x22a   : > { %1053 = vxpose.xlu2.c.b16.cont [2/4] (short) (narrow) %v2445_v19, 16  ;;  %v470_v19 = vunpack.c.l.b16 %v2603_v16  ;;  %v548_v16 = vpop.xlane.xlu1 %547 }
 0x22b   : > { %930 = vadd.xlane.f32.xlu1 %v929_v10  ;;  %v566_v45 = vadd.f32 1e-15, %v548_v16 }
 0x22c   : > { %v474_v42 = vpack.c.b16 %v470_v19, %v469_v36 }
 0x22d   : > { %2121 = vrcp.f32 %v566_v45 }
 0x230   : > { %1970 = vmatmul.msk.bf16.gmra.mxu1 %vm475_vm2, %v474_v42 }
 0x232   : > { %v554_v14 = vpop.xlane.xlu1 %553 }
 0x233   : > { %v2122_v51 = vpop.eup %2121  ;;  %v568_v20 = vadd.f32 1e-15, %v554_v14 }
 0x235   : > { %2123 = vrcp.f32 %v568_v20 }
 0x23a   : > { %1054 = vxpose.xlu2.c.b16.cont [3/4] (short) (narrow) %v2459_v23, 16  ;;  %v560_v24 = vpop.xlane.xlu1 %559 }
 0x23b   : > { %v2124_v54 = vpop.eup %2123  ;;  %v570_v19 = vadd.f32 1e-15, %v560_v24 }
 0x23d   : > { %2125 = vrcp.f32 %v570_v19 }
 0x242   : > { %v563_v58 = vpop.xlane.xlu1 %562 }
 0x243   : > { %v571_v42 = vadd.f32 1e-15, %v563_v58 }
 0x245   : > { %2127 = vrcp.f32 %v571_v42 }
 0x24a   : > { %1055 = vxpose.xlu2.c.b16.end [4/4] (short) (narrow) %v2466_v30, 16 }
 0x25b   : > { %v922_v55 = vpop.xlane.xlu1 %921 }
 0x262   : > { %v500_v23 = vpop.f32.mrf.mxu1 }
 0x263   : > { %v580_v25 = vmul.f32 %v2118_v60, %v500_v23 }
 0x265   : > { %v588_v30 = vpack.c.bf16 %v580_v25, %v580_v25 }
 0x267   : > { %597 = vst.msk [vmem:[%s2677_s13] sm:$0xf] %vm596_vm4, %v588_v30  ;;  %v525_v30 = vunpack.c.l.bf16 %v2662_v2 }
 0x269   : > { %v537_v16 = vmul.f32 %v2544_v4, %v525_v30 }
 0x26a   : > { %v502_v29 = vpop.f32.mrf.mxu1 }
 0x26b   : > { %v581_v39 = vmul.f32 %v2120_v12, %v502_v29  ;;  %v555_v45 = vsel %vm475_vm2, %v537_v16, 0.0  ;;  %v2048_v12 = vld [vmem:[%s3037_s2 + $0x10] sm:$0xf] }
 0x26c   : > { %v1457_v29 = vsel %vm475_vm2, %v2048_v12, 0  ;;  %v1208_v12 = vunpack.c.l.bf16 %v2457_v18 }
 0x26d   : > { %v589_v17 = vpack.c.bf16 %v581_v39, %v581_v39  ;;  %v668_v39 = vpop.f32.mrf.mxu2  ;;  %1466 = vmatpush.bf16.xpose.msrb.mxu0 %v1457_v29 }
 0x26e   : > { %v790_v2 = vmax.f32 %v668_v39, 0.0 }
 0x26f   : > { %598 = vst.msk [vmem:[%s2677_s13 + $0x4] sm:$0xf] %vm596_vm4, %v589_v17  ;;  %v923_v17 = vsel %vm475_vm2, %v2635_v7, 0.0  ;;  %v2027_v7 = vld [vmem:[%s3037_s2 + $0xc] sm:$0xf] }
 0x270   : > { %v916_v14 = vmul.f32 %v2627_v53, %v790_v2 }
 0x272   : > { %v505_v46 = vpop.f32.mrf.mxu1  ;;  %v932_v20 = vsel %vm475_vm2, %v916_v14, 0.0 }
 0x273   : > { %v582_v31 = vmul.f32 %v2122_v51, %v505_v46  ;;  %v926_v51 = vsel %vm475_vm2, %v2640_v40, 0.0 }
 0x274   : > { %2049 = vmatmul.msk.bf16.vlgmr.msrb.gmra.mxu0 %vm475_vm2, %v2486_v44  ;;  %v1403_v44 = vsel %vm475_vm2, %v2027_v7, 0 }
 0x275   : > { %v590_v37 = vpack.c.bf16 %v582_v31, %v582_v31  ;;  %v670_v46 = vpop.f32.mrf.mxu2  ;;  %1412 = vmatpush.bf16.xpose.msra.mxu3 %v1403_v44 }
 0x277   : > { %599 = vst.msk [vmem:[%s2677_s13 + $0x8] sm:$0xf] %vm596_vm4, %v590_v37  ;;  %v791_v37 = vmax.f32 %v670_v46, 0.0  ;;  %v944_v46 = vadd.f32 1e-15, %v922_v55 }
 0x279   : > { %v917_v40 = vmul.f32 %v2627_v53, %v791_v37 }
 0x27a   : > { %v2685_v43 = vpop.f32.mrf.mxu1 }
 0x27b   : > { %v822_v26 = vpop.trf.xlu2 }
 0x27c   : > { %2001 = vmatmul.msk.bf16.vlgmr.msrb.gmra.mxu1 %vm407_vm3, %v822_v26  ;;  %v2126_v26 = vpop.eup %2125 }
 0x27d   : > { %v2128_v59 = vpop.eup %2127 }
 0x284   : > { %2050 = vmatmul.msk.bf16.gmra.mxu0 %vm475_vm2, %v2495_v56  ;;  %v802_v56 = vpack.c.bf16 %v787_v8, %v786_v33  ;;  %v1511_v33 = vsel %vm475_vm2, %v2053_v52, 0  ;;  %v2755_v8 = vpop.permute.xlu1 %1212 }
 0x285   : > { %v1220_v29 = vmul.f32 %v2755_v8, %v1208_v12 }
 0x294   : > { %2051 = vmatmul.msk.bf16.gmra.mxu0 %vm475_vm2, %v2501_v41  ;;  %v1204_v41 = vunpack.c.l.bf16 %v2428_v1 }
 0x29d   : > { %v510_v10 = vpop.f32.mrf.mxu1 }
 0x29e   : > { %v584_v13 = vmul.f32 %v2124_v54, %v510_v10  ;;  %v673_v54 = vpop.f32.mrf.mxu2 }
 0x29f   : > { %v792_v10 = vmax.f32 %v673_v54, 0.0 }
 0x2a0   : > { %v592_v36 = vpack.c.bf16 %v584_v13, %v584_v13  ;;  %v935_v13 = vsel %vm475_vm2, %v917_v40, 0.0 }
 0x2a1   : > { %v918_v24 = vmul.f32 %v2627_v53, %v792_v10 }
 0x2a2   : > { %601 = vst.msk [vmem:[%s2677_s13 + $0x10] sm:$0xf] %vm596_vm4, %v592_v36 }
 0x2a3   : > { %v938_v42 = vsel %vm475_vm2, %v918_v24, 0.0 }
 0x2a4   : > { %2052 = vmatmul.msk.bf16.gmra.mxu0 %vm475_vm2, %v2507_v63 }
 0x2a5   : > { %v2700_v57 = vpop.f32.mrf.mxu1 }
 0x2a6   : > { %v675_v36 = vpop.f32.mrf.mxu2 }
 0x2a7   : > { %v793_v58 = vmax.f32 %v675_v36, 0.0 }
 0x2a9   : > { %v805_v1 = vpack.c.bf16 %v793_v58, %v792_v10 }
 0x2ad   : > { %v515_v50 = vpop.f32.mrf.mxu1 }
 0x2ae   : > { %v586_v34 = vmul.f32 %v2126_v26, %v515_v50  ;;  %v919_v26 = vmul.f32 %v2627_v53, %v793_v58  ;;  %v1207_v53 = vunpack.c.l.bf16 %v2453_v11  ;;  %v1209_v50 = vunpack.c.l.bf16 %v2689_v47  ;;  %v3048_v58 = vld [vmem:[#allocation3_spill] sm:$0xff] }
 0x2af   : > { %v1206_v11 = vunpack.c.l.bf16 %v2443_v9 }
 0x2b0   : > { %v594_v5 = vpack.c.bf16 %v586_v34, %v586_v34  ;;  %v1219_v63 = vmul.f32 %v2755_v8, %v1207_v53 }
 0x2b2   : > { %603 = vst.msk [vmem:[%s2677_s13 + $0x18] sm:$0xf] %vm596_vm4, %v594_v5  ;;  %v1221_v5 = vmul.f32 %v2755_v8, %v1209_v50 }
 0x2b3   : > { %1157 = vrot.lane.b32.xlu2 %v1150_v35, %s2209_s8 }
 0x2b5   : > { %v517_v60 = vpop.f32.mrf.mxu1 }
 0x2b6   : > { %v587_v23 = vmul.f32 %v2128_v59, %v517_v60  ;;  %v1491_v59 = vpop.permute.xlu0 %1490 }
 0x2b8   : > { %v595_v25 = vpack.c.bf16 %v587_v23, %v587_v23 }
 0x2ba   : > { %604 = vst.msk [vmem:[%s2677_s13 + $0x1c] sm:$0xf] %vm596_vm4, %v595_v25 }
 0x2bb   : > { %v1060_v31 = vpop.trf.xlu2 }
 0x2bc   : > { %2022 = vmatmul.msk.bf16.vlgmr.msrb.gmra.mxu3 %vm407_vm3, %v1060_v31 }
 0x2cc   : > { %2044 = vmatmul.msk.bf16.vlgmr.msra.gmra.mxu3 %vm475_vm2, %v2519_v49  ;;  %v941_v49 = vsel %vm475_vm2, %v919_v26, 0.0 }
 0x2dc   : > { %556 = vadd.xlane.f32.xlu2 %v555_v45  ;;  %2045 = vmatmul.msk.bf16.gmra.mxu3 %vm475_vm2, %v2523_v21  ;;  %v1216_v21 = vmul.f32 %v2755_v8, %v1204_v41 }
 0x2de   : > { %1233 = vrot.lane.b32.xlu1 %v1216_v21, %s2209_s8 }
 0x2e4   : > { %924 = vadd.xlane.f32.xlu2 %v923_v17 }
 0x2e6   : > { %1239 = vrot.lane.b32.xlu1 %v1219_v63, %s2209_s8 }
 0x2ec   : > { %927 = vadd.xlane.f32.xlu2 %v926_v51  ;;  %2046 = vmatmul.msk.bf16.gmra.mxu3 %vm475_vm2, %v2529_v22  ;;  %v1203_v22 = vunpack.c.l.bf16 %v2426_v0 }
 0x2ee   : > { %v1215_v34 = vmul.f32 %v2755_v8, %v1203_v22  ;;  %1243 = vrot.lane.b32.xlu1 %v1221_v5, %s2209_s8 }
 0x2f1   : > { %v2787_v45 = vpop.f32.mrf.mxu0 }
 0x2f4   : > { %933 = vadd.xlane.f32.xlu2 %v932_v20 }
 0x2f9   : > { %v842_v28 = vpop.f32.mrf.mxu1  ;;  %v2794_v39 = vpop.f32.mrf.mxu0 }
 0x2fa   : > { %v867_v32 = vpack.c.bf16 %v842_v28, %v842_v28 }
 0x2fc   : > { %936 = vadd.xlane.f32.xlu2 %v935_v13  ;;  %v881_v35 = vsel %vm475_vm2, %v867_v32, 0  ;;  %2047 = vmatmul.msk.bf16.gmra.mxu3 %vm475_vm2, %v2535_v27  ;;  %v1218_v27 = vmul.f32 %v2755_v8, %v1206_v11  ;;  %v931_v13 = vpop.xlane.xlu1 %930 }
 0x2fd   : > { %890 = vmatpush.bf16.xpose.msrb.mxu2 %v881_v35 }
 0x301   : > { %v844_v19 = vpop.f32.mrf.mxu1  ;;  %v2801_v51 = vpop.f32.mrf.mxu0 }
 0x302   : > { %v1552_v32 = vmax.f32 %v2801_v51, 0.0 }
 0x304   : > { %939 = vadd.xlane.f32.xlu2 %v938_v42  ;;  %2002 = vmatmul.msk.bf16.vlgmr.msrb.gmra.mxu2 %vm475_vm2, %v802_v56  ;;  %v1605_v19 = vsel %vm475_vm2, %v1552_v32, 0.0 }
 0x305   : > { %1520 = vmatpush.bf16.xpose.msra.mxu2 %v1511_v33 }
 0x309   : > { %v2805_v31 = vpop.f32.mrf.mxu0 }
 0x30a   : > { %v1553_v56 = vmax.f32 %v2805_v31, 0.0 }
 0x30c   : > { %942 = vadd.xlane.f32.xlu2 %v941_v49 }
 0x30d   : > { %v2778_v0 = vpop.permute.xlu2 %1157 }
 0x311   : > { %v2813_v44 = vpop.f32.mrf.mxu0 }
 0x312   : > { %v1554_v53 = vmax.f32 %v2813_v44, 0.0  ;;  %v3049_v44 = vld [vmem:[#allocation4_spill] sm:$0xff] }
 0x314   : > { %2003 = vmatmul.msk.bf16.gmra.mxu2 %vm475_vm2, %v2574_v38  ;;  %v804_v38 = vpack.c.bf16 %v791_v37, %v790_v2  ;;  %v1550_v37 = vmax.f32 %v2787_v45, 0.0  ;;  %v1609_v11 = vsel %vm475_vm2, %v1554_v53, 0.0 }
 0x319   : > { %v1480_v33 = vpop.f32.mrf.mxu0 }
 0x324   : > { %2004 = vmatmul.msk.bf16.gmra.mxu2 %vm475_vm2, %v804_v38  ;;  %1231 = vrot.lane.b32.xlu2 %v1215_v34, %s2209_s8  ;;  %v1607_v38 = vsel %vm475_vm2, %v1553_v56, 0.0 }
 0x32c   : > { %1237 = vrot.lane.b32.xlu2 %v1218_v27, %s2209_s8  ;;  %v1555_v27 = vmax.f32 %v1480_v33, 0.0 }
 0x32e   : > { %v1611_v12 = vsel %vm475_vm2, %v1555_v27, 0.0 }
 0x334   : > { %2005 = vmatmul.msk.bf16.gmra.mxu2 %vm475_vm2, %v805_v1  ;;  %1241 = vrot.lane.b32.xlu2 %v1220_v29, %s2209_s8 }
 0x344   : > { %2054 = vmatmul.msk.bf16.vlgmr.msra.gmra.mxu2 %vm475_vm2, %v1491_v59 }
 0x34f   : > { %v557_v47 = vpop.xlane.xlu2 %556 }
 0x350   : > { %v569_v60 = vadd.f32 1e-15, %v557_v47  ;;  %v1234_v5 = vpop.permute.xlu1 %1233 }
 0x351   : > { %v1258_v47 = vsel %vm475_vm2, %v1234_v5, 0.0 }
 0x352   : > { %2129 = vrcp.f32 %v569_v60  ;;  %1259 = vadd.xlane.f32.xlu1 %v1258_v47 }
 0x353   : > { %2131 = vrcp.f32 %v944_v46 }
 0x354   : > { %2055 = vmatmul.msk.bf16.gmra.mxu2 %vm475_vm2, %v2488_v48 }
 0x357   : > { %v925_v25 = vpop.xlane.xlu2 %924 }
 0x358   : > { %v2130_v23 = vpop.eup %2129  ;;  %v945_v7 = vadd.f32 1e-15, %v925_v25 }
 0x359   : > { %v585_v30 = vmul.f32 %v2130_v23, %v2700_v57  ;;  %v1096_v57 = vpop.f32.mrf.mxu3  ;;  %v2132_v54 = vpop.eup %2131  ;;  %v947_v23 = vadd.f32 1e-15, %v931_v13 }
 0x35a   : > { %v1130_v17 = vpack.c.bf16 %v1096_v57, %v1096_v57  ;;  %2133 = vrcp.f32 %v945_v7 }
 0x35b   : > { %v593_v9 = vpack.c.bf16 %v585_v30, %v585_v30  ;;  %v1483_v30 = vpop.f32.mrf.mxu0 }
 0x35c   : > { %v1172_v2 = vsel %vm475_vm2, %v1130_v17, 0  ;;  %v1556_v29 = vmax.f32 %v1483_v30, 0.0 }
 0x35d   : > { %602 = vst.msk [vmem:[%s2677_s13 + $0x14] sm:$0xf] %vm596_vm4, %v593_v9  ;;  %1181 = vmatpush.bf16.xpose.msra.mxu1 %v1172_v2 }
 0x35e   : > { %v1613_v46 = vsel %vm475_vm2, %v1556_v29, 0.0 }
 0x35f   : > { %v928_v16 = vpop.xlane.xlu2 %927 }
 0x360   : > { %v946_v26 = vadd.f32 1e-15, %v928_v16  ;;  %v2134_v41 = vpop.eup %2133 }
 0x361   : > { %v1098_v18 = vpop.f32.mrf.mxu3 }
 0x362   : > { %2135 = vrcp.f32 %v946_v26 }
 0x363   : > { %2137 = vrcp.f32 %v947_v23  ;;  %v1485_v13 = vpop.f32.mrf.mxu0 }
 0x364   : > { %2056 = vmatmul.msk.bf16.gmra.mxu2 %vm475_vm2, %v2497_v61  ;;  %2023 = vmatmul.msk.bf16.vlgmr.msra.gmra.mxu1 %vm475_vm2, %v2509_v3  ;;  %v1602_v3 = vsel %vm475_vm2, %v1550_v37, 0.0 }
 0x367   : > { %v2792_v48 = vpop.xlane.xlu2 %933 }
 0x368   : > { %v2136_v9 = vpop.eup %2135 }
 0x369   : > { %v2811_v20 = vpop.f32.mrf.mxu3 }
 0x36a   : > { %v1542_v49 = vmax.f32 %v2811_v20, 0.0 }
 0x36f   : > { %v2799_v61 = vpop.xlane.xlu2 %936 }
 0x371   : > { %v2838_v42 = vpop.f32.mrf.mxu3 }
 0x372   : > { %v1543_v52 = vmax.f32 %v2838_v42, 0.0 }
 0x374   : > { %2057 = vmatmul.msk.bf16.gmra.mxu2 %vm475_vm2, %v2503_v62  ;;  %v1551_v62 = vmax.f32 %v2794_v39, 0.0  ;;  %2024 = vmatmul.msk.bf16.gmra.mxu1 %vm475_vm2, %v3048_v58  ;;  %v2850_v63 = vpack.c.bf16 %v1543_v52, %v1542_v49 }
 0x376   : > { %v1603_v28 = vsel %vm475_vm2, %v1551_v62, 0.0  ;;  %v1562_v30 = vpack.c.bf16 %v1551_v62, %v1550_v37 }
 0x377   : > { %v2807_v14 = vpop.xlane.xlu2 %939  ;;  %v1604_v36 = vadd.f32 %v1603_v28, %v1602_v3  ;;  %v948_v3 = vadd.f32 1e-15, %v2792_v48 }
 0x378   : > { %v950_v31 = vadd.f32 1e-15, %v2807_v14 }
 0x379   : > { %v1606_v55 = vadd.f32 %v1605_v19, %v1604_v36  ;;  %v2857_v60 = vpop.f32.mrf.mxu3  ;;  %v1557_v19 = vmax.f32 %v1485_v13, 0.0  ;;  %2139 = vrcp.f32 %v948_v3 }
 0x37b   : > { %v1608_v50 = vadd.f32 %v1607_v38, %v1606_v55  ;;  %v1565_v55 = vpack.c.bf16 %v1557_v19, %v1556_v29  ;;  %v1615_v48 = vsel %vm475_vm2, %v1557_v19, 0.0  ;;  %v1564_v38 = vpack.c.bf16 %v1555_v27, %v1554_v53 }
 0x37d   : > { %v1610_v25 = vadd.f32 %v1609_v11, %v1608_v50  ;;  %1593 = vmatpush.bf16.msrb.mxu1 %v1565_v55 }
 0x37f   : > { %v2828_v35 = vpop.xlane.xlu2 %942  ;;  %v1612_v2 = vadd.f32 %v1611_v12, %v1610_v25 }
 0x381   : > { %1594 = vmatpush.bf16.msrb.mxu1 %v1564_v38 }
 0x384   : > { %2025 = vmatmul.msk.bf16.gmra.mxu1 %vm475_vm2, %v3049_v44 }
 0x387   : > { %v892_v40 = vpop.f32.mrf.mxu2  ;;  %v1232_v34 = vpop.permute.xlu2 %1231 }
 0x388   : > { %v960_v10 = vmul.f32 %v2132_v54, %v892_v40  ;;  %v1255_v59 = vsel %vm475_vm2, %v1232_v34, 0.0  ;;  %v2866_v54 = vpop.f32.mrf.mxu3  ;;  %v1544_v40 = vmax.f32 %v2857_v60, 0.0  ;;  %v949_v34 = vadd.f32 1e-15, %v2799_v61 }
 0x389   : > { %1256 = vadd.xlane.f32.xlu2 %v1255_v59  ;;  %v1545_v28 = vmax.f32 %v2866_v54, 0.0  ;;  %v1563_v59 = vpack.c.bf16 %v1553_v56, %v1552_v32 }
 0x38a   : > { %v968_v24 = vpack.c.bf16 %v960_v10, %v960_v10  ;;  %v1614_v10 = vadd.f32 %v1613_v46, %v1612_v2  ;;  %2141 = vrcp.f32 %v949_v34 }
 0x38b   : > { %v2875_v58 = vpack.c.bf16 %v1545_v28, %v1544_v40  ;;  %1595 = vmatpush.bf16.msrb.mxu1 %v1563_v59  ;;  %2143 = vrcp.f32 %v950_v31  ;;  %v523_v59 = vunpack.c.l.bf16 %v2650_v15 }
 0x38c   : > { %976 = vst.msk [vmem:[%s2826_s26] sm:$0xf] %vm596_vm4, %v968_v24  ;;  %v2138_v24 = vpop.eup %2137 }
 0x38d   : > { %v2140_v11 = vpop.eup %2139 }
 0x38f   : > { %v894_v21 = vpop.f32.mrf.mxu2  ;;  %v1238_v18 = vpop.permute.xlu2 %1237  ;;  %1596 = vmatpush.bf16.msrb.mxu1 %v1562_v30 }
 0x390   : > { %v961_v1 = vmul.f32 %v2134_v41, %v894_v21  ;;  %v1264_v7 = vsel %vm475_vm2, %v1238_v18, 0.0  ;;  %v1616_v41 = vadd.f32 %v1615_v48, %v1614_v10  ;;  %v1240_v21 = vpop.permute.xlu1 %1239  ;;  %v1424_v50 = vpop.f32.mrf.mxu3 }
 0x391   : > { %1265 = vadd.xlane.f32.xlu2 %v1264_v7  ;;  %v1546_v32 = vmax.f32 %v1424_v50, 0.0  ;;  %v2142_v39 = vpop.eup %2141 }
 0x392   : > { %v969_v22 = vpack.c.bf16 %v961_v1, %v961_v1  ;;  %v1267_v1 = vsel %vm475_vm2, %v1240_v21, 0.0  ;;  %v2144_v2 = vpop.eup %2143 }
 0x393   : > { %1268 = vadd.xlane.f32.xlu1 %v1267_v1 }
 0x394   : > { %977 = vst.msk [vmem:[%s2826_s26 + $0x4] sm:$0xf] %vm596_vm4, %v969_v22  ;;  %v1617_v22 = vrot.slane %v1616_v41, 4  ;;  %2026 = vmatmul.msk.bf16.gmra.mxu1 %vm475_vm2, %v2778_v0 }
 0x396   : > { %v1618_v5 = vadd.f32 %v1617_v22, %v1616_v41 }
 0x397   : > { %v897_v16 = vpop.f32.mrf.mxu2 }
 0x398   : > { %v962_v57 = vmul.f32 %v2136_v9, %v897_v16  ;;  %v1619_v27 = vrot.slane %v1618_v5, 2  ;;  %v1244_v51 = vpop.permute.xlu1 %1243  ;;  %v1426_v9 = vpop.f32.mrf.mxu3 }
 0x399   : > { %v1273_v56 = vsel %vm475_vm2, %v1244_v51, 0.0  ;;  %v1547_v16 = vmax.f32 %v1426_v9, 0.0 }
 0x39a   : > { %v970_v17 = vpack.c.bf16 %v962_v57, %v962_v57  ;;  %v1620_v25 = vadd.f32 %v1619_v27, %v1618_v5  ;;  %1274 = vadd.xlane.f32.xlu2 %v1273_v56 }
 0x39b   : > { %v2896_v62 = vpack.c.bf16 %v1547_v16, %v1546_v32 }
 0x39c   : > { %978 = vst.msk [vmem:[%s2826_s26 + $0x8] sm:$0xf] %vm596_vm4, %v970_v17  ;;  %v1621_v61 = vrot.slane %v1620_v25, 1  ;;  %v951_v17 = vadd.f32 1e-15, %v2828_v35 }
 0x39e   : > { %v1622_v45 = vadd.f32 %v1621_v61, %v1620_v25  ;;  %2145 = vrcp.f32 %v951_v17  ;;  %v1210_v61 = vunpack.c.l.bf16 %v2693_v6  ;;  %v1242_v17 = vpop.permute.xlu2 %1241 }
 0x39f   : > { %v899_v36 = vpop.f32.mrf.mxu2 }
 0x3a0   : > { %v963_v26 = vmul.f32 %v2138_v24, %v899_v36  ;;  %v1669_v0 = vmul.f32 %v1622_v45, %v1543_v52  ;;  %v1429_v57 = vpop.f32.mrf.mxu3  ;;  %v1672_v46 = vmul.f32 %v1622_v45, %v1546_v32  ;;  %v2911_v55 = vmul.f32 %v1622_v45, %v1542_v49 }
 0x3a1   : > { %v1548_v52 = vmax.f32 %v1429_v57, 0.0  ;;  %v2915_v48 = vmul.f32 %v1622_v45, %v1544_v40  ;;  %v2921_v41 = vmul.f32 %v1622_v45, %v1547_v16  ;;  %v1222_v51 = vmul.f32 %v2755_v8, %v1210_v61 }
 0x3a2   : > { %v971_v33 = vpack.c.bf16 %v963_v26, %v963_v26  ;;  %v1679_v14 = vsel %vm475_vm2, %v1669_v0, 0.0  ;;  %v1688_v3 = vsel %vm475_vm2, %v1672_v46, 0.0 }
 0x3a3   : > { %1680 = vadd.xlane.f32.xlu2 %v1679_v14  ;;  %v2926_v38 = vmul.f32 %v1622_v45, %v1548_v52 }
 0x3a4   : > { %979 = vst.msk [vmem:[%s2826_s26 + $0xc] sm:$0xf] %vm596_vm4, %v971_v33  ;;  %v2146_v13 = vpop.eup %2145  ;;  %v2919_v33 = vmul.f32 %v1622_v45, %v1545_v28 }
 0x3a7   : > { %v902_v47 = vpop.f32.mrf.mxu2 }
 0x3a8   : > { %v964_v53 = vmul.f32 %v2140_v11, %v902_v47  ;;  %v1431_v42 = vpop.f32.mrf.mxu3  ;;  %v535_v47 = vmul.f32 %v2544_v4, %v523_v59 }
 0x3a9   : > { %v1549_v10 = vmax.f32 %v1431_v42, 0.0  ;;  %v1685_v42 = vsel %vm475_vm2, %v2919_v33, 0.0 }
 0x3aa   : > { %v972_v23 = vpack.c.bf16 %v964_v53, %v964_v53  ;;  %v549_v53 = vsel %vm475_vm2, %v535_v47, 0.0 }
 0x3ab   : > { %1689 = vadd.xlane.f32.xlu2 %v1688_v3  ;;  %v2907_v36 = vpack.c.bf16 %v1549_v10, %v1548_v52  ;;  %v1675_v26 = vmul.f32 %v1622_v45, %v1549_v10  ;;  %v1682_v3 = vsel %vm475_vm2, %v2915_v48, 0.0  ;;  %v1691_v52 = vsel %vm475_vm2, %v2921_v41, 0.0 }
 0x3ac   : > { %980 = vst.msk [vmem:[%s2826_s26 + $0x10] sm:$0xf] %vm596_vm4, %v972_v23  ;;  %v3050_v23 = vld [vmem:[#allocation2_spill] sm:$0xff] }
 0x3ad   : > { %v1697_v21 = vsel %vm475_vm2, %v1675_v26, 0.0  ;;  %v1205_v25 = vunpack.c.l.bf16 %v3050_v23 }
 0x3af   : > { %v904_v37 = vpop.f32.mrf.mxu2  ;;  %v1217_v30 = vmul.f32 %v2755_v8, %v1205_v25 }
 0x3b0   : > { %v965_v12 = vmul.f32 %v2142_v39, %v904_v37 }
 0x3b2   : > { %v973_v29 = vpack.c.bf16 %v965_v12, %v965_v12 }
 0x3b3   : > { %1698 = vadd.xlane.f32.xlu2 %v1697_v21 }
 0x3b4   : > { %981 = vst.msk [vmem:[%s2826_s26 + $0x14] sm:$0xf] %vm596_vm4, %v973_v29 }
 0x3b7   : > { %v907_v18 = vpop.f32.mrf.mxu2 }
 0x3b8   : > { %v966_v7 = vmul.f32 %v2144_v2, %v907_v18  ;;  %v1270_v18 = vsel %vm475_vm2, %v1242_v17, 0.0 }
 0x3ba   : > { %v974_v44 = vpack.c.bf16 %v966_v7, %v966_v7 }
 0x3bc   : > { %982 = vst.msk [vmem:[%s2826_s26 + $0x18] sm:$0xf] %vm596_vm4, %v974_v44  ;;  %v1676_v44 = vsel %vm475_vm2, %v2911_v55, 0.0 }
 0x3bf   : > { %v909_v24 = vpop.f32.mrf.mxu2 }
 0x3c0   : > { %v967_v35 = vmul.f32 %v2146_v13, %v909_v24  ;;  %v1694_v24 = vsel %vm475_vm2, %v2926_v38, 0.0 }
 0x3c2   : > { %v975_v19 = vpack.c.bf16 %v967_v35, %v967_v35 }
 0x3c4   : > { %983 = vst.msk [vmem:[%s2826_s26 + $0x1c] sm:$0xf] %vm596_vm4, %v975_v19 }
 0x3c5   : > { %v1260_v13 = vpop.xlane.xlu1 %1259 }
 0x3c6   : > { %v1280_v35 = vadd.f32 1e-15, %v1260_v13 }
 0x3c7   : > { %v1522_v20 = vpop.f32.mrf.mxu2 }
 0x3cf   : > { %v1524_v49 = vpop.f32.mrf.mxu2 }
 0x3d0   : > { %v1566_v1 = vpack.c.bf16 %v1524_v49, %v1522_v20 }
 0x3d2   : > { %1570 = vxpose.xlu0.c.b16.start [1/4] (short) (narrow) %v1566_v1, 16 }
 0x3d7   : > { %v1527_v60 = vpop.f32.mrf.mxu2 }
 0x3df   : > { %v1529_v40 = vpop.f32.mrf.mxu2 }
 0x3e0   : > { %v1567_v22 = vpack.c.bf16 %v1529_v40, %v1527_v60 }
 0x3e1   : > { %v1183_v4 = vpop.f32.mrf.mxu1 }
 0x3e2   : > { %1571 = vxpose.xlu0.c.b16.cont [2/4] (short) (narrow) %v1567_v22, 16 }
 0x3e7   : > { %v1532_v54 = vpop.f32.mrf.mxu2 }
 0x3e9   : > { %v1185_v15 = vpop.f32.mrf.mxu1 }
 0x3ef   : > { %v1534_v28 = vpop.f32.mrf.mxu2 }
 0x3f0   : > { %v1568_v50 = vpack.c.bf16 %v1534_v28, %v1532_v54 }
 0x3f1   : > { %v2938_v9 = vpop.f32.mrf.mxu1 }
 0x3f2   : > { %1572 = vxpose.xlu0.c.b16.cont [3/4] (short) (narrow) %v1568_v50, 16 }
 0x3f7   : > { %v1537_v34 = vpop.f32.mrf.mxu2 }
 0x3f9   : > { %v2940_v31 = vpop.f32.mrf.mxu1 }
 0x3fc   : > { %v1257_v10 = vpop.xlane.xlu2 %1256 }
 0x3ff   : > { %v1539_v5 = vpop.f32.mrf.mxu2 }
 0x400   : > { %v1569_v11 = vpack.c.bf16 %v1539_v5, %v1537_v34 }
 0x401   : > { %v1193_v32 = vpop.f32.mrf.mxu1 }
 0x402   : > { %1573 = vxpose.xlu0.c.b16.end [4/4] (short) (narrow) %v1569_v11, 16 }
 0x404   : > { %v1266_v26 = vpop.xlane.xlu2 %1265 }
 0x405   : > { %v1282_v33 = vadd.f32 1e-15, %v1266_v26 }
 0x406   : > { %v1269_v19 = vpop.xlane.xlu1 %1268 }
 0x407   : > { %v1283_v55 = vadd.f32 1e-15, %v1269_v19 }
 0x409   : > { %v2942_v56 = vpop.f32.mrf.mxu1 }
 0x40d   : > { %v1275_v38 = vpop.xlane.xlu2 %1274 }
 0x40e   : > { %v1285_v1 = vadd.f32 1e-15, %v1275_v38 }
 0x411   : > { %v2944_v39 = vpop.f32.mrf.mxu1 }
 0x419   : > { %v2949_v12 = vpop.f32.mrf.mxu1 }
 0x473   : > { %550 = vadd.xlane.f32.xlu0 %v549_v53 }
 0x47e   : > { %v1578_v27 = vpop.trf.xlu0 }
 0x47f   : > { %2058 = vmatmul.msk.bf16.vlgmr.msrb.gmra.mxu1 %vm407_vm3, %v1578_v27 }
 0x487   : > { %1235 = vrot.lane.b32.xlu0 %v1217_v30, %s2209_s8 }
 0x48f   : > { %1245 = vrot.lane.b32.xlu0 %v1222_v51, %s2209_s8 }
 0x4e6   : > { %v551_v16 = vpop.xlane.xlu0 %550 }
 0x4e7   : > { %v567_v45 = vadd.f32 1e-15, %v551_v16 }
 0x4e9   : > { %2147 = vrcp.f32 %v567_v45 }
 0x4ef   : > { %v2148_v6 = vpop.eup %2147 }
 0x4f0   : > { %v583_v37 = vmul.f32 %v2148_v6, %v2685_v43 }
 0x4f2   : > { %v591_v8 = vpack.c.bf16 %v583_v37, %v583_v37 }
 0x4f4   : > { %600 = vst.msk [vmem:[%s2677_s13 + $0xc] sm:$0xf] %vm596_vm4, %v591_v8 }
 0x4f9   : > { %v1236_v29 = vpop.permute.xlu0 %1235 }
 0x4fa   : > { %v1261_v0 = vsel %vm475_vm2, %v1236_v29, 0.0 }
 0x4fb   : > { %1262 = vadd.xlane.f32.xlu0 %v1261_v0 }
 0x4fc   : > { %v1598_v14 = vpop.f32.mrf.mxu1 }
 0x4fd   : > { %v1623_v57 = vpack.c.bf16 %v1598_v14, %v1598_v14 }
 0x4ff   : > { %v1637_v2 = vsel %vm475_vm2, %v1623_v57, 0 }
 0x500   : > { %1646 = vmatpush.bf16.xpose.msrb.mxu3 %v1637_v2 }
 0x501   : > { %v1246_v46 = vpop.permute.xlu0 %1245 }
 0x502   : > { %v1276_v43 = vsel %vm475_vm2, %v1246_v46, 0.0 }
 0x503   : > { %1271 = vadd.xlane.f32.xlu0 %v1270_v18  ;;  %1277 = vadd.xlane.f32.xlu1 %v1276_v43 }
 0x504   : > { %v1600_v7 = vpop.f32.mrf.mxu1 }
 0x507   : > { %2059 = vmatmul.msk.bf16.vlgmr.msrb.gmra.mxu3 %vm475_vm2, %v2850_v63  ;;  %v1279_v63 = vadd.f32 1e-15, %v1257_v10 }
 0x509   : > { %2149 = vrcp.f32 %v1279_v63 }
 0x50a   : > { %2151 = vrcp.f32 %v1280_v35 }
 0x50b   : > { %1677 = vadd.xlane.f32.xlu0 %v1676_v44  ;;  %1683 = vadd.xlane.f32.xlu1 %v1682_v3  ;;  %2153 = vrcp.f32 %v1283_v55 }
 0x50c   : > { %2155 = vrcp.f32 %v1282_v33 }
 0x50d   : > { %2157 = vrcp.f32 %v1285_v1 }
 0x50f   : > { %v2150_v48 = vpop.eup %2149 }
 0x510   : > { %v2152_v41 = vpop.eup %2151  ;;  %v1295_v21 = vmul.f32 %v2150_v48, %v1183_v4 }
 0x511   : > { %v2154_v49 = vpop.eup %2153 }
 0x512   : > { %v1303_v20 = vpack.c.bf16 %v1295_v21, %v1295_v21  ;;  %v2156_v40 = vpop.eup %2155  ;;  %v1299_v22 = vmul.f32 %v2154_v49, %v1193_v32 }
 0x513   : > { %1686 = vadd.xlane.f32.xlu0 %v1685_v42  ;;  %1692 = vadd.xlane.f32.xlu1 %v1691_v52  ;;  %v1298_v54 = vmul.f32 %v2156_v40, %v2940_v31  ;;  %v2158_v50 = vpop.eup %2157 }
 0x514   : > { %v1307_v28 = vpack.c.bf16 %v1299_v22, %v1299_v22  ;;  %v1301_v34 = vmul.f32 %v2158_v50, %v2944_v39 }
 0x516   : > { %v1309_v5 = vpack.c.bf16 %v1301_v34, %v1301_v34 }
 0x517   : > { %2060 = vmatmul.msk.bf16.gmra.mxu3 %vm475_vm2, %v2875_v58  ;;  %v1296_v58 = vmul.f32 %v2152_v41, %v1185_v15 }
 0x519   : > { %v1304_v60 = vpack.c.bf16 %v1296_v58, %v1296_v58 }
 0x51b   : > { %1695 = vadd.xlane.f32.xlu0 %v1694_v24 }
 0x527   : > { %2061 = vmatmul.msk.bf16.gmra.mxu3 %vm475_vm2, %v2896_v62  ;;  %v1306_v62 = vpack.c.bf16 %v1298_v54, %v1298_v54 }
 0x52c   : > { %1319 = vrot.lane.b32.xlu1 %v1303_v20, %s2210_s19 }
 0x52f   : > { %1321 = vrot.lane.b32.xlu0 %v1304_v60, %s2210_s19 }
 0x534   : > { %1327 = vrot.lane.b32.xlu1 %v1307_v28, %s2210_s19 }
 0x537   : > { %1325 = vrot.lane.b32.xlu0 %v1306_v62, %s2210_s19  ;;  %2062 = vmatmul.msk.bf16.gmra.mxu3 %vm475_vm2, %v2907_v36 }
 0x53f   : > { %1331 = vrot.lane.b32.xlu0 %v1309_v5, %s2210_s19 }
 0x56e   : > { %v1263_v11 = vpop.xlane.xlu0 %1262 }
 0x56f   : > { %v1281_v59 = vadd.f32 1e-15, %v1263_v11 }
 0x571   : > { %2159 = vrcp.f32 %v1281_v59 }
 0x576   : > { %v1278_v47 = vpop.xlane.xlu1 %1277  ;;  %v1272_v53 = vpop.xlane.xlu0 %1271 }
 0x577   : > { %v2160_v27 = vpop.eup %2159  ;;  %v1286_v23 = vadd.f32 1e-15, %v1278_v47  ;;  %v1284_v25 = vadd.f32 1e-15, %v1272_v53 }
 0x578   : > { %v1297_v30 = vmul.f32 %v2160_v27, %v2938_v9  ;;  %v1681_v9 = vpop.xlane.xlu2 %1680 }
 0x579   : > { %2161 = vrcp.f32 %v1286_v23  ;;  %v1701_v39 = vadd.f32 1e-15, %v1681_v9 }
 0x57a   : > { %2163 = vrcp.f32 %v1284_v25  ;;  %v1305_v61 = vpack.c.bf16 %v1297_v30, %v1297_v30 }
 0x57c   : > { %1323 = vrot.lane.b32.xlu2 %v1305_v61, %s2210_s19 }
 0x57e   : > { %v1678_v36 = vpop.xlane.xlu0 %1677  ;;  %v1684_v29 = vpop.xlane.xlu1 %1683 }
 0x57f   : > { %v2162_v51 = vpop.eup %2161  ;;  %v1700_v15 = vadd.f32 1e-15, %v1678_v36 }
 0x580   : > { %v2164_v4 = vpop.eup %2163  ;;  %v1302_v31 = vmul.f32 %v2162_v51, %v2949_v12  ;;  %v1702_v12 = vadd.f32 1e-15, %v1684_v29  ;;  %v1690_v10 = vpop.xlane.xlu2 %1689 }
 0x581   : > { %v1300_v32 = vmul.f32 %v2164_v4, %v2942_v56  ;;  %2165 = vrcp.f32 %v1700_v15  ;;  %v1704_v13 = vadd.f32 1e-15, %v1690_v10 }
 0x582   : > { %v1310_v16 = vpack.c.bf16 %v1302_v31, %v1302_v31  ;;  %2167 = vrcp.f32 %v1701_v39 }
 0x583   : > { %v1308_v45 = vpack.c.bf16 %v1300_v32, %v1300_v32  ;;  %2169 = vrcp.f32 %v1702_v12 }
 0x584   : > { %1333 = vrot.lane.b32.xlu1 %v1310_v16, %s2210_s19 }
 0x585   : > { %1329 = vrot.lane.b32.xlu2 %v1308_v45, %s2210_s19 }
 0x586   : > { %v1687_v14 = vpop.xlane.xlu0 %1686  ;;  %v1693_v18 = vpop.xlane.xlu1 %1692 }
 0x587   : > { %v2166_v6 = vpop.eup %2165  ;;  %v1703_v46 = vadd.f32 1e-15, %v1687_v14  ;;  %v1705_v48 = vadd.f32 1e-15, %v1693_v18 }
 0x588   : > { %v2168_v56 = vpop.eup %2167  ;;  %v1699_v22 = vpop.xlane.xlu2 %1698 }
 0x589   : > { %v2170_v7 = vpop.eup %2169  ;;  %2171 = vrcp.f32 %v1703_v46  ;;  %v1707_v28 = vadd.f32 1e-15, %v1699_v22 }
 0x58a   : > { %v1648_v37 = vpop.f32.mrf.mxu3  ;;  %2173 = vrcp.f32 %v1704_v13 }
 0x58b   : > { %v1716_v8 = vmul.f32 %v2166_v6, %v1648_v37  ;;  %2175 = vrcp.f32 %v1705_v48 }
 0x58d   : > { %v1724_v0 = vpack.c.bf16 %v1716_v8, %v1716_v8 }
 0x58e   : > { %v1696_v43 = vpop.xlane.xlu0 %1695 }
 0x58f   : > { %1740 = vrot.lane.b32.xlu2 %v1724_v0, %s2210_s19  ;;  %v2172_v24 = vpop.eup %2171  ;;  %v1706_v49 = vadd.f32 1e-15, %v1696_v43 }
 0x590   : > { %v2174_v41 = vpop.eup %2173 }
 0x591   : > { %v2176_v1 = vpop.eup %2175  ;;  %2177 = vrcp.f32 %v1706_v49 }
 0x592   : > { %v1650_v57 = vpop.f32.mrf.mxu3  ;;  %2179 = vrcp.f32 %v1707_v28 }
 0x593   : > { %v1717_v17 = vmul.f32 %v2168_v56, %v1650_v57 }
 0x595   : > { %v1725_v2 = vpack.c.bf16 %v1717_v17, %v1717_v17 }
 0x597   : > { %1742 = vrot.lane.b32.xlu0 %v1725_v2, %s2210_s19  ;;  %v2178_v62 = vpop.eup %2177 }
 0x598   : > { %v2180_v11 = vpop.eup %2179 }
 0x59a   : > { %v1653_v44 = vpop.f32.mrf.mxu3 }
 0x59b   : > { %v1718_v3 = vmul.f32 %v2170_v7, %v1653_v44 }
 0x59d   : > { %v1726_v42 = vpack.c.bf16 %v1718_v3, %v1718_v3 }
 0x59e   : > { %v1320_v52 = vpop.permute.xlu1 %1319 }
 0x59f   : > { %1344 = vst.msk [vmem:[%s2677_s13] sm:$0xf] %vm1343_vm5, %v1320_v52  ;;  %1744 = vrot.lane.b32.xlu1 %v1726_v42, %s2210_s19 }
 0x5a1   : > { %v1322_v63 = vpop.permute.xlu0 %1321 }
 0x5a2   : > { %1345 = vst.msk [vmem:[%s2677_s13 + $0x4] sm:$0xf] %vm1343_vm5, %v1322_v63  ;;  %v1655_v35 = vpop.f32.mrf.mxu3 }
 0x5a3   : > { %v1719_v19 = vmul.f32 %v2172_v24, %v1655_v35 }
 0x5a5   : > { %v1727_v26 = vpack.c.bf16 %v1719_v19, %v1719_v19 }
 0x5a6   : > { %v1328_v55 = vpop.permute.xlu1 %1327 }
 0x5a7   : > { %1348 = vst.msk [vmem:[%s2677_s13 + $0x10] sm:$0xf] %vm1343_vm5, %v1328_v55  ;;  %1746 = vrot.lane.b32.xlu2 %v1727_v26, %s2210_s19 }
 0x5a9   : > { %v1326_v33 = vpop.permute.xlu0 %1325 }
 0x5aa   : > { %1347 = vst.msk [vmem:[%s2677_s13 + $0xc] sm:$0xf] %vm1343_vm5, %v1326_v33  ;;  %v1658_v21 = vpop.f32.mrf.mxu3 }
 0x5ab   : > { %v1720_v58 = vmul.f32 %v2174_v41, %v1658_v21 }
 0x5ad   : > { %v1728_v20 = vpack.c.bf16 %v1720_v58, %v1720_v58 }
 0x5af   : > { %1748 = vrot.lane.b32.xlu0 %v1728_v20, %s2210_s19 }
 0x5b1   : > { %v1332_v38 = vpop.permute.xlu0 %1331 }
 0x5b2   : > { %1350 = vst.msk [vmem:[%s2677_s13 + $0x18] sm:$0xf] %vm1343_vm5, %v1332_v38  ;;  %v1660_v60 = vpop.f32.mrf.mxu3 }
 0x5b3   : > { %v1721_v40 = vmul.f32 %v2176_v1, %v1660_v60 }
 0x5b5   : > { %v1729_v54 = vpack.c.bf16 %v1721_v40, %v1721_v40 }
 0x5b7   : > { %1750 = vrot.lane.b32.xlu1 %v1729_v54, %s2210_s19 }
 0x5ba   : > { %v1663_v50 = vpop.f32.mrf.mxu3 }
 0x5bb   : > { %v1722_v34 = vmul.f32 %v2178_v62, %v1663_v50 }
 0x5bd   : > { %v1730_v5 = vpack.c.bf16 %v1722_v34, %v1722_v34 }
 0x5bf   : > { %1752 = vrot.lane.b32.xlu2 %v1730_v5, %s2210_s19 }
 0x5c2   : > { %v1665_v59 = vpop.f32.mrf.mxu3 }
 0x5c3   : > { %v1723_v47 = vmul.f32 %v2180_v11, %v1665_v59 }
 0x5c5   : > { %v1731_v53 = vpack.c.bf16 %v1723_v47, %v1723_v47 }
 0x5c7   : > { %1754 = vrot.lane.b32.xlu0 %v1731_v53, %s2210_s19 }
 0x5d6   : > { %v1324_v27 = vpop.permute.xlu2 %1323 }
 0x5d7   : > { %1346 = vst.msk [vmem:[%s2677_s13 + $0x8] sm:$0xf] %vm1343_vm5, %v1324_v27 }
 0x5df   : > { %v1330_v23 = vpop.permute.xlu2 %1329 }
 0x5e0   : > { %1349 = vst.msk [vmem:[%s2677_s13 + $0x14] sm:$0xf] %vm1343_vm5, %v1330_v23 }
 0x5e9   : > { %v1741_v25 = vpop.permute.xlu2 %1740 }
 0x5ea   : > { %1764 = vst.msk [vmem:[%s2826_s26] sm:$0xf] %vm1343_vm5, %v1741_v25 }
 0x5f6   : > { %v1334_v30 = vpop.permute.xlu1 %1333 }
 0x5f7   : > { %1351 = vst.msk [vmem:[%s2677_s13 + $0x1c] sm:$0xf] %vm1343_vm5, %v1334_v30 }
 0x601   : > { %v1747_v61 = vpop.permute.xlu2 %1746 }
 0x602   : > { %1767 = vst.msk [vmem:[%s2826_s26 + $0xc] sm:$0xf] %vm1343_vm5, %v1747_v61 }
 0x609   : > { %v1743_v36 = vpop.permute.xlu0 %1742 }
 0x60a   : > { %1765 = vst.msk [vmem:[%s2826_s26 + $0x4] sm:$0xf] %vm1343_vm5, %v1743_v36 }
 0x611   : > { %v1745_v51 = vpop.permute.xlu1 %1744 }
 0x612   : > { %1766 = vst.msk [vmem:[%s2826_s26 + $0x8] sm:$0xf] %vm1343_vm5, %v1745_v51 }
 0x619   : > { %v1753_v4 = vpop.permute.xlu2 %1752 }
 0x61a   : > { %1770 = vst.msk [vmem:[%s2826_s26 + $0x18] sm:$0xf] %vm1343_vm5, %v1753_v4 }
 0x621   : > { %v1749_v15 = vpop.permute.xlu0 %1748 }
 0x622   : > { %1768 = vst.msk [vmem:[%s2826_s26 + $0x10] sm:$0xf] %vm1343_vm5, %v1749_v15 }
 0x629   : > { %v1751_v31 = vpop.permute.xlu1 %1750 }
 0x62a   : > { %1769 = vst.msk [vmem:[%s2826_s26 + $0x14] sm:$0xf] %vm1343_vm5, %v1751_v31 }
 0x639   : > { %v1755_v32 = vpop.permute.xlu0 %1754 }
 0x63a   : > { %1771 = vst.msk [vmem:[%s2826_s26 + $0x1c] sm:$0xf] %vm1343_vm5, %v1755_v32 }
 0x63b PF: > { %s15_s17 = sadd.s32 1, %s2203_s17   ;;  %s3051_s15 = smov %s2199_s16 }
 0x63c   : > { %p12_p5 = scmp.ge.s32.totalorder %s15_s17, 4   ;;  %s3052_s16 = smov %s3054_s18 }
 0x63e   :  { %14 = sbr.rel (!%p12_p5) target bundleno = 2 (0x2), region = 85 }

// kernel: _lambda_.5
= control target key start
LH: loop header
LB: loop body
LE: loop exit
PB: predicated region body
PF: predicated region fallthrough
CT: control target
= control target key end

     0   :  { %s2602_s9 = smov 0   ;;  %s2604_s10 = smov 0   ;;  %s4190_s0 = inlined_call_operand.vmem [shape: bf16[2,8,8,48], index: 0, kind: input, shape index: {}]   ;;  %s4191_s1 = inlined_call_operand.vmem [shape: f32[25,1,48], index: 1, kind: input, shape index: {}]   ;;  %s4192_s2 = inlined_call_operand.vmem [shape: bf16[2,8,8,48], index: 2, kind: output, shape index: {}]  }
   0x1   :  { %s2606_s11 = smov 0  }
   0x2 LB: > { %s24_s12 = sadd.s32 1, %s2580_s10  ;;  %p2453_p0 = scmp.ge.s32.totalorder %s2584_s11, 1  ;;  %s2584_s11 = sphi %s2606_s11, %s12_s11   ;;  %s2580_s10 = sphi %s2604_s10, %s4501_s10   ;;  %s2576_s9 = sphi %s2602_s9, %s4500_s9  }
   0x3   : > { %p26_p1 = scmp.ge.s32.totalorder %s24_s12, 2  ;;  %p139_p2 = scmp.lt.s32.totalorder %s2584_s11, 3 }
   0x5   : > { %s4503_s12 = smov (%p26_p1, %s24_s12), 0  ;;  %p140_p3 = pnand %p2453_p0, %p139_p2 }
   0x7   : > { %143 = sbr.rel (%p140_p3) target bundleno = 370 (0x172), region = 28 }
   0xc   : > { %vm190_vm0 = vcmask 388096   ;;  %v2586_v0 = vmov 0   ;;  %vm192_vm1 = vcmask 386048   ;;  %vm201_vm2 = vcmask 385024   ;;  %p170_p4 = scmp.lt.s32.totalorder %s2576_s9, 1 }
   0xd   : > { %191 = vst.msk [vmem:[#allocation2] sm:$0xf] %vm190_vm0, %v2586_v0  ;;  %v2661_v5 = vld [vmem:[%s4191_s1 + $0x1] ss:$0 sm:$0xff]  ;;  %vm214_vm3 = vcmask 386049   ;;  %vm374_vm4 = vcmask 1046528  }
   0xe   : > { %194 = vst.msk [vmem:[#allocation2 + $0x8] sm:$0xf] %vm190_vm0, %v2586_v0  ;;  %s4505_s9 = smov (!%p170_p4, %s2576_s9), 1  ;;  %v2707_v17 = vld [vmem:[%s4191_s1 + $0x2] ss:$0 sm:$0xff]  ;;  %vm468_vm5 = vcmask 1045504  }
   0xf   : > { %197 = vst.msk [vmem:[#allocation2 + $0x50] sm:$0xf] %vm190_vm0, %v2586_v0  ;;  %s2484_s13 = sshll.u32 %s4505_s9, 5  ;;  %v2724_v25 = vld [vmem:[%s4191_s1 + $0x3] ss:$0 sm:$0xff]  ;;  %vm276_vm6 = vcmask 388097  }
  0x10   : > { %199 = vst.msk [vmem:[#allocation2 + $0x58] sm:$0xf] %vm190_vm0, %v2586_v0  ;;  %s2670_s18 = scalar_lea.vmem %s4190_s0, %s2484_s13  ;;  %v2729_v26 = vld [vmem:[%s4191_s1 + $0x4] ss:$0 sm:$0xff]  ;;  %v2742_v32 = vld [vmem:[%s4191_s1] ss:$0 sm:$0xff]  ;;  %s3711_s27 = scalar_lea.vmem %s4192_s2, %s2484_s13 }
  0x11   : > { %193 = vst.msk [vmem:[#allocation2 + $0x4] sm:$0x3] %vm192_vm1, %v2586_v0  ;;  %v2683_v9 = vld [vmem:[%s2670_s18] sm:$0xf]  ;;  %v2702_v16 = vld [vmem:[%s2670_s18 + $0x4] sm:$0xf] }
  0x12   : > { %195 = vst.msk [vmem:[#allocation2 + $0xc] sm:$0x3] %vm192_vm1, %v2586_v0  ;;  %v243_v19 = vrot.slane %v2683_v9, 7  ;;  %v245_v24 = vrot.slane %v2702_v16, 7  ;;  %v2757_v42 = vld [vmem:[%s4191_s1 + $0x7] ss:$0 sm:$0xff] }
  0x13   : > { %198 = vst.msk [vmem:[#allocation2 + $0x54] sm:$0x3] %vm192_vm1, %v2586_v0  ;;  %v2775_v53 = vld [vmem:[%s2670_s18 + $0x8] sm:$0xf]  ;;  %v2809_v9 = vld [vmem:[%s4191_s1 + $0x6] ss:$0 sm:$0xff] }
  0x14   : > { %200 = vst.msk [vmem:[#allocation2 + $0x5c] sm:$0x3] %vm192_vm1, %v2586_v0  ;;  %v415_v10 = vld [vmem:[#allocation2] sm:$0xe]  ;;  %v244_v33 = vrot.slane %v243_v19, 4  ;;  %v246_v41 = vrot.slane %v245_v24, 4 }
  0x15   : > { %202 = vst.msk [vmem:[#allocation2] sm:$0x1] %vm201_vm2, %v2586_v0  ;;  %v416_v13 = vld [vmem:[#allocation2 + $0x8] sm:$0xe]  ;;  %v603_v18 = vld [vmem:[#allocation2] sm:$0xc]  ;;  %v423_v20 = vunpack.c.l.bf16 %v415_v10 }
  0x16   : > { %203 = vst.msk [vmem:[#allocation2 + $0x8] sm:$0x1] %vm201_vm2, %v2586_v0  ;;  %v424_v21 = vunpack.c.l.bf16 %v416_v13  ;;  %v604_v27 = vld [vmem:[#allocation2 + $0x8] sm:$0xc]  ;;  %v611_v34 = vunpack.c.l.bf16 %v603_v18  ;;  %v2787_v59 = vld [vmem:[%s4191_s1 + $0x8] ss:$0 sm:$0xff] }
  0x17   : > { %204 = vst.msk [vmem:[#allocation2 + $0x10] sm:$0x1] %vm201_vm2, %v2586_v0  ;;  %v2731_v28 = vld [vmem:[#allocation2 + $0x8] sm:$0xe]  ;;  %v436_v37 = vmul.f32 %v2707_v17, %v423_v20  ;;  %v612_v45 = vunpack.c.l.bf16 %v604_v27  ;;  %v530_v49 = vmul.f32 %v2724_v25, %v423_v20  ;;  %vm562_vm7 = vcmask 1044480  }
  0x18   : > { %205 = vst.msk [vmem:[#allocation2 + $0x18] sm:$0x1] %vm201_vm2, %v2586_v0  ;;  %v2644_v1 = vld [vmem:[#allocation2 + $0x4] sm:$0x1]  ;;  %v2737_v31 = vld [vmem:[#allocation2 + $0x8] sm:$0xc]  ;;  %v438_v38 = vmul.f32 %v2707_v17, %v424_v21  ;;  %v836_v46 = vunpack.c.l.bf16 %v2731_v28  ;;  %v2768_v50 = vmul.f32 %v2729_v26, %v611_v34  ;;  %v532_v51 = vmul.f32 %v2724_v25, %v424_v21 }
  0x19   : > { %206 = vst.msk [vmem:[#allocation2 + $0x20] sm:$0x1] %vm201_vm2, %v2586_v0  ;;  %v2649_v2 = vld [vmem:[#allocation2 + $0xc] sm:$0x1]  ;;  %v329_v4 = vunpack.c.l.bf16 %v2644_v1  ;;  %v1022_v52 = vunpack.c.l.bf16 %v2737_v31  ;;  %v469_v54 = vrot.slane %v436_v37, 2  ;;  %vm656_vm8 = vcmask 1043456  }
  0x1a   : > { %207 = vst.msk [vmem:[#allocation2 + $0x28] sm:$0x1] %vm201_vm2, %v2586_v0  ;;  %v330_v6 = vunpack.c.l.bf16 %v2649_v2  ;;  %v2746_v35 = vld [vmem:[#allocation2 + $0xc] sm:$0x1]  ;;  %v472_v55 = vrot.slane %v438_v38, 2  ;;  %v2823_v27 = vmul.f32 %v2787_v59, %v836_v46 }
  0x1b   : > { %208 = vst.msk [vmem:[#allocation2 + $0x30] sm:$0x1] %vm201_vm2, %v2586_v0  ;;  %v2686_v11 = vmul.f32 %v2661_v5, %v329_v4  ;;  %v437_v43 = vmul.f32 %v2707_v17, %v329_v4  ;;  %v743_v56 = vunpack.c.l.bf16 %v2746_v35  ;;  %v247_v4 = vrot.slane %v2775_v53, 7  ;;  %v2879_v53 = vld [vmem:[%s4191_s1 + $0xb] ss:$0 sm:$0xff] }
  0x1c   : > { %v2651_v3 = vld [vmem:[#allocation2] sm:$0xf]  ;;  %209 = vst.msk [vmem:[#allocation2 + $0x38] sm:$0x1] %vm201_vm2, %v2586_v0  ;;  %v2692_v14 = vmul.f32 %v2661_v5, %v330_v6  ;;  %v439_v47 = vmul.f32 %v2707_v17, %v330_v6  ;;  %v563_v6 = vrot.slane %v530_v49, 3 }
  0x1d   : > { %210 = vst.msk [vmem:[#allocation2 + $0x40] sm:$0x1] %vm201_vm2, %v2586_v0  ;;  %v301_v7 = vunpack.c.l.bf16 %v2651_v3  ;;  %v2676_v8 = vld [vmem:[#allocation2 + $0x8] sm:$0xf]  ;;  %v376_v22 = vrot.slane %v2686_v11, 1  ;;  %v470_v60 = vrot.slane %v437_v43, 2  ;;  %v850_v20 = vmul.f32 %v2757_v42, %v743_v56 }
  0x1e   : > { %211 = vst.msk [vmem:[#allocation2 + $0x48] sm:$0x1] %vm201_vm2, %v2586_v0  ;;  %v302_v12 = vunpack.c.l.bf16 %v2676_v8  ;;  %v379_v29 = vrot.slane %v2692_v14, 1  ;;  %v2781_v58 = vld [vmem:[#allocation2 + $0x8] sm:$0xf]  ;;  %v473_v1 = vrot.slane %v439_v47, 2  ;;  %v849_v8 = vmul.f32 %v2757_v42, %v836_v46 }
  0x1f   : > { %212 = vst.msk [vmem:[#allocation2 + $0x50] sm:$0x1] %vm201_vm2, %v2586_v0  ;;  %v2697_v15 = vmul.f32 %v2661_v5, %v301_v7  ;;  %v313_v57 = vmul.f32 %v2742_v32, %v301_v7  ;;  %v626_v7 = vmul.f32 %v2729_v26, %v612_v45  ;;  %v706_v10 = vunpack.c.l.bf16 %v2781_v58  ;;  %v2835_v46 = vld [vmem:[%s4191_s1 + $0x5] ss:$0 sm:$0xff] }
  0x20   : > { %213 = vst.msk [vmem:[#allocation2 + $0x58] sm:$0x1] %vm201_vm2, %v2586_v0  ;;  %v344_v23 = vmul.f32 %v2661_v5, %v302_v12  ;;  %v314_v62 = vmul.f32 %v2742_v32, %v302_v12  ;;  %v657_v11 = vrot.slane %v2768_v50, 4  ;;  %v566_v12 = vrot.slane %v532_v51, 3 }
  0x21   : > { %215 = vst.msk [vmem:[#allocation2 + $0x4] sm:$0x2] %vm214_vm3, %v2586_v0  ;;  %v375_v30 = vrot.slane %v2697_v15, 1  ;;  %v471_v14 = vsel %vm468_vm5, %v469_v54, %v470_v60  ;;  %v474_v21 = vsel %vm468_vm5, %v472_v55, %v473_v1  ;;  %v757_v28 = vmul.f32 %v2809_v9, %v743_v56 }
  0x22   : > { %216 = vst.msk [vmem:[#allocation2 + $0xc] sm:$0x2] %vm214_vm3, %v2586_v0  ;;  %v378_v39 = vrot.slane %v344_v23, 1  ;;  %v881_v31 = vrot.slane %v849_v8, 2 }
  0x23   : > { %217 = vst.msk [vmem:[#allocation2 + $0x14] sm:$0x2] %vm214_vm3, %v2586_v0  ;;  %v377_v61 = vsel %vm374_vm4, %v375_v30, %v376_v22  ;;  %v789_v45 = vrot.slane %v757_v28, 1 }
  0x24   : > { %218 = vst.msk [vmem:[#allocation2 + $0x1c] sm:$0x2] %vm214_vm3, %v2586_v0  ;;  %v380_v2 = vsel %vm374_vm4, %v378_v39, %v379_v29  ;;  %v407_v13 = vadd.f32 %v377_v61, %v313_v57  ;;  %v756_v29 = vmul.f32 %v2809_v9, %v706_v10  ;;  %v882_v39 = vrot.slane %v850_v20, 2 }
  0x25   : > { %219 = vst.msk [vmem:[#allocation2 + $0x24] sm:$0x2] %vm214_vm3, %v2586_v0  ;;  %v408_v15 = vadd.f32 %v380_v2, %v314_v62 }
  0x26   : > { %220 = vst.msk [vmem:[#allocation2 + $0x2c] sm:$0x2] %vm214_vm3, %v2586_v0  ;;  %v501_v34 = vadd.f32 %v471_v14, %v407_v13  ;;  %v788_v47 = vrot.slane %v756_v29, 1  ;;  %v2847_v62 = vsel %vm468_vm5, %v881_v31, %v882_v39  ;;  %v248_v29 = vrot.slane %v247_v4, 4 }
  0x27   : > { %221 = vst.msk [vmem:[#allocation2 + $0x34] sm:$0x2] %vm214_vm3, %v2586_v0 }
  0x28   : > { %v509_v36 = vld [vmem:[#allocation2 + $0x4] sm:$0x3]  ;;  %222 = vst.msk [vmem:[#allocation2 + $0x3c] sm:$0x2] %vm214_vm3, %v2586_v0 }
  0x29   : > { %223 = vst.msk [vmem:[#allocation2 + $0x44] sm:$0x2] %vm214_vm3, %v2586_v0  ;;  %v510_v40 = vld [vmem:[#allocation2 + $0xc] sm:$0x3]  ;;  %v517_v44 = vunpack.c.l.bf16 %v509_v36  ;;  %v502_v36 = vadd.f32 %v474_v21, %v408_v15 }
  0x2a   : > { %224 = vst.msk [vmem:[#allocation2 + $0x4c] sm:$0x2] %vm214_vm3, %v2586_v0  ;;  %v518_v48 = vunpack.c.l.bf16 %v510_v40 }
  0x2b   : > { %225 = vst.msk [vmem:[#allocation2 + $0x54] sm:$0x2] %vm214_vm3, %v2586_v0  ;;  %v531_v63 = vmul.f32 %v2724_v25, %v517_v44  ;;  %v625_v18 = vmul.f32 %v2729_v26, %v517_v44 }
  0x2c   : > { %226 = vst.msk [vmem:[#allocation2 + $0x5c] sm:$0x2] %vm214_vm3, %v2586_v0  ;;  %v2798_v0 = vld [vmem:[%s4191_s1 + $0x9] ss:$0 sm:$0xff]  ;;  %v533_v3 = vmul.f32 %v2724_v25, %v518_v48  ;;  %v627_v23 = vmul.f32 %v2729_v26, %v518_v48 }
  0x2d   : > { %277 = vst.msk [vmem:[#allocation2 + $0x10] sm:$0xe] %vm276_vm6, %v243_v19  ;;  %v564_v16 = vrot.slane %v531_v63, 3  ;;  %v921_v19 = vld [vmem:[#allocation2 + $0xc] sm:$0x3]  ;;  %v658_v38 = vrot.slane %v625_v18, 4 }
  0x2e   : > { %278 = vst.msk [vmem:[#allocation2 + $0x14] sm:$0x1] %vm201_vm2, %v244_v33  ;;  %v567_v22 = vrot.slane %v533_v3, 3  ;;  %v2828_v33 = vmul.f32 %v2798_v0, %v1022_v52  ;;  %v929_v35 = vunpack.c.l.bf16 %v921_v19 }
  0x2f   : > { %279 = vst.msk [vmem:[#allocation2 + $0x18] sm:$0xe] %vm276_vm6, %v245_v24  ;;  %v660_v24 = vrot.slane %v626_v7, 4  ;;  %v565_v37 = vsel %vm562_vm7, %v563_v6, %v564_v16  ;;  %v659_v57 = vsel %vm656_vm8, %v657_v11, %v658_v38  ;;  %v719_v6 = vmul.f32 %v2835_v46, %v706_v10 }
  0x30   : > { %280 = vst.msk [vmem:[#allocation2 + $0x1c] sm:$0x1] %vm201_vm2, %v246_v41  ;;  %v568_v40 = vsel %vm562_vm7, %v566_v12, %v567_v22  ;;  %v661_v41 = vrot.slane %v627_v23, 4  ;;  %v595_v50 = vadd.f32 %v565_v37, %v501_v34  ;;  %v2839_v51 = vmul.f32 %v2787_v59, %v929_v35 }
  0x31   : > { %281 = vst.msk [vmem:[#allocation2 + $0x20] sm:$0xe] %vm276_vm6, %v247_v4  ;;  %v2842_v52 = vmul.f32 %v2798_v0, %v929_v35  ;;  %v596_v60 = vadd.f32 %v568_v40, %v502_v36  ;;  %v2853_v7 = vsel %vm374_vm4, %v788_v47, %v789_v45 }
  0x32   : > { %v662_v2 = vsel %vm656_vm8, %v660_v24, %v661_v41  ;;  %v689_v11 = vadd.f32 %v659_v57, %v595_v50  ;;  %v2890_v50 = vld [vmem:[%s4191_s1 + $0xa] ss:$0 sm:$0xff]  ;;  %282 = vst.msk [vmem:[#allocation2 + $0x24] sm:$0x1] %vm201_vm2, %v248_v29 }
  0x33   : > { %v690_v20 = vadd.f32 %v662_v2, %v596_v60 }
  0x34   : > { %v295_v30 = vld [vmem:[#allocation2 + $0x10] sm:$0xf]  ;;  %v2868_v36 = vadd.f32 %v719_v6, %v689_v11 }
  0x35   : > { %v303_v43 = vunpack.c.l.bf16 %v295_v30  ;;  %v417_v44 = vld [vmem:[#allocation2 + $0x10] sm:$0xe]  ;;  %v323_v55 = vld [vmem:[#allocation2 + $0x14] sm:$0x1] }
  0x36   : > { %v605_v48 = vld [vmem:[#allocation2 + $0x10] sm:$0xc]  ;;  %v425_v58 = vunpack.c.l.bf16 %v417_v44  ;;  %v736_v3 = vld [vmem:[#allocation2 + $0x14] sm:$0x1]  ;;  %v331_v12 = vunpack.c.l.bf16 %v323_v55 }
  0x37   : > { %v699_v54 = vld [vmem:[#allocation2 + $0x10] sm:$0xf]  ;;  %v346_v63 = vmul.f32 %v2661_v5, %v303_v43  ;;  %v613_v1 = vunpack.c.l.bf16 %v605_v48  ;;  %v511_v18 = vld [vmem:[#allocation2 + $0x14] sm:$0x3]  ;;  %v744_v22 = vunpack.c.l.bf16 %v736_v3  ;;  %v315_v37 = vmul.f32 %v2742_v32, %v303_v43 }
  0x38   : > { %v829_v61 = vld [vmem:[#allocation2 + $0x10] sm:$0xe]  ;;  %v707_v8 = vunpack.c.l.bf16 %v699_v54  ;;  %v440_v19 = vmul.f32 %v2707_v17, %v425_v58  ;;  %v347_v21 = vmul.f32 %v2661_v5, %v331_v12  ;;  %v2860_v23 = vmul.f32 %v2724_v25, %v425_v58  ;;  %v922_v45 = vld [vmem:[#allocation2 + $0x14] sm:$0x3] }
  0x39   : > { %v837_v15 = vunpack.c.l.bf16 %v829_v61  ;;  %v1015_v16 = vld [vmem:[#allocation2 + $0x10] sm:$0xc]  ;;  %v381_v10 = vrot.slane %v346_v63, 1  ;;  %v2863_v24 = vmul.f32 %v2729_v26, %v613_v1  ;;  %v519_v35 = vunpack.c.l.bf16 %v511_v18  ;;  %v1144_v1 = vld [vmem:[#allocation2 + $0x14] sm:$0x1] }
  0x3a   : > { %v1107_v28 = vld [vmem:[#allocation2 + $0x10] sm:$0xf]  ;;  %v758_v30 = vmul.f32 %v2809_v9, %v707_v8  ;;  %v1023_v31 = vunpack.c.l.bf16 %v1015_v16  ;;  %v382_v34 = vrot.slane %v347_v21, 1  ;;  %v441_v39 = vmul.f32 %v2707_v17, %v331_v12  ;;  %v296_v12 = vld [vmem:[#allocation2 + $0x18] sm:$0xf] }
  0x3b   : > { %v2872_v38 = vmul.f32 %v2757_v42, %v837_v15  ;;  %v475_v40 = vrot.slane %v440_v19, 2  ;;  %v720_v41 = vmul.f32 %v2835_v46, %v707_v8  ;;  %v1115_v44 = vunpack.c.l.bf16 %v1107_v28  ;;  %v2892_v54 = vld [vmem:[#allocation2 + $0x10] sm:$0xe]  ;;  %v2911_v16 = vld [vmem:[%s4191_s1 + $0xc] ss:$0 sm:$0xff] }
  0x3c   : > { %v759_v4 = vmul.f32 %v2809_v9, %v744_v22  ;;  %v569_v47 = vrot.slane %v2860_v23, 3  ;;  %v663_v43 = vrot.slane %v2863_v24, 4  ;;  %v2885_v48 = vmul.f32 %v2787_v59, %v837_v15  ;;  %v2898_v61 = vld [vmem:[#allocation2 + $0x10] sm:$0xc]  ;;  %v2974_v24 = vld [vmem:[#allocation2 + $0x18] sm:$0xc] }
  0x3d   : > { %v383_v55 = vsel %vm374_vm4, %v381_v10, %v382_v34  ;;  %v728_v57 = vadd.f32 %v720_v41, %v690_v20  ;;  %v791_v58 = vrot.slane %v758_v30, 1  ;;  %v2896_v60 = vmul.f32 %v2798_v0, %v1023_v31  ;;  %v418_v31 = vld [vmem:[#allocation2 + $0x18] sm:$0xe]  ;;  %4262 = vst [vmem:[#allocation8_spill] sm:$0xff] %v2974_v24 }
  0x3e   : > { %4257 = vst [vmem:[#allocation3_spill] sm:$0xff] %v2885_v48  ;;  %v535_v63 = vmul.f32 %v2724_v25, %v519_v35  ;;  %v884_v2 = vrot.slane %v2872_v38, 2  ;;  %v476_v3 = vrot.slane %v441_v39, 2  ;;  %v852_v6 = vmul.f32 %v2757_v42, %v744_v22  ;;  %v606_v34 = vld [vmem:[#allocation2 + $0x18] sm:$0xc] }
  0x3f   : > { %4258 = vst [vmem:[#allocation4_spill] sm:$0xff] %v2896_v60  ;;  %v930_v8 = vunpack.c.l.bf16 %v922_v45  ;;  %v2905_v11 = vmul.f32 %v2879_v53, %v1115_v44  ;;  %v4193_v15 = vunpack.c.l.bf16 %v2892_v54  ;;  %v409_v18 = vadd.f32 %v383_v55, %v315_v37 }
  0x40   : > { %v792_v19 = vrot.slane %v759_v4, 1  ;;  %v629_v22 = vmul.f32 %v2729_v26, %v519_v35  ;;  %v1152_v10 = vunpack.c.l.bf16 %v1144_v1  ;;  %v2918_v28 = vmul.f32 %v2890_v50, %v1115_v44  ;;  %v700_v35 = vld [vmem:[#allocation2 + $0x18] sm:$0xf]  ;;  %v324_v4 = vld [vmem:[#allocation2 + $0x1c] sm:$0x1] }
  0x41   : > { %v570_v29 = vrot.slane %v535_v63, 3  ;;  %v304_v30 = vunpack.c.l.bf16 %v296_v12  ;;  %v477_v38 = vsel %vm468_vm5, %v475_v40, %v476_v3  ;;  %v885_v37 = vrot.slane %v852_v6, 2  ;;  %v2937_v3 = vld [vmem:[#allocation2 + $0x14] sm:$0x3] }
  0x42   : > { %v2922_v39 = vmul.f32 %v2787_v59, %v930_v8  ;;  %v2925_v41 = vmul.f32 %v2798_v0, %v930_v8  ;;  %v2931_v44 = vmul.f32 %v2911_v16, %v4193_v15  ;;  %v503_v55 = vadd.f32 %v477_v38, %v409_v18 }
  0x43   : > { %v793_v63 = vsel %vm374_vm4, %v791_v58, %v792_v19  ;;  %v664_v40 = vrot.slane %v629_v22, 4  ;;  %v2935_v1 = vmul.f32 %v2879_v53, %v1152_v10  ;;  %v426_v6 = vunpack.c.l.bf16 %v418_v31  ;;  %v830_v22 = vld [vmem:[#allocation2 + $0x18] sm:$0xe]  ;;  %v923_v31 = vld [vmem:[#allocation2 + $0x1c] sm:$0x3] }
  0x44   : > { %4259 = vst [vmem:[#allocation5_spill] sm:$0xff] %v2922_v39  ;;  %v614_v8 = vunpack.c.l.bf16 %v606_v34  ;;  %v571_v12 = vsel %vm562_vm7, %v569_v47, %v570_v29  ;;  %v348_v23 = vmul.f32 %v2661_v5, %v304_v30  ;;  %v708_v20 = vunpack.c.l.bf16 %v700_v35  ;;  %v512_v34 = vld [vmem:[#allocation2 + $0x1c] sm:$0x3] }
  0x45   : > { %4260 = vst [vmem:[#allocation6_spill] sm:$0xff] %v2925_v41  ;;  %v332_v45 = vunpack.c.l.bf16 %v324_v4  ;;  %v2941_v21 = vadd.f32 %v793_v63, %v728_v57  ;;  %v2944_v18 = vsel %vm468_vm5, %v884_v2, %v885_v37  ;;  %v2949_v38 = vmul.f32 %v2911_v16, %v1152_v10  ;;  %v737_v35 = vld [vmem:[#allocation2 + $0x1c] sm:$0x1]  ;;  %v1016_v63 = vld [vmem:[#allocation2 + $0x18] sm:$0xc] }
  0x46   : > { %v597_v47 = vadd.f32 %v571_v12, %v503_v55  ;;  %v442_v2 = vmul.f32 %v2707_v17, %v426_v6  ;;  %v2956_v37 = vmul.f32 %v2724_v25, %v426_v6  ;;  %v2959_v4 = vmul.f32 %v2729_v26, %v614_v8  ;;  %v1108_v12 = vld [vmem:[#allocation2 + $0x18] sm:$0xf] }
  0x47   : > { %v349_v29 = vmul.f32 %v2661_v5, %v332_v45  ;;  %v384_v10 = vrot.slane %v348_v23, 1  ;;  %v2962_v19 = vmul.f32 %v2809_v9, %v708_v20  ;;  %v838_v55 = vunpack.c.l.bf16 %v830_v22  ;;  %v2969_v23 = vld [vmem:[#allocation2 + $0x18] sm:$0xe] }
  0x48   : > { %v316_v56 = vmul.f32 %v2742_v32, %v304_v30  ;;  %v665_v57 = vsel %vm656_vm8, %v663_v43, %v664_v40  ;;  %v520_v14 = vunpack.c.l.bf16 %v512_v34  ;;  %v745_v6 = vunpack.c.l.bf16 %v737_v35  ;;  %4261 = vst [vmem:[#allocation7_spill] sm:$0xff] %v2969_v23  ;;  %v1145_v34 = vld [vmem:[#allocation2 + $0x1c] sm:$0x1] }
  0x49   : > { %v385_v58 = vrot.slane %v349_v29, 1  ;;  %v691_v15 = vadd.f32 %v665_v57, %v597_v47  ;;  %v721_v8 = vmul.f32 %v2835_v46, %v708_v20  ;;  %v1024_v49 = vunpack.c.l.bf16 %v1016_v63 }
  0x4a   : > { %v443_v13 = vmul.f32 %v2707_v17, %v332_v45  ;;  %v478_v22 = vrot.slane %v442_v2, 2  ;;  %v572_v29 = vrot.slane %v2956_v37, 3  ;;  %v1116_v60 = vunpack.c.l.bf16 %v1108_v12  ;;  %v297_v37 = vld [vmem:[#allocation2 + $0x20] sm:$0xf] }
  0x4b   : > { %v794_v43 = vrot.slane %v2962_v19, 1  ;;  %v853_v40 = vmul.f32 %v2757_v42, %v838_v55  ;;  %v386_v47 = vsel %vm374_vm4, %v384_v10, %v385_v58  ;;  %v931_v20 = vunpack.c.l.bf16 %v923_v31  ;;  %v3001_v19 = vld [vmem:[#allocation2 + $0x1c] sm:$0x3] }
  0x4c   : > { %v2980_v35 = vmul.f32 %v2787_v59, %v838_v55  ;;  %v537_v57 = vmul.f32 %v2724_v25, %v520_v14  ;;  %v761_v2 = vmul.f32 %v2809_v9, %v745_v6  ;;  %v729_v63 = vadd.f32 %v721_v8, %v691_v15  ;;  %4268 = vst [vmem:[#allocation14_spill] sm:$0xff] %v3001_v19 }
  0x4d   : > { %v2986_v12 = vmul.f32 %v2798_v0, %v1024_v49  ;;  %v479_v30 = vrot.slane %v443_v13, 2  ;;  %v2990_v58 = vmul.f32 %v2879_v53, %v1116_v60  ;;  %v410_v31 = vadd.f32 %v386_v47, %v316_v56  ;;  %v607_v49 = vld [vmem:[#allocation2 + $0x20] sm:$0xc]  ;;  %v325_v56 = vld [vmem:[#allocation2 + $0x24] sm:$0x1] }
  0x4e   : > { %4263 = vst [vmem:[#allocation9_spill] sm:$0xff] %v2980_v35  ;;  %v854_v10 = vmul.f32 %v2757_v42, %v745_v6  ;;  %v1153_v55 = vunpack.c.l.bf16 %v1145_v34  ;;  %v887_v45 = vrot.slane %v853_v40, 2  ;;  %v631_v41 = vmul.f32 %v2729_v26, %v520_v14  ;;  %v419_v34 = vld [vmem:[#allocation2 + $0x20] sm:$0xe] }
  0x4f   : > { %4264 = vst [vmem:[#allocation10_spill] sm:$0xff] %v2986_v12  ;;  %v2995_v48 = vmul.f32 %v2787_v59, %v931_v20  ;;  %v305_v15 = vunpack.c.l.bf16 %v297_v37  ;;  %v573_v8 = vrot.slane %v537_v57, 3  ;;  %v795_v39 = vrot.slane %v761_v2, 1  ;;  %v513_v57 = vld [vmem:[#allocation2 + $0x24] sm:$0x3] }
  0x50   : > { %4265 = vst [vmem:[#allocation11_spill] sm:$0xff] %v2990_v58  ;;  %v2999_v13 = vmul.f32 %v2798_v0, %v931_v20  ;;  %v3005_v6 = vmul.f32 %v2890_v50, %v1116_v60  ;;  %v4270_v14 = vunpack.c.l.bf16 %v2969_v23  ;;  %v480_v47 = vsel %vm468_vm5, %v478_v22, %v479_v30  ;;  %v3067_v23 = vld [vmem:[%s2670_s18 + $0x14] sm:$0xf] }
  0x51   : > { %4266 = vst [vmem:[#allocation12_spill] sm:$0xff] %v2995_v48  ;;  %v504_v2 = vadd.f32 %v480_v47, %v410_v31  ;;  %v888_v20 = vrot.slane %v854_v10, 2  ;;  %v3015_v37 = vmul.f32 %v2879_v53, %v1153_v55  ;;  %v667_v12 = vrot.slane %v631_v41, 4  ;;  %v831_v47 = vld [vmem:[#allocation2 + $0x20] sm:$0xe] }
  0x52   : > { %4267 = vst [vmem:[#allocation13_spill] sm:$0xff] %v2999_v13  ;;  %v3010_v40 = vmul.f32 %v2911_v16, %v4270_v14  ;;  %v350_v14 = vmul.f32 %v2661_v5, %v305_v15  ;;  %v574_v22 = vsel %vm562_vm7, %v572_v29, %v573_v8  ;;  %v796_v30 = vsel %vm374_vm4, %v794_v43, %v795_v39  ;;  %v738_v39 = vld [vmem:[#allocation2 + $0x24] sm:$0x1] }
  0x53   : > { %4269 = vst [vmem:[#allocation15_spill] sm:$0xff] %v3005_v6  ;;  %v701_v6 = vld [vmem:[#allocation2 + $0x20] sm:$0xf]  ;;  %v427_v10 = vunpack.c.l.bf16 %v419_v34  ;;  %v3023_v24 = vadd.f32 %v796_v30, %v729_v63  ;;  %v3026_v41 = vmul.f32 %v2911_v16, %v1153_v55  ;;  %v615_v60 = vunpack.c.l.bf16 %v607_v49  ;;  %v924_v30 = vld [vmem:[#allocation2 + $0x24] sm:$0x3] }
  0x54   : > { %4271 = vst [vmem:[#allocation16_spill] sm:$0xff] %v3010_v40  ;;  %v333_v48 = vunpack.c.l.bf16 %v325_v56  ;;  %v3029_v35 = vsel %vm468_vm5, %v887_v45, %v888_v20  ;;  %v598_v29 = vadd.f32 %v574_v22, %v504_v2  ;;  %v709_v8 = vunpack.c.l.bf16 %v701_v6  ;;  %v1017_v34 = vld [vmem:[#allocation2 + $0x20] sm:$0xc] }
  0x55   : > { %4272 = vst [vmem:[#allocation17_spill] sm:$0xff] %v3015_v37  ;;  %v387_v43 = vrot.slane %v350_v14, 1  ;;  %v839_v31 = vunpack.c.l.bf16 %v831_v47  ;;  %v521_v63 = vunpack.c.l.bf16 %v513_v57  ;;  %v444_v55 = vmul.f32 %v2707_v17, %v427_v10  ;;  %v3040_v20 = vld [vmem:[#allocation2 + $0x20] sm:$0xf] }
  0x56   : > { %4273 = vst [vmem:[#allocation18_spill] sm:$0xff] %v3023_v24  ;;  %v351_v13 = vmul.f32 %v2661_v5, %v333_v48  ;;  %v3035_v49 = vmul.f32 %v2724_v25, %v427_v10  ;;  %v4276_v45 = vrot.slane %v2959_v4, 4  ;;  %v445_v6 = vmul.f32 %v2707_v17, %v333_v48 }
  0x57   : > { %4274 = vst [vmem:[#allocation19_spill] sm:$0xff] %v3026_v41  ;;  %v317_v2 = vmul.f32 %v2742_v32, %v305_v15  ;;  %v3045_v14 = vmul.f32 %v2729_v26, %v615_v60  ;;  %v746_v22 = vunpack.c.l.bf16 %v738_v39  ;;  %v722_v10 = vmul.f32 %v2835_v46, %v709_v8  ;;  %v231_v60 = vld [vmem:[%s2670_s18 + $0x10] sm:$0xf]  ;;  %v3060_v41 = vld [vmem:[#allocation2 + $0x24] sm:$0x1] }
  0x58   : > { %4275 = vst [vmem:[#allocation20_spill] sm:$0xff] %v3029_v35  ;;  %v668_v56 = vsel %vm656_vm8, %v4276_v45, %v667_v12  ;;  %v388_v57 = vrot.slane %v351_v13, 1  ;;  %v762_v4 = vmul.f32 %v2809_v9, %v709_v8  ;;  %v1025_v40 = vunpack.c.l.bf16 %v1017_v34  ;;  %v230_v12 = vld [vmem:[%s2670_s18 + $0xc] sm:$0xf] }
  0x59   : > { %v692_v47 = vadd.f32 %v668_v56, %v598_v29  ;;  %v855_v45 = vmul.f32 %v2757_v42, %v839_v31  ;;  %v1117_v35 = vunpack.c.l.bf16 %v3040_v20  ;;  %v539_v15 = vmul.f32 %v2724_v25, %v521_v63 }
  0x5a   : > { %v389_v48 = vsel %vm374_vm4, %v387_v43, %v388_v57  ;;  %v481_v13 = vrot.slane %v444_v55, 2  ;;  %v575_v39 = vrot.slane %v3035_v49, 3  ;;  %v482_v29 = vrot.slane %v445_v6, 2 }
  0x5b   : > { %v932_v56 = vunpack.c.l.bf16 %v924_v30  ;;  %v3057_v24 = vmul.f32 %v2787_v59, %v839_v31  ;;  %v411_v8 = vadd.f32 %v389_v48, %v317_v2  ;;  %v763_v34 = vmul.f32 %v2809_v9, %v746_v22  ;;  %v3072_v31 = vld [vmem:[#allocation2 + $0x20] sm:$0xe] }
  0x5c   : > { %v249_v20 = vrot.slane %v230_v12, 7  ;;  %v797_v19 = vrot.slane %v762_v4, 1  ;;  %v3063_v43 = vmul.f32 %v2798_v0, %v1025_v40  ;;  %v856_v57 = vmul.f32 %v2757_v42, %v746_v22  ;;  %4280 = vst [vmem:[#allocation24_spill] sm:$0xff] %v3072_v31  ;;  %v3076_v4 = vld [vmem:[#allocation2 + $0x20] sm:$0xc] }
  0x5d   : > { %4277 = vst [vmem:[#allocation21_spill] sm:$0xff] %v3057_v24  ;;  %v251_v55 = vrot.slane %v231_v60, 7  ;;  %v3070_v49 = vmul.f32 %v2879_v53, %v1117_v35  ;;  %v576_v6 = vrot.slane %v539_v15, 3  ;;  %v633_v2 = vmul.f32 %v2729_v26, %v521_v63 }
  0x5e   : > { %4278 = vst [vmem:[#allocation22_spill] sm:$0xff] %v3063_v43  ;;  %v250_v30 = vrot.slane %v249_v20, 4  ;;  %v483_v40 = vsel %vm468_vm5, %v481_v13, %v482_v29  ;;  %v3080_v22 = vmul.f32 %v2787_v59, %v932_v56  ;;  %v1154_v12 = vunpack.c.l.bf16 %v3060_v41 }
  0x5f   : > { %4279 = vst [vmem:[#allocation23_spill] sm:$0xff] %v3070_v49  ;;  %v252_v48 = vrot.slane %v251_v55, 4  ;;  %v505_v60 = vadd.f32 %v483_v40, %v411_v8  ;;  %v798_v58 = vrot.slane %v763_v34, 1  ;;  %v3085_v15 = vmul.f32 %v2798_v0, %v932_v56 }
  0x60   : > { %283 = vst.msk [vmem:[#allocation2 + $0x28] sm:$0xe] %vm276_vm6, %v249_v20  ;;  %v253_v63 = vrot.slane %v3067_v23, 7  ;;  %v730_v20 = vadd.f32 %v722_v10, %v692_v47  ;;  %v890_v37 = vrot.slane %v855_v45, 2  ;;  %v4208_v13 = vunpack.c.l.bf16 %v3072_v31  ;;  %v3101_v45 = vld [vmem:[#allocation2 + $0x24] sm:$0x3] }
  0x61   : > { %4281 = vst [vmem:[#allocation25_spill] sm:$0xff] %v3076_v4  ;;  %v891_v29 = vrot.slane %v856_v57, 2  ;;  %v669_v41 = vrot.slane %v3045_v14, 4  ;;  %v577_v23 = vsel %vm562_vm7, %v575_v39, %v576_v6  ;;  %v670_v47 = vrot.slane %v633_v2, 4 }
  0x62   : > { %4282 = vst [vmem:[#allocation26_spill] sm:$0xff] %v3080_v22  ;;  %v3099_v10 = vmul.f32 %v2879_v53, %v1154_v12  ;;  %v799_v14 = vsel %vm374_vm4, %v797_v19, %v798_v58  ;;  %v599_v40 = vadd.f32 %v577_v23, %v505_v60  ;;  %v3112_v39 = vmul.f32 %v2911_v16, %v4208_v13 }
  0x63   : > { %285 = vst.msk [vmem:[#allocation2 + $0x30] sm:$0xe] %vm276_vm6, %v251_v55  ;;  %v3114_v6 = vadd.f32 %v799_v14, %v730_v20  ;;  %v3117_v2 = vsel %vm468_vm5, %v890_v37, %v891_v29  ;;  %v671_v13 = vsel %vm656_vm8, %v669_v41, %v670_v47  ;;  %v3133_v41 = vrot.slane %v253_v63, 4 }
  0x64   : > { %4283 = vst [vmem:[#allocation27_spill] sm:$0xff] %v3085_v15  ;;  %v693_v55 = vadd.f32 %v671_v13, %v599_v40  ;;  %v3136_v47 = vmul.f32 %v2911_v16, %v1154_v12 }
  0x65   : > { %284 = vst.msk [vmem:[#allocation2 + $0x2c] sm:$0x1] %vm201_vm2, %v250_v30 }
  0x66   : > { %286 = vst.msk [vmem:[#allocation2 + $0x34] sm:$0x1] %vm201_vm2, %v252_v48  ;;  %v3107_v48 = vmul.f32 %v2890_v50, %v1117_v35 }
  0x67   : > { %287 = vst.msk [vmem:[#allocation2 + $0x38] sm:$0xe] %vm276_vm6, %v253_v63  ;;  %v298_v8 = vld [vmem:[#allocation2 + $0x28] sm:$0xf] }
  0x68   : > { %4284 = vst [vmem:[#allocation28_spill] sm:$0xff] %v3099_v10  ;;  %v420_v19 = vld [vmem:[#allocation2 + $0x28] sm:$0xe]  ;;  %v306_v30 = vunpack.c.l.bf16 %v298_v8 }
  0x69   : > { %4285 = vst [vmem:[#allocation29_spill] sm:$0xff] %v3101_v45  ;;  %v608_v58 = vld [vmem:[#allocation2 + $0x28] sm:$0xc]  ;;  %v428_v60 = vunpack.c.l.bf16 %v420_v19 }
  0x6a   : > { %4286 = vst [vmem:[#allocation30_spill] sm:$0xff] %v3107_v48  ;;  %v616_v23 = vunpack.c.l.bf16 %v608_v58  ;;  %v702_v35 = vld [vmem:[#allocation2 + $0x28] sm:$0xf]  ;;  %v352_v37 = vmul.f32 %v2661_v5, %v306_v30 }
  0x6b   : > { %4287 = vst [vmem:[#allocation31_spill] sm:$0xff] %v3114_v6  ;;  %v832_v57 = vld [vmem:[#allocation2 + $0x28] sm:$0xe]  ;;  %v710_v20 = vunpack.c.l.bf16 %v702_v35  ;;  %v446_v29 = vmul.f32 %v2707_v17, %v428_v60  ;;  %v3125_v43 = vmul.f32 %v2724_v25, %v428_v60 }
  0x6c   : > { %4288 = vst [vmem:[#allocation32_spill] sm:$0xff] %v3117_v2  ;;  %v1018_v34 = vld [vmem:[#allocation2 + $0x28] sm:$0xc]  ;;  %v840_v14 = vunpack.c.l.bf16 %v832_v57  ;;  %v3128_v8 = vmul.f32 %v2729_v26, %v616_v23  ;;  %v326_v40 = vld [vmem:[#allocation2 + $0x2c] sm:$0x1]  ;;  %v390_v24 = vrot.slane %v352_v37, 1 }
  0x6d   : > { %v764_v19 = vmul.f32 %v2809_v9, %v710_v20  ;;  %v1026_v58 = vunpack.c.l.bf16 %v1018_v34  ;;  %v1110_v15 = vld [vmem:[#allocation2 + $0x28] sm:$0xf]  ;;  %v723_v57 = vmul.f32 %v2835_v46, %v710_v20  ;;  %v514_v23 = vld [vmem:[#allocation2 + $0x2c] sm:$0x3]  ;;  %v318_v34 = vmul.f32 %v2742_v32, %v306_v30  ;;  %288 = vst.msk [vmem:[#allocation2 + $0x3c] sm:$0x1] %vm201_vm2, %v3133_v41 }
  0x6e   : > { %v3131_v56 = vld [vmem:[#allocation2 + $0x28] sm:$0xe]  ;;  %v857_v60 = vmul.f32 %v2757_v42, %v840_v14  ;;  %v3141_v13 = vmul.f32 %v2787_v59, %v840_v14  ;;  %v739_v35 = vld [vmem:[#allocation2 + $0x2c] sm:$0x1]  ;;  %v484_v22 = vrot.slane %v446_v29, 2  ;;  %v578_v63 = vrot.slane %v3125_v43, 3 }
  0x6f   : > { %4289 = vst [vmem:[#allocation33_spill] sm:$0xff] %v3131_v56  ;;  %v3145_v2 = vld [vmem:[#allocation2 + $0x28] sm:$0xc]  ;;  %v731_v6 = vadd.f32 %v723_v57, %v693_v55  ;;  %v800_v20 = vrot.slane %v764_v19, 1  ;;  %v1118_v48 = vunpack.c.l.bf16 %v1110_v15  ;;  %v3149_v49 = vmul.f32 %v2798_v0, %v1026_v58  ;;  %v925_v45 = vld [vmem:[#allocation2 + $0x2c] sm:$0x3] }
  0x70   : > { %4290 = vst [vmem:[#allocation34_spill] sm:$0xff] %v3141_v13  ;;  %v334_v14 = vunpack.c.l.bf16 %v326_v40  ;;  %v522_v10 = vunpack.c.l.bf16 %v514_v23  ;;  %v747_v4 = vunpack.c.l.bf16 %v739_v35  ;;  %v893_v31 = vrot.slane %v857_v60, 2  ;;  %v1147_v23 = vld [vmem:[#allocation2 + $0x2c] sm:$0x1]  ;;  %v1019_v41 = vld [vmem:[#allocation2 + $0x30] sm:$0xc] }
  0x71   : > { %4291 = vst [vmem:[#allocation35_spill] sm:$0xff] %v3145_v2  ;;  %v3155_v29 = vmul.f32 %v2879_v53, %v1118_v48  ;;  %v933_v40 = vunpack.c.l.bf16 %v925_v45  ;;  %v3165_v37 = vmul.f32 %v2890_v50, %v1118_v48  ;;  %v327_v48 = vld [vmem:[#allocation2 + $0x34] sm:$0x1] }
  0x72   : > { %4292 = vst [vmem:[#allocation36_spill] sm:$0xff] %v3149_v49  ;;  %v353_v55 = vmul.f32 %v2661_v5, %v334_v14  ;;  %v447_v15 = vmul.f32 %v2707_v17, %v334_v14  ;;  %v541_v19 = vmul.f32 %v2724_v25, %v522_v10  ;;  %v635_v58 = vmul.f32 %v2729_v26, %v522_v10  ;;  %v609_v49 = vld [vmem:[#allocation2 + $0x30] sm:$0xc] }
  0x73   : > { %4293 = vst [vmem:[#allocation37_spill] sm:$0xff] %v3155_v29  ;;  %v765_v57 = vmul.f32 %v2809_v9, %v747_v4  ;;  %v858_v60 = vmul.f32 %v2757_v42, %v747_v4  ;;  %v3168_v13 = vmul.f32 %v2787_v59, %v933_v40  ;;  %v4296_v10 = vunpack.c.l.bf16 %v3131_v56 }
  0x74   : > { %v391_v30 = vrot.slane %v353_v55, 1  ;;  %v485_v43 = vrot.slane %v447_v15, 2  ;;  %v579_v12 = vrot.slane %v541_v19, 3  ;;  %4294 = vst [vmem:[#allocation38_spill] sm:$0xff] %v3165_v37  ;;  %v3177_v45 = vmul.f32 %v2798_v0, %v933_v40  ;;  %v299_v15 = vld [vmem:[#allocation2 + $0x30] sm:$0xf] }
  0x75   : > { %v801_v5 = vrot.slane %v765_v57, 1  ;;  %v894_v14 = vrot.slane %v858_v60, 2  ;;  %4295 = vst [vmem:[#allocation39_spill] sm:$0xff] %v3168_v13  ;;  %v3173_v2 = vmul.f32 %v2911_v16, %v4296_v10  ;;  %v1155_v55 = vunpack.c.l.bf16 %v1147_v23  ;;  %v421_v19 = vld [vmem:[#allocation2 + $0x30] sm:$0xe] }
  0x76   : > { %v392_v4 = vsel %vm374_vm4, %v390_v24, %v391_v30  ;;  %4297 = vst [vmem:[#allocation40_spill] sm:$0xff] %v3177_v45  ;;  %v486_v60 = vsel %vm468_vm5, %v484_v22, %v485_v43  ;;  %v673_v35 = vrot.slane %v635_v58, 4  ;;  %v703_v37 = vld [vmem:[#allocation2 + $0x30] sm:$0xf]  ;;  %v580_v56 = vsel %vm562_vm7, %v578_v63, %v579_v12  ;;  %v3189_v40 = vld [vmem:[#allocation2 + $0x2c] sm:$0x3] }
  0x77   : > { %v412_v57 = vadd.f32 %v392_v4, %v318_v34  ;;  %v802_v10 = vsel %vm374_vm4, %v800_v20, %v801_v5  ;;  %v3184_v24 = vsel %vm468_vm5, %v893_v31, %v894_v14  ;;  %v3187_v30 = vmul.f32 %v2879_v53, %v1155_v55  ;;  %4300 = vst [vmem:[#allocation43_spill] sm:$0xff] %v3189_v40  ;;  %v833_v20 = vld [vmem:[#allocation2 + $0x30] sm:$0xe]  ;;  %v3204_v14 = vld [vmem:[%s4191_s1 + $0x1] ss:$0 sm:$0xff] }
  0x78   : > { %4298 = vst [vmem:[#allocation41_spill] sm:$0xff] %v3184_v24  ;;  %v307_v4 = vunpack.c.l.bf16 %v299_v15  ;;  %v429_v22 = vunpack.c.l.bf16 %v421_v19  ;;  %v3194_v43 = vadd.f32 %v802_v10, %v731_v6  ;;  %v617_v12 = vunpack.c.l.bf16 %v609_v49  ;;  %v3265_v45 = vld [vmem:[%s4191_s1 + $0x3] ss:$0 sm:$0xff] }
  0x79   : > { %4299 = vst [vmem:[#allocation42_spill] sm:$0xff] %v3187_v30  ;;  %v506_v23 = vadd.f32 %v486_v60, %v412_v57  ;;  %v711_v31 = vunpack.c.l.bf16 %v703_v37  ;;  %v3198_v58 = vmul.f32 %v2911_v16, %v1155_v55  ;;  %v1111_v57 = vld [vmem:[#allocation2 + $0x30] sm:$0xf]  ;;  %v4302_v10 = vrot.slane %v3128_v8, 4 }
  0x7a   : > { %4301 = vst [vmem:[#allocation44_spill] sm:$0xff] %v3194_v43  ;;  %v354_v15 = vmul.f32 %v3204_v14, %v307_v4  ;;  %v3208_v6 = vmul.f32 %v2707_v17, %v429_v22  ;;  %v3212_v37 = vmul.f32 %v2724_v25, %v429_v22  ;;  %v3215_v19 = vmul.f32 %v2729_v26, %v617_v12  ;;  %v3227_v26 = vld [vmem:[#allocation2 + $0x30] sm:$0xc]  ;;  %v515_v22 = vld [vmem:[#allocation2 + $0x34] sm:$0x3] }
  0x7b   : > { %v600_v55 = vadd.f32 %v580_v56, %v506_v23  ;;  %v319_v60 = vmul.f32 %v2742_v32, %v307_v4  ;;  %v674_v63 = vsel %vm656_vm8, %v4302_v10, %v673_v35  ;;  %v3222_v17 = vmul.f32 %v2809_v9, %v711_v31  ;;  %v3225_v23 = vld [vmem:[#allocation2 + $0x30] sm:$0xe]  ;;  %4304 = vst [vmem:[#allocation46_spill] sm:$0xff] %v3227_v26 }
  0x7c   : > { %v841_v34 = vunpack.c.l.bf16 %v833_v20  ;;  %v393_v49 = vrot.slane %v354_v15, 1  ;;  %v724_v25 = vmul.f32 %v2835_v46, %v711_v31  ;;  %v1027_v56 = vunpack.c.l.bf16 %v1019_v41  ;;  %4303 = vst [vmem:[#allocation45_spill] sm:$0xff] %v3225_v23  ;;  %v740_v15 = vld [vmem:[#allocation2 + $0x34] sm:$0x1] }
  0x7d   : > { %v694_v5 = vadd.f32 %v674_v63, %v600_v55  ;;  %v487_v32 = vrot.slane %v3208_v6, 2  ;;  %v1119_v4 = vunpack.c.l.bf16 %v1111_v57  ;;  %v581_v12 = vrot.slane %v3212_v37, 3  ;;  %v926_v41 = vld [vmem:[#allocation2 + $0x34] sm:$0x3] }
  0x7e   : > { %v3231_v8 = vmul.f32 %v2757_v42, %v841_v34  ;;  %v3234_v35 = vmul.f32 %v2787_v59, %v841_v34  ;;  %v675_v63 = vrot.slane %v3215_v19, 4  ;;  %v3239_v31 = vmul.f32 %v2798_v0, %v1027_v56  ;;  %v1148_v34 = vld [vmem:[#allocation2 + $0x34] sm:$0x1] }
  0x7f   : > { %v335_v20 = vunpack.c.l.bf16 %v327_v48  ;;  %v3241_v55 = vadd.f32 %v724_v25, %v694_v5  ;;  %v803_v6 = vrot.slane %v3222_v17, 1  ;;  %v3252_v48 = vld [vmem:[%s4191_s1 + $0x2] ss:$0 sm:$0xff]  ;;  %v3256_v25 = vmul.f32 %v2890_v50, %v1119_v4 }
  0x80   : > { %4305 = vst [vmem:[#allocation47_spill] sm:$0xff] %v3234_v35  ;;  %v896_v57 = vrot.slane %v3231_v8, 2  ;;  %v523_v17 = vunpack.c.l.bf16 %v515_v22  ;;  %v748_v56 = vunpack.c.l.bf16 %v740_v15  ;;  %v934_v10 = vunpack.c.l.bf16 %v926_v41  ;;  %v3271_v22 = vld [vmem:[%s4191_s1 + $0x4] ss:$0 sm:$0xff] }
  0x81   : > { %4306 = vst [vmem:[#allocation48_spill] sm:$0xff] %v3239_v31  ;;  %v355_v19 = vmul.f32 %v3204_v14, %v335_v20  ;;  %v449_v5 = vmul.f32 %v3252_v48, %v335_v20  ;;  %v3260_v37 = vmul.f32 %v2879_v53, %v1119_v4  ;;  %v4311_v13 = vunpack.c.l.bf16 %v3225_v23 }
  0x82   : > { %4307 = vst [vmem:[#allocation49_spill] sm:$0xff] %v3256_v25  ;;  %v543_v20 = vmul.f32 %v3265_v45, %v523_v17  ;;  %v637_v15 = vmul.f32 %v3271_v22, %v523_v17  ;;  %v767_v41 = vmul.f32 %v2809_v9, %v748_v56  ;;  %v860_v4 = vmul.f32 %v2757_v42, %v748_v56  ;;  %v300_v42 = vld [vmem:[#allocation2 + $0x38] sm:$0xf] }
  0x83   : > { %4308 = vst [vmem:[#allocation50_spill] sm:$0xff] %v3260_v37  ;;  %v394_v35 = vrot.slane %v355_v19, 1  ;;  %v488_v26 = vrot.slane %v449_v5, 2  ;;  %v3276_v19 = vld [vmem:[#allocation2 + $0x34] sm:$0x3]  ;;  %v3280_v8 = vmul.f32 %v2787_v59, %v934_v10  ;;  %v3283_v31 = vmul.f32 %v2798_v0, %v934_v10 }
  0x84   : > { %v1156_v25 = vunpack.c.l.bf16 %v1148_v34  ;;  %v3288_v24 = vmul.f32 %v2911_v16, %v4311_v13  ;;  %v582_v43 = vrot.slane %v543_v20, 3  ;;  %v804_v29 = vrot.slane %v767_v41, 1  ;;  %v422_v56 = vld [vmem:[#allocation2 + $0x38] sm:$0xe] }
  0x85   : > { %v395_v5 = vsel %vm374_vm4, %v393_v49, %v394_v35  ;;  %4309 = vst [vmem:[#allocation51_spill] sm:$0xff] %v3280_v8  ;;  %v489_v49 = vsel %vm468_vm5, %v487_v32, %v488_v26  ;;  %v676_v59 = vrot.slane %v637_v15, 4  ;;  %v610_v0 = vld [vmem:[#allocation2 + $0x38] sm:$0xc]  ;;  %v897_v40 = vrot.slane %v860_v4, 2 }
  0x86   : > { %4310 = vst [vmem:[#allocation52_spill] sm:$0xff] %v3283_v31  ;;  %v413_v17 = vadd.f32 %v395_v5, %v319_v60  ;;  %v704_v10 = vld [vmem:[#allocation2 + $0x38] sm:$0xf]  ;;  %v583_v20 = vsel %vm562_vm7, %v581_v12, %v582_v43  ;;  %v805_v41 = vsel %vm374_vm4, %v803_v6, %v804_v29  ;;  %v3298_v5 = vmul.f32 %v2879_v53, %v1156_v25 }
  0x87   : > { %v834_v60 = vld [vmem:[#allocation2 + $0x38] sm:$0xe]  ;;  %v308_v26 = vunpack.c.l.bf16 %v300_v42  ;;  %v3301_v32 = vmul.f32 %v2911_v16, %v1156_v25  ;;  %v430_v15 = vunpack.c.l.bf16 %v422_v56  ;;  %v712_v13 = vunpack.c.l.bf16 %v704_v10 }
  0x88   : > { %v507_v34 = vadd.f32 %v489_v49, %v413_v17  ;;  %v618_v17 = vunpack.c.l.bf16 %v610_v0  ;;  %v677_v49 = vsel %vm656_vm8, %v675_v63, %v676_v59  ;;  %v842_v23 = vunpack.c.l.bf16 %v834_v60  ;;  %v1020_v25 = vld [vmem:[#allocation2 + $0x38] sm:$0xc]  ;;  %v3328_v59 = vld [vmem:[%s4191_s1 + $0x7] ss:$0 sm:$0xff]  ;;  %v3343_v60 = vld [vmem:[%s4191_s1 + $0x8] ss:$0 sm:$0xff] }
  0x89   : > { %v3304_v4 = vmul.f32 %v3204_v14, %v308_v26  ;;  %v3308_v43 = vmul.f32 %v3252_v48, %v430_v15  ;;  %v3311_v29 = vmul.f32 %v3265_v45, %v430_v15  ;;  %v3317_v42 = vadd.f32 %v805_v41, %v3241_v55  ;;  %v1112_v10 = vld [vmem:[#allocation2 + $0x38] sm:$0xf]  ;;  %v516_v41 = vld [vmem:[#allocation2 + $0x3c] sm:$0x3] }
  0x8a   : > { %v601_v30 = vadd.f32 %v583_v20, %v507_v34  ;;  %v3314_v12 = vmul.f32 %v3271_v22, %v618_v17  ;;  %v3320_v56 = vsel %vm468_vm5, %v896_v57, %v897_v40  ;;  %v3323_v63 = vmul.f32 %v2809_v9, %v712_v13  ;;  %v328_v34 = vld [vmem:[#allocation2 + $0x3c] sm:$0x1]  ;;  %v2541_v40 = vld [vmem:[%s4191_s1] ss:$0 sm:$0xff] }
  0x8b   : > { %4312 = vst [vmem:[#allocation53_spill] sm:$0xff] %v3317_v42  ;;  %v3331_v0 = vmul.f32 %v3328_v59, %v842_v23  ;;  %v320_v9 = vmul.f32 %v2541_v40, %v308_v26  ;;  %v725_v57 = vmul.f32 %v2835_v46, %v712_v13  ;;  %v3346_v20 = vmul.f32 %v3343_v60, %v842_v23  ;;  %v741_v15 = vld [vmem:[#allocation2 + $0x3c] sm:$0x1]  ;;  %v3354_v23 = vld [vmem:[#allocation2 + $0x38] sm:$0xc] }
  0x8c   : > { %v695_v6 = vadd.f32 %v677_v49, %v601_v30  ;;  %4313 = vst [vmem:[#allocation54_spill] sm:$0xff] %v3320_v56  ;;  %v3333_v30 = vld [vmem:[#allocation2 + $0x38] sm:$0xe]  ;;  %v396_v17 = vrot.slane %v3304_v4, 1  ;;  %v490_v49 = vrot.slane %v3308_v43, 2  ;;  %v584_v55 = vrot.slane %v3311_v29, 3 }
  0x8d   : > { %4314 = vst [vmem:[#allocation55_spill] sm:$0xff] %v3346_v20  ;;  %v1028_v35 = vunpack.c.l.bf16 %v1020_v25  ;;  %v927_v26 = vld [vmem:[#allocation2 + $0x3c] sm:$0x3]  ;;  %v678_v46 = vrot.slane %v3314_v12, 4  ;;  %v806_v40 = vrot.slane %v3323_v63, 1  ;;  %v1120_v31 = vunpack.c.l.bf16 %v1112_v10 }
  0x8e   : > { %v733_v13 = vadd.f32 %v725_v57, %v695_v6  ;;  %v899_v8 = vrot.slane %v3331_v0, 2  ;;  %4315 = vst [vmem:[#allocation56_spill] sm:$0xff] %v3354_v23  ;;  %v336_v56 = vunpack.c.l.bf16 %v328_v34  ;;  %v524_v42 = vunpack.c.l.bf16 %v516_v41  ;;  %v3360_v43 = vld [vmem:[%s4191_s1 + $0x9] ss:$0 sm:$0xff]  ;;  %v1149_v34 = vld [vmem:[#allocation2 + $0x3c] sm:$0x1] }
  0x8f   : > { %v749_v37 = vunpack.c.l.bf16 %v741_v15  ;;  %v3363_v29 = vmul.f32 %v3360_v43, %v1028_v35  ;;  %v4237_v12 = vunpack.c.l.bf16 %v3333_v30  ;;  %v935_v6 = vunpack.c.l.bf16 %v927_v26  ;;  %v3377_v35 = vld [vmem:[%s4191_s1 + $0x6] ss:$0 sm:$0xff]  ;;  %v233_v20 = vld [vmem:[%s2670_s18 + $0x18] sm:$0xf] }
  0x90   : > { %v3367_v25 = vmul.f32 %v2879_v53, %v1120_v31  ;;  %v357_v63 = vmul.f32 %v3204_v14, %v336_v56  ;;  %v451_v0 = vmul.f32 %v3252_v48, %v336_v56  ;;  %v545_v10 = vmul.f32 %v3265_v45, %v524_v42 }
  0x91   : > { %4316 = vst [vmem:[#allocation57_spill] sm:$0xff] %v3363_v29  ;;  %v639_v57 = vmul.f32 %v3271_v22, %v524_v42  ;;  %v769_v41 = vmul.f32 %v3377_v35, %v749_v37  ;;  %v862_v15 = vmul.f32 %v3328_v59, %v749_v37  ;;  %v3382_v56 = vmul.f32 %v3343_v60, %v935_v6 }
  0x92   : > { %v397_v14 = vrot.slane %v357_v63, 1  ;;  %v491_v26 = vrot.slane %v451_v0, 2  ;;  %v585_v48 = vrot.slane %v545_v10, 3  ;;  %v3385_v45 = vmul.f32 %v2890_v50, %v1120_v31  ;;  %v234_v50 = vld [vmem:[%s2670_s18 + $0x1c] sm:$0xf] }
  0x93   : > { %4317 = vst [vmem:[#allocation58_spill] sm:$0xff] %v3382_v56  ;;  %v3390_v22 = vmul.f32 %v2911_v16, %v4237_v12  ;;  %v807_v42 = vrot.slane %v769_v41, 1  ;;  %v900_v4 = vrot.slane %v862_v15, 2  ;;  %v3397_v10 = vmul.f32 %v3360_v43, %v935_v6  ;;  %v3402_v41 = vld [vmem:[#allocation2 + $0x3c] sm:$0x3] }
  0x94   : > { %4318 = vst [vmem:[#allocation59_spill] sm:$0xff] %v3385_v45  ;;  %v398_v0 = vsel %vm374_vm4, %v396_v17, %v397_v14  ;;  %v492_v45 = vsel %vm468_vm5, %v490_v49, %v491_v26  ;;  %v586_v12 = vsel %vm562_vm7, %v584_v55, %v585_v48  ;;  %v679_v23 = vrot.slane %v639_v57, 4  ;;  %v3414_v55 = vld [vmem:[%s4191_s1 + $0xd] ss:$0 sm:$0xff]  ;;  %v1517_v57 = vld [vmem:[#allocation2 + $0x18] sm:$0xf] }
  0x95   : > { %4319 = vst [vmem:[#allocation60_spill] sm:$0xff] %v3390_v22  ;;  %v414_v31 = vadd.f32 %v398_v0, %v320_v9  ;;  %v808_v15 = vsel %vm374_vm4, %v806_v40, %v807_v42  ;;  %v1157_v29 = vunpack.c.l.bf16 %v1149_v34  ;;  %v255_v63 = vrot.slane %v233_v20, 7  ;;  %v2546_v40 = vld [vmem:[%s4191_s1 + $0xa] ss:$0 sm:$0xff] }
  0x96   : > { %4320 = vst [vmem:[#allocation61_spill] sm:$0xff] %v3397_v10  ;;  %v3407_v17 = vsel %vm468_vm5, %v899_v8, %v900_v4  ;;  %v257_v6 = vrot.slane %v234_v50, 7  ;;  %v820_v9 = vadd.f32 %v2853_v7, %v2868_v36  ;;  %v3416_v49 = vadd.f32 %v808_v15, %v733_v13  ;;  %v3424_v8 = vld [vmem:[%s4191_s1 + $0xe] ss:$0 sm:$0xff]  ;;  %v3471_v15 = vld [vmem:[%s4191_s1 + $0x10] ss:$0 sm:$0xff] }
  0x97   : > { %v508_v22 = vadd.f32 %v492_v45, %v414_v31  ;;  %289 = vst.msk [vmem:[#allocation2 + $0x40] sm:$0xe] %vm276_vm6, %v255_v63  ;;  %v256_v20 = vrot.slane %v255_v63, 4  ;;  %v3427_v7 = vmul.f32 %v2879_v53, %v1157_v29  ;;  %v680_v36 = vsel %vm656_vm8, %v678_v46, %v679_v23  ;;  %v3442_v23 = vld [vmem:[#allocation2 + $0x1c] sm:$0x1] }
  0x98   : > { %291 = vst.msk [vmem:[#allocation2 + $0x48] sm:$0xe] %vm276_vm6, %v257_v6  ;;  %v258_v13 = vrot.slane %v257_v6, 4  ;;  %v913_v4 = vadd.f32 %v2847_v62, %v820_v9  ;;  %v3433_v14 = vmul.f32 %v2911_v16, %v1157_v29  ;;  %v4321_v48 = vrot.slane %v2839_v51, 3 }
  0x99   : > { %v602_v26 = vadd.f32 %v586_v12, %v508_v22  ;;  %290 = vst.msk [vmem:[#allocation2 + $0x44] sm:$0x1] %vm201_vm2, %v256_v20  ;;  %v4322_v45 = vrot.slane %v2823_v27, 3  ;;  %v1290_v46 = vrot.slane %v2931_v44, 2  ;;  %v1291_v42 = vrot.slane %v2949_v38, 2 }
  0x9a   : > { %292 = vst.msk [vmem:[#allocation2 + $0x4c] sm:$0x1] %vm201_vm2, %v258_v13  ;;  %v4323_v16 = vunpack.c.l.bf16 %v2892_v54  ;;  %v4324_v12 = vunpack.c.l.bf16 %v2937_v3  ;;  %v3455_v27 = vld [vmem:[%s4191_s1 + $0xf] ss:$0 sm:$0xff]  ;;  %v4325_v44 = vrot.slane %v2842_v52, 4  ;;  %v4326_v22 = vrot.slane %v2828_v33, 4 }
  0x9b   : > { %v976_v53 = vsel %vm562_vm7, %v4322_v45, %v4321_v48  ;;  %v4327_v38 = vunpack.c.l.bf16 %v2898_v61  ;;  %v1525_v31 = vunpack.c.l.bf16 %v1517_v57  ;;  %v4240_v33 = vunpack.c.l.bf16 %v3442_v23  ;;  %v3480_v48 = vld [vmem:[#allocation2 + $0x18] sm:$0xe] }
  0x9c   : > { %v1006_v62 = vadd.f32 %v976_v53, %v913_v4  ;;  %v1351_v29 = vmul.f32 %v3414_v55, %v4323_v16  ;;  %v1352_v51 = vmul.f32 %v3414_v55, %v4324_v12  ;;  %v1069_v63 = vsel %vm656_vm8, %v4326_v22, %v4325_v44 }
  0x9d   : > { %v1444_v54 = vmul.f32 %v3424_v8, %v4327_v38  ;;  %v4328_v0 = vmov %v4324_v12  ;;  %v4329_v61 = vrot.slane %v2935_v1, 1  ;;  %v4330_v13 = vrot.slane %v2905_v11, 1 }
  0x9e   : > { %v1445_v50 = vmul.f32 %v3424_v8, %v4328_v0  ;;  %v1099_v6 = vadd.f32 %v1069_v63, %v1006_v62  ;;  %v1383_v52 = vrot.slane %v1351_v29, 3  ;;  %v1384_v9 = vrot.slane %v1352_v51, 3  ;;  %v705_v53 = vld [vmem:[#allocation2 + $0x40] sm:$0xf] }
  0x9f   : > { %v1199_v3 = vsel %vm374_vm4, %v4330_v13, %v4329_v61  ;;  %v1476_v4 = vrot.slane %v1444_v54, 4  ;;  %v696_v45 = vadd.f32 %v680_v36, %v602_v26  ;;  %v835_v16 = vld [vmem:[#allocation2 + $0x40] sm:$0xe]  ;;  %v3484_v12 = vsel %vm468_vm5, %v1290_v46, %v1291_v42  ;;  %v2545_v54 = vld [vmem:[%s4191_s1 + $0x5] ss:$0 sm:$0xff] }
  0xa0   : > { %v1477_v57 = vrot.slane %v1445_v50, 4  ;;  %v1021_v62 = vld [vmem:[#allocation2 + $0x40] sm:$0xc]  ;;  %v1136_v29 = vadd.f32 %v2918_v28, %v1099_v6  ;;  %v3487_v51 = vmul.f32 %v3455_v27, %v1525_v31  ;;  %v713_v1 = vunpack.c.l.bf16 %v705_v53  ;;  %v742_v6 = vld [vmem:[#allocation2 + $0x44] sm:$0x1] }
  0xa1   : > { %v843_v11 = vunpack.c.l.bf16 %v835_v16  ;;  %v1029_v44 = vunpack.c.l.bf16 %v1021_v62  ;;  %v1113_v22 = vld [vmem:[#allocation2 + $0x40] sm:$0xf]  ;;  %v3494_v36 = vmul.f32 %v3471_v15, %v1525_v31  ;;  %v3498_v46 = vsel %vm562_vm7, %v1383_v52, %v1384_v9  ;;  %v928_v61 = vld [vmem:[#allocation2 + $0x44] sm:$0x3]  ;;  %v1114_v16 = vld [vmem:[#allocation2 + $0x48] sm:$0xf] }
  0xa2   : > { %v3489_v63 = vld [vmem:[#allocation2 + $0x40] sm:$0xe]  ;;  %v1121_v26 = vunpack.c.l.bf16 %v1113_v22  ;;  %v3503_v42 = vmul.f32 %v3471_v15, %v4240_v33  ;;  %v726_v0 = vmul.f32 %v2545_v54, %v713_v1  ;;  %v770_v50 = vmul.f32 %v3377_v35, %v713_v1  ;;  %v1150_v53 = vld [vmem:[#allocation2 + $0x44] sm:$0x1]  ;;  %v3515_v62 = vld [vmem:[#allocation2 + $0x48] sm:$0xe] }
  0xa3   : > { %v3491_v38 = vld [vmem:[#allocation2 + $0x40] sm:$0xc]  ;;  %v4244_v28 = vunpack.c.l.bf16 %v3489_v63  ;;  %v863_v31 = vmul.f32 %v3328_v59, %v843_v11  ;;  %v3512_v52 = vmul.f32 %v3343_v60, %v843_v11  ;;  %4333 = vst [vmem:[#allocation64_spill] sm:$0xff] %v3515_v62  ;;  %v1229_v22 = vadd.f32 %v1199_v3, %v1136_v29  ;;  %v2547_v11 = vld [vmem:[%s4191_s1 + $0xb] ss:$0 sm:$0xff] }
  0xa4   : > { %4331 = vst [vmem:[#allocation62_spill] sm:$0xff] %v3491_v38  ;;  %v3518_v54 = vsel %vm656_vm8, %v1476_v4, %v1477_v57  ;;  %v3521_v1 = vmul.f32 %v3360_v43, %v1029_v44  ;;  %v3526_v37 = vmul.f32 %v2546_v40, %v1121_v26  ;;  %v3531_v9 = vmul.f32 %v2547_v11, %v1121_v26  ;;  %v2548_v3 = vld [vmem:[%s4191_s1 + $0xc] ss:$0 sm:$0xff]  ;;  %v3540_v13 = vld [vmem:[#allocation2 + $0x44] sm:$0x3] }
  0xa5   : > { %4332 = vst [vmem:[#allocation63_spill] sm:$0xff] %v3512_v52  ;;  %v3538_v4 = vmul.f32 %v2548_v3, %v4244_v28  ;;  %v734_v57 = vadd.f32 %v726_v0, %v696_v45  ;;  %v809_v29 = vrot.slane %v770_v50, 1  ;;  %v750_v44 = vunpack.c.l.bf16 %v742_v6  ;;  %v3557_v6 = vld [vmem:[#allocation2 + $0x48] sm:$0xc]  ;;  %v3577_v45 = vld [vmem:[%s4191_s1 + $0x12] ss:$0 sm:$0xff] }
  0xa6   : > { %4334 = vst [vmem:[#allocation65_spill] sm:$0xff] %v3521_v1  ;;  %v936_v34 = vunpack.c.l.bf16 %v928_v61  ;;  %v902_v20 = vrot.slane %v863_v31, 2  ;;  %v1158_v33 = vunpack.c.l.bf16 %v1150_v53  ;;  %v4245_v26 = vunpack.c.l.bf16 %v3515_v62  ;;  %v3566_v61 = vld [vmem:[#allocation2 + $0x4c] sm:$0x1] }
  0xa7   : > { %4335 = vst [vmem:[#allocation66_spill] sm:$0xff] %v3526_v37  ;;  %v1122_v37 = vunpack.c.l.bf16 %v1114_v16  ;;  %v771_v38 = vmul.f32 %v3377_v35, %v750_v44  ;;  %v864_v10 = vmul.f32 %v3328_v59, %v750_v44  ;;  %v3562_v59 = vld [vmem:[%s4191_s1 + $0x11] ss:$0 sm:$0xff]  ;;  %v3586_v16 = vld [vmem:[#allocation2 + $0x4c] sm:$0x3]  ;;  %v1608_v53 = vrot.slane %v3503_v42, 1 }
  0xa8   : > { %4336 = vst [vmem:[#allocation67_spill] sm:$0xff] %v3538_v4  ;;  %v3546_v56 = vmul.f32 %v3343_v60, %v936_v34  ;;  %v3549_v28 = vmul.f32 %v3360_v43, %v936_v34  ;;  %v3553_v50 = vmul.f32 %v2547_v11, %v1158_v33  ;;  %v3570_v44 = vmul.f32 %v2548_v3, %v1158_v33  ;;  %v1740_v33 = vld [vmem:[#allocation2 + $0x1c] sm:$0x3] }
  0xa9   : > { %4337 = vst [vmem:[#allocation68_spill] sm:$0xff] %v3540_v13  ;;  %v3555_v31 = vmul.f32 %v2547_v11, %v1122_v37  ;;  %v810_v35 = vrot.slane %v771_v38, 1  ;;  %v903_v43 = vrot.slane %v864_v10, 2  ;;  %v3572_v0 = vmul.f32 %v2546_v40, %v1122_v37 }
  0xaa   : > { %4338 = vst [vmem:[#allocation69_spill] sm:$0xff] %v3546_v56  ;;  %v3583_v34 = vmul.f32 %v2548_v3, %v4245_v26  ;;  %v1322_v38 = vadd.f32 %v3484_v12, %v1229_v22  ;;  %v3597_v3 = vld [vmem:[%s4191_s1 + $0x13] ss:$0 sm:$0xff]  ;;  %v1607_v10 = vrot.slane %v3494_v36, 1  ;;  %v4347_v26 = vunpack.c.l.bf16 %v3480_v48  ;;  %v1927_v36 = vld [vmem:[#allocation2 + $0x20] sm:$0xf] }
  0xab   : > { %4339 = vst [vmem:[#allocation70_spill] sm:$0xff] %v3549_v28  ;;  %v811_v37 = vsel %vm374_vm4, %v809_v29, %v810_v35  ;;  %v3590_v40 = vsel %vm468_vm5, %v902_v20, %v903_v43  ;;  %v4348_v20 = vunpack.c.l.bf16 %v3442_v23  ;;  %v1748_v43 = vunpack.c.l.bf16 %v1740_v33  ;;  %v3617_v23 = vld [vmem:[%s4191_s1 + $0x15] ss:$0 sm:$0xff]  ;;  %v2150_v12 = vld [vmem:[#allocation2 + $0x24] sm:$0x3] }
  0xac   : > { %4340 = vst [vmem:[#allocation71_spill] sm:$0xff] %v3555_v31  ;;  %v1668_v29 = vmul.f32 %v3562_v59, %v4347_v26  ;;  %v1415_v22 = vadd.f32 %v3498_v46, %v1322_v38  ;;  %v4349_v60 = vmov %v4347_v26  ;;  %v3612_v42 = vadd.f32 %v811_v37, %v734_v57 }
  0xad   : > { %4341 = vst [vmem:[#allocation72_spill] sm:$0xff] %v3557_v6  ;;  %v1669_v35 = vmul.f32 %v3562_v59, %v4348_v20  ;;  %v1761_v31 = vmul.f32 %v3577_v45, %v4349_v60  ;;  %v1964_v6 = vld [vmem:[#allocation2 + $0x24] sm:$0x1]  ;;  %v2057_v20 = vld [vmem:[#allocation2 + $0x20] sm:$0xe]  ;;  %v4351_v46 = vunpack.c.l.bf16 %v3566_v61  ;;  %v1762_v60 = vmul.f32 %v3577_v45, %v1748_v43 }
  0xae   : > { %4342 = vst [vmem:[#allocation73_spill] sm:$0xff] %v3570_v44  ;;  %v1700_v62 = vrot.slane %v1668_v29, 2  ;;  %v1508_v48 = vadd.f32 %v3518_v54, %v1415_v22  ;;  %v1855_v57 = vmul.f32 %v3597_v3, %v1748_v43  ;;  %v1609_v33 = vsel %vm374_vm4, %v1607_v10, %v1608_v53  ;;  %v3643_v53 = vld [vmem:[%s4191_s1 + $0x17] ss:$0 sm:$0xff] }
  0xaf   : > { %4343 = vst [vmem:[#allocation74_spill] sm:$0xff] %v3572_v0  ;;  %v1833_v0 = vld [vmem:[#allocation2 + $0x18] sm:$0xc]  ;;  %v1701_v1 = vrot.slane %v1669_v35, 2  ;;  %v3621_v38 = vmul.f32 %v2547_v11, %v4351_v46  ;;  %v1935_v29 = vunpack.c.l.bf16 %v1927_v36  ;;  %v3636_v11 = vld [vmem:[%s4191_s1 + $0x14] ss:$0 sm:$0xff]  ;;  %v1972_v54 = vunpack.c.l.bf16 %v1964_v6 }
  0xb0   : > { %4344 = vst [vmem:[#allocation75_spill] sm:$0xff] %v3583_v34  ;;  %v1841_v26 = vunpack.c.l.bf16 %v1833_v0  ;;  %v3629_v0 = vld [vmem:[%s4191_s1 + $0x16] ss:$0 sm:$0xff]  ;;  %v1546_v35 = vadd.f32 %v3487_v51, %v1508_v48  ;;  %v1793_v43 = vrot.slane %v1761_v31, 3  ;;  %v2065_v46 = vunpack.c.l.bf16 %v2057_v20  ;;  %v3650_v51 = vld [vmem:[%s4191_s1 + $0x18] ss:$0 sm:$0xff] }
  0xb1   : > { %4345 = vst [vmem:[#allocation76_spill] sm:$0xff] %v3586_v16  ;;  %v1702_v22 = vsel %vm468_vm5, %v1700_v62, %v1701_v1  ;;  %v1794_v10 = vrot.slane %v1762_v60, 3  ;;  %v1887_v36 = vrot.slane %v1855_v57, 4  ;;  %v1986_v16 = vmul.f32 %v3617_v23, %v1972_v54  ;;  %v2243_v20 = vld [vmem:[#allocation2 + $0x20] sm:$0xc] }
  0xb2   : > { %4346 = vst [vmem:[#allocation77_spill] sm:$0xff] %v3590_v40  ;;  %v1854_v37 = vmul.f32 %v3597_v3, %v1841_v26  ;;  %v1985_v26 = vmul.f32 %v3617_v23, %v1935_v29  ;;  %v1639_v62 = vadd.f32 %v1609_v33, %v1546_v35  ;;  %v2078_v31 = vmul.f32 %v3629_v0, %v2065_v46 }
  0xb3   : > { %4350 = vst [vmem:[#allocation78_spill] sm:$0xff] %v3612_v42  ;;  %v2079_v6 = vmul.f32 %v3629_v0, %v1972_v54  ;;  %v1948_v48 = vmul.f32 %v3636_v11, %v1935_v29  ;;  %v2018_v57 = vrot.slane %v1986_v16, 1  ;;  %v2158_v28 = vunpack.c.l.bf16 %v2150_v12 }
  0xb4   : > { %4352 = vst [vmem:[#allocation79_spill] sm:$0xff] %v3621_v38  ;;  %v1886_v1 = vrot.slane %v1854_v37, 4  ;;  %v2017_v60 = vrot.slane %v1985_v26, 1  ;;  %v1732_v34 = vadd.f32 %v1702_v22, %v1639_v62  ;;  %v2110_v52 = vrot.slane %v2078_v31, 2 }
  0xb5   : > { %v2111_v56 = vrot.slane %v2079_v6, 2  ;;  %v2171_v40 = vmul.f32 %v3643_v53, %v2065_v46  ;;  %v1795_v42 = vsel %vm562_vm7, %v1793_v43, %v1794_v10  ;;  %v2172_v33 = vmul.f32 %v3643_v53, %v2158_v28  ;;  %v4353_v46 = vld [vmem:[#allocation5_spill] sm:$0xff]  ;;  %v4355_v43 = vld [vmem:[#allocation3_spill] sm:$0xff] }
  0xb6   : > { %v2251_v37 = vunpack.c.l.bf16 %v2243_v20  ;;  %v2265_v35 = vmul.f32 %v3650_v51, %v2158_v28  ;;  %v1825_v38 = vadd.f32 %v1795_v42, %v1732_v34  ;;  %v1888_v54 = vsel %vm656_vm8, %v1886_v1, %v1887_v36  ;;  %v4359_v1 = vld [vmem:[#allocation4_spill] sm:$0xff] }
  0xb7   : > { %v2203_v44 = vrot.slane %v2171_v40, 3  ;;  %v914_v16 = vadd.f32 %v2944_v18, %v2941_v21  ;;  %v2019_v12 = vsel %vm374_vm4, %v2017_v60, %v2018_v57  ;;  %v2204_v29 = vrot.slane %v2172_v33, 3  ;;  %v4357_v21 = vld [vmem:[#allocation6_spill] sm:$0xff]  ;;  %v4361_v60 = vld [vmem:[#allocation17_spill] sm:$0xff]  ;;  %v4363_v33 = vld [vmem:[#allocation11_spill] sm:$0xff] }
  0xb8   : > { %v2264_v22 = vmul.f32 %v3650_v51, %v2251_v37  ;;  %v4354_v26 = vrot.slane %v4353_v46, 3  ;;  %v4356_v10 = vrot.slane %v4355_v43, 3  ;;  %v1918_v31 = vadd.f32 %v1888_v54, %v1825_v38  ;;  %v4369_v43 = vld [vmem:[#allocation16_spill] sm:$0xff] }
  0xb9   : > { %v2112_v28 = vsel %vm468_vm5, %v2110_v52, %v2111_v56  ;;  %v2297_v34 = vrot.slane %v2265_v35, 4  ;;  %v2205_v40 = vsel %vm562_vm7, %v2203_v44, %v2204_v29  ;;  %v4358_v18 = vrot.slane %v4357_v21, 4  ;;  %v4365_v56 = vld [vmem:[#allocation7_spill] sm:$0xff]  ;;  %v4367_v44 = vld [vmem:[#allocation14_spill] sm:$0xff] }
  0xba   : > { %v979_v62 = vsel %vm562_vm7, %v4356_v10, %v4354_v26  ;;  %v2296_v36 = vrot.slane %v2264_v22, 4  ;;  %v4360_v6 = vrot.slane %v4359_v1, 4  ;;  %v4362_v57 = vrot.slane %v4361_v60, 1  ;;  %v1518_v22 = vld [vmem:[#allocation2 + $0x20] sm:$0xf] }
  0xbb   : > { %v1007_v42 = vadd.f32 %v979_v62, %v914_v16  ;;  %v4364_v37 = vrot.slane %v4363_v33, 1  ;;  %v1956_v38 = vadd.f32 %v1948_v48, %v1918_v31  ;;  %v4366_v52 = vunpack.c.l.bf16 %v4365_v56  ;;  %v1555_v26 = vld [vmem:[#allocation2 + $0x24] sm:$0x1] }
  0xbc   : > { %v1072_v20 = vsel %vm656_vm8, %v4360_v6, %v4358_v18  ;;  %v4368_v16 = vunpack.c.l.bf16 %v4367_v44  ;;  %v1293_v10 = vrot.slane %v4369_v43, 2  ;;  %v4370_v62 = vld [vmem:[#allocation19_spill] sm:$0xff]  ;;  %v4371_v18 = vld [vmem:[#allocation8_spill] sm:$0xff]  ;;  %v1563_v43 = vunpack.c.l.bf16 %v1555_v26 }
  0xbd   : > { %v1202_v46 = vsel %vm374_vm4, %v4364_v37, %v4362_v57  ;;  %v1100_v54 = vadd.f32 %v1072_v20, %v1007_v42  ;;  %v1353_v35 = vmul.f32 %v3414_v55, %v4366_v52  ;;  %v1294_v21 = vrot.slane %v4370_v62, 2  ;;  %v1648_v42 = vld [vmem:[#allocation2 + $0x20] sm:$0xe] }
  0xbe   : > { %v1354_v29 = vmul.f32 %v3414_v55, %v4368_v16  ;;  %v4372_v1 = vunpack.c.l.bf16 %v4371_v18  ;;  %v4373_v48 = vmov %v4368_v16  ;;  %v2049_v20 = vadd.f32 %v2019_v12, %v1956_v38  ;;  %v4374_v60 = vld [vmem:[#allocation15_spill] sm:$0xff] }
  0xbf   : > { %v1447_v31 = vmul.f32 %v3424_v8, %v4373_v48  ;;  %v1137_v57 = vadd.f32 %v4374_v60, %v1100_v54  ;;  %v1386_v33 = vrot.slane %v1353_v35, 3  ;;  %v1526_v16 = vunpack.c.l.bf16 %v1518_v22  ;;  %v1834_v22 = vld [vmem:[#allocation2 + $0x20] sm:$0xc] }
  0xc0   : > { %v1446_v6 = vmul.f32 %v3424_v8, %v4372_v1  ;;  %v1387_v37 = vrot.slane %v1354_v29, 3  ;;  %v2142_v4 = vadd.f32 %v2112_v28, %v2049_v20  ;;  %v2298_v62 = vsel %vm656_vm8, %v2296_v36, %v2297_v34  ;;  %v1741_v1 = vld [vmem:[#allocation2 + $0x24] sm:$0x3]  ;;  %v1965_v20 = vld [vmem:[#allocation2 + $0x2c] sm:$0x1] }
  0xc1   : > { %v1480_v52 = vrot.slane %v1447_v31, 4  ;;  %v1230_v18 = vadd.f32 %v1202_v46, %v1137_v57  ;;  %v1656_v13 = vunpack.c.l.bf16 %v1648_v42  ;;  %v1295_v44 = vsel %vm468_vm5, %v1293_v10, %v1294_v21  ;;  %v1928_v42 = vld [vmem:[#allocation2 + $0x28] sm:$0xf] }
  0xc2   : > { %v1479_v56 = vrot.slane %v1446_v6, 4  ;;  %v1388_v48 = vsel %vm562_vm7, %v1386_v33, %v1387_v37  ;;  %v1577_v12 = vmul.f32 %v3471_v15, %v1526_v16  ;;  %v1578_v38 = vmul.f32 %v3471_v15, %v1563_v43  ;;  %v2058_v33 = vld [vmem:[#allocation2 + $0x28] sm:$0xe] }
  0xc3   : > { %v2235_v54 = vadd.f32 %v2205_v40, %v2142_v4  ;;  %v1323_v35 = vadd.f32 %v1295_v44, %v1230_v18  ;;  %v1670_v29 = vmul.f32 %v3562_v59, %v1656_v13  ;;  %v1671_v28 = vmul.f32 %v3562_v59, %v1563_v43 }
  0xc4   : > { %v1481_v34 = vsel %vm656_vm8, %v1479_v56, %v1480_v52  ;;  %v1539_v36 = vmul.f32 %v3455_v27, %v1526_v16  ;;  %v1749_v46 = vunpack.c.l.bf16 %v1741_v1  ;;  %v1763_v26 = vmul.f32 %v3577_v45, %v1656_v13  ;;  %v2151_v13 = vld [vmem:[#allocation2 + $0x2c] sm:$0x3] }
  0xc5   : > { %v2328_v10 = vadd.f32 %v2298_v62, %v2235_v54  ;;  %v1416_v21 = vadd.f32 %v1388_v48, %v1323_v35  ;;  %v1610_v6 = vrot.slane %v1577_v12, 1  ;;  %v1611_v31 = vrot.slane %v1578_v38, 1 }
  0xc6   : > { %v1703_v4 = vrot.slane %v1670_v29, 2  ;;  %v1704_v40 = vrot.slane %v1671_v28, 2  ;;  %v1764_v60 = vmul.f32 %v3577_v45, %v1749_v46  ;;  %v1842_v57 = vunpack.c.l.bf16 %v1834_v22 }
  0xc7   : > { %v2336_v37 = vpack.c.bf16 %v2328_v10, %v2328_v10  ;;  %v1509_v56 = vadd.f32 %v1481_v34, %v1416_v21  ;;  %v1796_v52 = vrot.slane %v1763_v26, 3  ;;  %v1857_v16 = vmul.f32 %v3597_v3, %v1749_v46  ;;  %v2244_v10 = vld [vmem:[#allocation2 + $0x28] sm:$0xc] }
  0xc8   : > { %v1797_v43 = vrot.slane %v1764_v60, 3  ;;  %v1856_v62 = vmul.f32 %v3597_v3, %v1842_v57  ;;  %v1936_v18 = vunpack.c.l.bf16 %v1928_v42  ;;  %v1973_v1 = vunpack.c.l.bf16 %v1965_v20 }
  0xc9   : > { %2344 = vst.msk [vmem:[%s3711_s27] sm:$0xf] %vm190_vm0, %v2336_v37  ;;  %v1547_v44 = vadd.f32 %v1539_v36, %v1509_v56  ;;  %v1612_v48 = vsel %vm374_vm4, %v1610_v6, %v1611_v31  ;;  %v2066_v12 = vunpack.c.l.bf16 %v2058_v33  ;;  %v2159_v38 = vunpack.c.l.bf16 %v2151_v13 }
  0xca   : > { %v1705_v54 = vsel %vm468_vm5, %v1703_v4, %v1704_v40  ;;  %v1889_v35 = vrot.slane %v1856_v62, 4  ;;  %v1890_v29 = vrot.slane %v1857_v16, 4  ;;  %v1987_v28 = vmul.f32 %v3617_v23, %v1936_v18 }
  0xcb   : > { %v1640_v22 = vadd.f32 %v1612_v48, %v1547_v44  ;;  %v1988_v34 = vmul.f32 %v3617_v23, %v1973_v1  ;;  %v2080_v46 = vmul.f32 %v3629_v0, %v2066_v12  ;;  %v2081_v26 = vmul.f32 %v3629_v0, %v1973_v1 }
  0xcc   : > { %v1798_v36 = vsel %vm562_vm7, %v1796_v52, %v1797_v43  ;;  %v2020_v21 = vrot.slane %v1987_v28, 1  ;;  %v2173_v6 = vmul.f32 %v3643_v53, %v2066_v12  ;;  %v2174_v31 = vmul.f32 %v3643_v53, %v2159_v38  ;;  %v4375_v52 = vld [vmem:[#allocation18_spill] sm:$0xff]  ;;  %v4376_v43 = vld [vmem:[#allocation20_spill] sm:$0xff] }
  0xcd   : > { %v1733_v42 = vadd.f32 %v1705_v54, %v1640_v22  ;;  %v2021_v20 = vrot.slane %v1988_v34, 1  ;;  %v2113_v4 = vrot.slane %v2080_v46, 2  ;;  %v2114_v40 = vrot.slane %v2081_v26, 2  ;;  %v4377_v12 = vld [vmem:[#allocation12_spill] sm:$0xff]  ;;  %v4381_v34 = vld [vmem:[#allocation13_spill] sm:$0xff]  ;;  %v4383_v26 = vld [vmem:[#allocation10_spill] sm:$0xff] }
  0xce   : > { %v1891_v60 = vsel %vm656_vm8, %v1889_v35, %v1890_v29  ;;  %v1949_v57 = vmul.f32 %v3636_v11, %v1936_v18  ;;  %v2252_v33 = vunpack.c.l.bf16 %v2244_v10  ;;  %v2267_v13 = vmul.f32 %v3650_v51, %v2159_v38  ;;  %v4379_v35 = vld [vmem:[#allocation9_spill] sm:$0xff] }
  0xcf   : > { %v1826_v37 = vadd.f32 %v1798_v36, %v1733_v42  ;;  %v2206_v56 = vrot.slane %v2173_v6, 3  ;;  %v2207_v16 = vrot.slane %v2174_v31, 3  ;;  %v915_v62 = vadd.f32 %v4376_v43, %v4375_v52  ;;  %v4385_v42 = vld [vmem:[#allocation24_spill] sm:$0xff]  ;;  %v4389_v52 = vld [vmem:[#allocation25_spill] sm:$0xff] }
  0xd0   : > { %v2022_v1 = vsel %vm374_vm4, %v2020_v21, %v2021_v20  ;;  %v2115_v44 = vsel %vm468_vm5, %v2113_v4, %v2114_v40  ;;  %v2266_v48 = vmul.f32 %v3650_v51, %v2252_v33  ;;  %v4378_v54 = vrot.slane %v4377_v12, 3  ;;  %v1519_v12 = vld [vmem:[#allocation2 + $0x28] sm:$0xf] }
  0xd1   : > { %v4380_v29 = vrot.slane %v4379_v35, 3  ;;  %v1919_v28 = vadd.f32 %v1891_v60, %v1826_v37  ;;  %v2300_v38 = vrot.slane %v2267_v13, 4  ;;  %v4382_v46 = vrot.slane %v4381_v34, 4  ;;  %v4387_v60 = vld [vmem:[#allocation29_spill] sm:$0xff] }
  0xd2   : > { %v4384_v10 = vrot.slane %v4383_v26, 4  ;;  %v2299_v21 = vrot.slane %v2266_v48, 4  ;;  %v1296_v6 = vrot.slane %v3112_v39, 2  ;;  %v1297_v31 = vrot.slane %v3136_v47, 2  ;;  %v1556_v48 = vld [vmem:[#allocation2 + $0x2c] sm:$0x1] }
  0xd3   : > { %v982_v18 = vsel %vm562_vm7, %v4380_v29, %v4378_v54  ;;  %v4386_v20 = vunpack.c.l.bf16 %v4385_v42  ;;  %v1957_v40 = vadd.f32 %v1949_v57, %v1919_v28  ;;  %v4388_v13 = vunpack.c.l.bf16 %v4387_v60  ;;  %v1649_v54 = vld [vmem:[#allocation2 + $0x28] sm:$0xe]  ;;  %v4393_v29 = vld [vmem:[#allocation23_spill] sm:$0xff] }
  0xd4   : > { %v1008_v22 = vadd.f32 %v982_v18, %v915_v62  ;;  %v1075_v36 = vsel %vm656_vm8, %v4384_v10, %v4382_v46  ;;  %v4390_v43 = vunpack.c.l.bf16 %v4389_v52  ;;  %v2208_v39 = vsel %vm562_vm7, %v2206_v56, %v2207_v16  ;;  %v4391_v47 = vld [vmem:[#allocation28_spill] sm:$0xff] }
  0xd5   : > { %v1355_v4 = vmul.f32 %v3414_v55, %v4386_v20  ;;  %v1356_v37 = vmul.f32 %v3414_v55, %v4388_v13  ;;  %v4392_v35 = vrot.slane %v4391_v47, 1  ;;  %v4394_v18 = vrot.slane %v4393_v29, 1  ;;  %v1742_v46 = vld [vmem:[#allocation2 + $0x2c] sm:$0x3] }
  0xd6   : > { %v1101_v33 = vadd.f32 %v1075_v36, %v1008_v22  ;;  %v1448_v62 = vmul.f32 %v3424_v8, %v4390_v43  ;;  %v4395_v22 = vmov %v4388_v13  ;;  %v2050_v26 = vadd.f32 %v2022_v1, %v1957_v40  ;;  %v4396_v36 = vld [vmem:[#allocation30_spill] sm:$0xff] }
  0xd7   : > { %v1205_v57 = vsel %vm374_vm4, %v4394_v18, %v4392_v35  ;;  %v1389_v28 = vrot.slane %v1355_v4, 3  ;;  %v1449_v34 = vmul.f32 %v3424_v8, %v4395_v22  ;;  %v2301_v10 = vsel %vm656_vm8, %v2299_v21, %v2300_v38  ;;  %v1966_v22 = vld [vmem:[#allocation2 + $0x34] sm:$0x1] }
  0xd8   : > { %v1138_v42 = vadd.f32 %v4396_v36, %v1101_v33  ;;  %v1390_v20 = vrot.slane %v1356_v37, 3  ;;  %v1298_v56 = vsel %vm468_vm5, %v1296_v6, %v1297_v31  ;;  %v1527_v16 = vunpack.c.l.bf16 %v1519_v12  ;;  %v1835_v31 = vld [vmem:[#allocation2 + $0x28] sm:$0xc]  ;;  %v2059_v36 = vld [vmem:[#allocation2 + $0x30] sm:$0xe] }
  0xd9   : > { %v1564_v13 = vunpack.c.l.bf16 %v1556_v48  ;;  %v1657_v52 = vunpack.c.l.bf16 %v1649_v54  ;;  %v2143_v43 = vadd.f32 %v2115_v44, %v2050_v26  ;;  %v1482_v35 = vrot.slane %v1448_v62, 4 }
  0xda   : > { %v1231_v47 = vadd.f32 %v1205_v57, %v1138_v42  ;;  %v1750_v4 = vunpack.c.l.bf16 %v1742_v46  ;;  %v1391_v60 = vsel %vm562_vm7, %v1389_v28, %v1390_v20  ;;  %v1483_v29 = vrot.slane %v1449_v34, 4  ;;  %v1929_v28 = vld [vmem:[#allocation2 + $0x30] sm:$0xf]  ;;  %v2152_v42 = vld [vmem:[#allocation2 + $0x34] sm:$0x3] }
  0xdb   : > { %v1579_v18 = vmul.f32 %v3471_v15, %v1527_v16  ;;  %v1580_v1 = vmul.f32 %v3471_v15, %v1564_v13  ;;  %v2236_v38 = vadd.f32 %v2208_v39, %v2143_v43  ;;  %v1672_v40 = vmul.f32 %v3562_v59, %v1657_v52 }
  0xdc   : > { %v1324_v21 = vadd.f32 %v1298_v56, %v1231_v47  ;;  %v1673_v6 = vmul.f32 %v3562_v59, %v1564_v13  ;;  %v1765_v44 = vmul.f32 %v3577_v45, %v1657_v52  ;;  %v1766_v62 = vmul.f32 %v3577_v45, %v1750_v4 }
  0xdd   : > { %v1613_v33 = vrot.slane %v1579_v18, 1  ;;  %v1614_v37 = vrot.slane %v1580_v1, 1  ;;  %v2329_v12 = vadd.f32 %v2301_v10, %v2236_v38  ;;  %v1706_v54 = vrot.slane %v1672_v40, 2 }
  0xde   : > { %v1417_v48 = vadd.f32 %v1391_v60, %v1324_v21  ;;  %v1707_v57 = vrot.slane %v1673_v6, 2  ;;  %v1484_v39 = vsel %vm656_vm8, %v1482_v35, %v1483_v29  ;;  %v1540_v34 = vmul.f32 %v3455_v27, %v1527_v16 }
  0xdf   : > { %v1615_v46 = vsel %vm374_vm4, %v1613_v33, %v1614_v37  ;;  %v1843_v26 = vunpack.c.l.bf16 %v1835_v31  ;;  %v2337_v20 = vpack.c.bf16 %v2329_v12, %v2329_v12  ;;  %v1799_v13 = vrot.slane %v1765_v44, 3  ;;  %v2245_v37 = vld [vmem:[#allocation2 + $0x30] sm:$0xc] }
  0xe0   : > { %v1510_v56 = vadd.f32 %v1484_v39, %v1417_v48  ;;  %v1859_v10 = vmul.f32 %v3597_v3, %v1750_v4  ;;  %v1800_v52 = vrot.slane %v1766_v62, 3  ;;  %v1937_v47 = vunpack.c.l.bf16 %v1929_v28 }
  0xe1   : > { %v1858_v43 = vmul.f32 %v3597_v3, %v1843_v26  ;;  %v1974_v60 = vunpack.c.l.bf16 %v1966_v22  ;;  %2345 = vst.msk [vmem:[%s3711_s27 + $0x4] sm:$0xf] %vm190_vm0, %v2337_v20  ;;  %v1708_v16 = vsel %vm468_vm5, %v1706_v54, %v1707_v57  ;;  %v2067_v29 = vunpack.c.l.bf16 %v2059_v36 }
  0xe2   : > { %v1548_v35 = vadd.f32 %v1540_v34, %v1510_v56  ;;  %v2160_v18 = vunpack.c.l.bf16 %v2152_v42  ;;  %v1893_v38 = vrot.slane %v1859_v10, 4  ;;  %v1989_v21 = vmul.f32 %v3617_v23, %v1937_v47  ;;  %v4397_v56 = vld [vmem:[#allocation31_spill] sm:$0xff] }
  0xe3   : > { %v1892_v1 = vrot.slane %v1858_v43, 4  ;;  %v1990_v40 = vmul.f32 %v3617_v23, %v1974_v60  ;;  %v2082_v4 = vmul.f32 %v3629_v0, %v2067_v29  ;;  %v2083_v31 = vmul.f32 %v3629_v0, %v1974_v60  ;;  %v4399_v60 = vld [vmem:[#allocation26_spill] sm:$0xff] }
  0xe4   : > { %v1641_v6 = vadd.f32 %v1615_v46, %v1548_v35  ;;  %v2175_v33 = vmul.f32 %v3643_v53, %v2067_v29  ;;  %v1801_v44 = vsel %vm562_vm7, %v1799_v13, %v1800_v52  ;;  %v2023_v62 = vrot.slane %v1989_v21, 1  ;;  %v4398_v13 = vld [vmem:[#allocation32_spill] sm:$0xff]  ;;  %v4403_v21 = vld [vmem:[#allocation27_spill] sm:$0xff] }
  0xe5   : > { %v2024_v12 = vrot.slane %v1990_v40, 1  ;;  %v2176_v48 = vmul.f32 %v3643_v53, %v2160_v18  ;;  %v1950_v57 = vmul.f32 %v3636_v11, %v1937_v47  ;;  %v2116_v28 = vrot.slane %v2082_v4, 2 }
  0xe6   : > { %v1734_v54 = vadd.f32 %v1708_v16, %v1641_v6  ;;  %v2117_v22 = vrot.slane %v2083_v31, 2  ;;  %v1894_v39 = vsel %vm656_vm8, %v1892_v1, %v1893_v38  ;;  %v2209_v34 = vrot.slane %v2175_v33, 3  ;;  %v4401_v16 = vld [vmem:[#allocation21_spill] sm:$0xff]  ;;  %v4405_v6 = vld [vmem:[#allocation22_spill] sm:$0xff] }
  0xe7   : > { %v2253_v46 = vunpack.c.l.bf16 %v2245_v37  ;;  %v2269_v26 = vmul.f32 %v3650_v51, %v2160_v18  ;;  %v2025_v42 = vsel %vm374_vm4, %v2023_v62, %v2024_v12  ;;  %v2210_v20 = vrot.slane %v2176_v48, 3  ;;  %v4407_v62 = vld [vmem:[#allocation33_spill] sm:$0xff] }
  0xe8   : > { %v1827_v36 = vadd.f32 %v1801_v44, %v1734_v54  ;;  %v916_v10 = vadd.f32 %v4398_v13, %v4397_v56  ;;  %v2118_v52 = vsel %vm468_vm5, %v2116_v28, %v2117_v22  ;;  %v4400_v35 = vrot.slane %v4399_v60, 3  ;;  %v4409_v54 = vld [vmem:[#allocation43_spill] sm:$0xff] }
  0xe9   : > { %v2268_v43 = vmul.f32 %v3650_v51, %v2253_v46  ;;  %v2303_v47 = vrot.slane %v2269_v26, 4  ;;  %v4402_v29 = vrot.slane %v4401_v16, 3  ;;  %v4404_v40 = vrot.slane %v4403_v21, 4  ;;  %v4411_v26 = vld [vmem:[#allocation35_spill] sm:$0xff]  ;;  %v1743_v21 = vld [vmem:[#allocation2 + $0x34] sm:$0x3] }
  0xea   : > { %v1920_v38 = vadd.f32 %v1894_v39, %v1827_v36  ;;  %v4406_v4 = vrot.slane %v4405_v6, 4  ;;  %v1299_v33 = vrot.slane %v3173_v2, 2  ;;  %v1300_v44 = vrot.slane %v3198_v58, 2  ;;  %v1557_v58 = vld [vmem:[#allocation2 + $0x34] sm:$0x1] }
  0xeb   : > { %v985_v1 = vsel %vm562_vm7, %v4402_v29, %v4400_v35  ;;  %v2302_v37 = vrot.slane %v2268_v43, 4  ;;  %v4408_v12 = vunpack.c.l.bf16 %v4407_v62  ;;  %v4410_v28 = vunpack.c.l.bf16 %v4409_v54  ;;  %v1650_v43 = vld [vmem:[#allocation2 + $0x30] sm:$0xe]  ;;  %v4414_v35 = vld [vmem:[#allocation42_spill] sm:$0xff] }
  0xec   : > { %v1009_v18 = vadd.f32 %v985_v1, %v916_v10  ;;  %v1078_v31 = vsel %vm656_vm8, %v4406_v4, %v4404_v40  ;;  %v1958_v39 = vadd.f32 %v1950_v57, %v1920_v38  ;;  %v4412_v36 = vunpack.c.l.bf16 %v4411_v26  ;;  %v1520_v10 = vld [vmem:[#allocation2 + $0x30] sm:$0xf]  ;;  %v4418_v4 = vld [vmem:[#allocation38_spill] sm:$0xff] }
  0xed   : > { %v1357_v48 = vmul.f32 %v3414_v55, %v4408_v12  ;;  %v1358_v22 = vmul.f32 %v3414_v55, %v4410_v28  ;;  %v4413_v13 = vmov %v4410_v28  ;;  %v2211_v60 = vsel %vm562_vm7, %v2209_v34, %v2210_v20  ;;  %v4416_v29 = vld [vmem:[#allocation37_spill] sm:$0xff] }
  0xee   : > { %v1102_v46 = vadd.f32 %v1078_v31, %v1009_v18  ;;  %v1450_v56 = vmul.f32 %v3424_v8, %v4412_v36  ;;  %v1451_v2 = vmul.f32 %v3424_v8, %v4413_v13  ;;  %v4415_v16 = vrot.slane %v4414_v35, 1 }
  0xef   : > { %v4417_v1 = vrot.slane %v4416_v29, 1  ;;  %v1392_v38 = vrot.slane %v1357_v48, 3  ;;  %v1393_v18 = vrot.slane %v1358_v22, 3  ;;  %v2051_v40 = vadd.f32 %v2025_v42, %v1958_v39  ;;  %v1836_v39 = vld [vmem:[#allocation2 + $0x30] sm:$0xc] }
  0xf0   : > { %v2304_v6 = vsel %vm656_vm8, %v2302_v37, %v2303_v47  ;;  %v1139_v31 = vadd.f32 %v4418_v4, %v1102_v46  ;;  %v1301_v62 = vsel %vm468_vm5, %v1299_v33, %v1300_v44  ;;  %v1485_v12 = vrot.slane %v1450_v56, 4 }
  0xf1   : > { %v1208_v57 = vsel %vm374_vm4, %v4417_v1, %v4415_v16  ;;  %v1528_v54 = vunpack.c.l.bf16 %v1520_v10  ;;  %v1565_v28 = vunpack.c.l.bf16 %v1557_v58  ;;  %v1658_v34 = vunpack.c.l.bf16 %v1650_v43  ;;  %v1930_v10 = vld [vmem:[#allocation2 + $0x38] sm:$0xf]  ;;  %v1967_v1 = vld [vmem:[#allocation2 + $0x3c] sm:$0x1] }
  0xf2   : > { %v2144_v20 = vadd.f32 %v2118_v52, %v2051_v40  ;;  %v1232_v26 = vadd.f32 %v1208_v57, %v1139_v31  ;;  %v1486_v36 = vrot.slane %v1451_v2, 4  ;;  %v1751_v13 = vunpack.c.l.bf16 %v1743_v21  ;;  %v2060_v21 = vld [vmem:[#allocation2 + $0x38] sm:$0xe] }
  0xf3   : > { %v1394_v35 = vsel %vm562_vm7, %v1392_v38, %v1393_v18  ;;  %v1581_v48 = vmul.f32 %v3471_v15, %v1528_v54  ;;  %v1582_v42 = vmul.f32 %v3471_v15, %v1565_v28  ;;  %v1674_v47 = vmul.f32 %v3562_v59, %v1658_v34 }
  0xf4   : > { %v2237_v37 = vadd.f32 %v2211_v60, %v2144_v20  ;;  %v1325_v22 = vadd.f32 %v1301_v62, %v1232_v26  ;;  %v1675_v33 = vmul.f32 %v3562_v59, %v1565_v28  ;;  %v1767_v44 = vmul.f32 %v3577_v45, %v1658_v34  ;;  %v2153_v28 = vld [vmem:[#allocation2 + $0x3c] sm:$0x3] }
  0xf5   : > { %v1616_v46 = vrot.slane %v1581_v48, 1  ;;  %v1617_v52 = vrot.slane %v1582_v42, 1  ;;  %v1709_v56 = vrot.slane %v1674_v47, 2  ;;  %v1768_v2 = vmul.f32 %v3577_v45, %v1751_v13 }
  0xf6   : > { %v2330_v58 = vadd.f32 %v2304_v6, %v2237_v37  ;;  %v1418_v43 = vadd.f32 %v1394_v35, %v1325_v22  ;;  %v1710_v16 = vrot.slane %v1675_v33, 2  ;;  %v1802_v29 = vrot.slane %v1767_v44, 3  ;;  %v2246_v37 = vld [vmem:[#allocation2 + $0x38] sm:$0xc] }
  0xf7   : > { %v1487_v60 = vsel %vm656_vm8, %v1485_v12, %v1486_v36  ;;  %v1803_v57 = vrot.slane %v1768_v2, 3  ;;  %v1844_v38 = vunpack.c.l.bf16 %v1836_v39  ;;  %v1861_v18 = vmul.f32 %v3597_v3, %v1751_v13 }
  0xf8   : > { %v2338_v40 = vpack.c.bf16 %v2330_v58, %v2330_v58  ;;  %v1511_v4 = vadd.f32 %v1487_v60, %v1418_v43  ;;  %v1541_v31 = vmul.f32 %v3455_v27, %v1528_v54  ;;  %v1938_v62 = vunpack.c.l.bf16 %v1930_v10 }
  0xf9   : > { %v1618_v6 = vsel %vm374_vm4, %v1616_v46, %v1617_v52  ;;  %v1711_v34 = vsel %vm468_vm5, %v1709_v56, %v1710_v16  ;;  %v1860_v20 = vmul.f32 %v3597_v3, %v1844_v38  ;;  %v1975_v26 = vunpack.c.l.bf16 %v1967_v1  ;;  %v4420_v38 = vld [vmem:[#allocation41_spill] sm:$0xff] }
  0xfa   : > { %2346 = vst.msk [vmem:[%s3711_s27 + $0x8] sm:$0xf] %vm190_vm0, %v2338_v40  ;;  %v1549_v12 = vadd.f32 %v1541_v31, %v1511_v4  ;;  %v1804_v36 = vsel %vm562_vm7, %v1802_v29, %v1803_v57  ;;  %v1991_v13 = vmul.f32 %v3617_v23, %v1938_v62  ;;  %v2068_v35 = vunpack.c.l.bf16 %v2060_v21  ;;  %v4419_v57 = vld [vmem:[#allocation44_spill] sm:$0xff]  ;;  %v4421_v31 = vld [vmem:[#allocation39_spill] sm:$0xff] }
  0xfb   : > { %v1896_v48 = vrot.slane %v1861_v18, 4  ;;  %v1992_v54 = vmul.f32 %v3617_v23, %v1975_v26  ;;  %v2085_v42 = vmul.f32 %v3629_v0, %v1975_v26  ;;  %v2161_v47 = vunpack.c.l.bf16 %v2153_v28 }
  0xfc   : > { %v1642_v22 = vadd.f32 %v1618_v6, %v1549_v12  ;;  %v1895_v33 = vrot.slane %v1860_v20, 4  ;;  %v2084_v44 = vmul.f32 %v3629_v0, %v2068_v35  ;;  %v2177_v39 = vmul.f32 %v3643_v53, %v2068_v35  ;;  %v4423_v6 = vld [vmem:[#allocation34_spill] sm:$0xff] }
  0xfd   : > { %v2026_v46 = vrot.slane %v1991_v13, 1  ;;  %v2027_v52 = vrot.slane %v1992_v54, 1  ;;  %v2120_v56 = vrot.slane %v2085_v42, 2  ;;  %v2178_v2 = vmul.f32 %v3643_v53, %v2161_v47  ;;  %v4425_v42 = vld [vmem:[#allocation40_spill] sm:$0xff] }
  0xfe   : > { %v1735_v10 = vadd.f32 %v1711_v34, %v1642_v22  ;;  %v2119_v58 = vrot.slane %v2084_v44, 2  ;;  %v2212_v43 = vrot.slane %v2177_v39, 3  ;;  %v2254_v16 = vunpack.c.l.bf16 %v2246_v37  ;;  %v4429_v39 = vld [vmem:[#allocation45_spill] sm:$0xff] }
  0xff   : > { %v1951_v29 = vmul.f32 %v3636_v11, %v1938_v62  ;;  %v2213_v1 = vrot.slane %v2178_v2, 3  ;;  %v2271_v60 = vmul.f32 %v3650_v51, %v2161_v47  ;;  %v917_v18 = vadd.f32 %v4420_v38, %v4419_v57  ;;  %v4427_v47 = vld [vmem:[#allocation36_spill] sm:$0xff]  ;;  %v1558_v38 = vld [vmem:[#allocation2 + $0x3c] sm:$0x1] }
 0x100   : > { %v1828_v21 = vadd.f32 %v1804_v36, %v1735_v10  ;;  %v1897_v40 = vsel %vm656_vm8, %v1895_v33, %v1896_v48  ;;  %v2270_v4 = vmul.f32 %v3650_v51, %v2254_v16  ;;  %v4422_v28 = vrot.slane %v4421_v31, 3  ;;  %v1521_v10 = vld [vmem:[#allocation2 + $0x38] sm:$0xf] }
 0x101   : > { %v4424_v34 = vrot.slane %v4423_v6, 3  ;;  %v2028_v26 = vsel %vm374_vm4, %v2026_v46, %v2027_v52  ;;  %v2121_v62 = vsel %vm468_vm5, %v2119_v58, %v2120_v56  ;;  %v2214_v12 = vsel %vm562_vm7, %v2212_v43, %v2213_v1  ;;  %v4432_v16 = vld [vmem:[#allocation46_spill] sm:$0xff] }
 0x102   : > { %v1921_v35 = vadd.f32 %v1897_v40, %v1828_v21  ;;  %v2305_v54 = vrot.slane %v2270_v4, 4  ;;  %v2306_v36 = vrot.slane %v2271_v60, 4  ;;  %v4426_v48 = vrot.slane %v4425_v42, 4  ;;  %v4435_v21 = vld [vmem:[#allocation49_spill] sm:$0xff]  ;;  %v4437_v31 = vld [vmem:[#allocation50_spill] sm:$0xff] }
 0x103   : > { %v988_v20 = vsel %vm562_vm7, %v4424_v34, %v4422_v28  ;;  %v4428_v37 = vrot.slane %v4427_v47, 4  ;;  %v1302_v44 = vrot.slane %v3288_v24, 2  ;;  %v4430_v2 = vunpack.c.l.bf16 %v4429_v39 }
 0x104   : > { %v1010_v13 = vadd.f32 %v988_v20, %v917_v18  ;;  %v4431_v52 = vunpack.c.l.bf16 %v3276_v19  ;;  %v1959_v58 = vadd.f32 %v1951_v29, %v1921_v35  ;;  %v1303_v43 = vrot.slane %v3301_v32, 2  ;;  %v1651_v18 = vld [vmem:[#allocation2 + $0x38] sm:$0xe] }
 0x105   : > { %v1081_v22 = vsel %vm656_vm8, %v4428_v37, %v4426_v48  ;;  %v1359_v46 = vmul.f32 %v3414_v55, %v4430_v2  ;;  %v4433_v1 = vunpack.c.l.bf16 %v4432_v16  ;;  %v4436_v4 = vrot.slane %v3298_v5, 1  ;;  %v1744_v48 = vld [vmem:[#allocation2 + $0x3c] sm:$0x3] }
 0x106   : > { %v1103_v33 = vadd.f32 %v1081_v22, %v1010_v13  ;;  %v1360_v56 = vmul.f32 %v3414_v55, %v4431_v52  ;;  %v4434_v57 = vmov %v4431_v52  ;;  %v4438_v55 = vrot.slane %v4437_v31, 1 }
 0x107   : > { %v1452_v60 = vmul.f32 %v3424_v8, %v4433_v1  ;;  %v1453_v24 = vmul.f32 %v3424_v8, %v4434_v57  ;;  %v1395_v28 = vrot.slane %v1359_v46, 3  ;;  %v2052_v6 = vadd.f32 %v2028_v26, %v1959_v58  ;;  %v1837_v46 = vld [vmem:[#allocation2 + $0x38] sm:$0xc]  ;;  %v1968_v57 = vld [vmem:[#allocation2 + $0x44] sm:$0x1] }
 0x108   : > { %v1140_v40 = vadd.f32 %v4435_v21, %v1103_v33  ;;  %v1211_v29 = vsel %vm374_vm4, %v4438_v55, %v4436_v4  ;;  %v1396_v32 = vrot.slane %v1360_v56, 3  ;;  %v1529_v13 = vunpack.c.l.bf16 %v1521_v10 }
 0x109   : > { %v1488_v34 = vrot.slane %v1452_v60, 4  ;;  %v1489_v20 = vrot.slane %v1453_v24, 4  ;;  %v2307_v19 = vsel %vm656_vm8, %v2305_v54, %v2306_v36  ;;  %v1566_v8 = vunpack.c.l.bf16 %v1558_v38 }
 0x10a   : > { %v1233_v35 = vadd.f32 %v1211_v29, %v1140_v40  ;;  %v1659_v42 = vunpack.c.l.bf16 %v1651_v18  ;;  %v2145_v47 = vadd.f32 %v2121_v62, %v2052_v6  ;;  %v1304_v37 = vsel %vm468_vm5, %v1302_v44, %v1303_v43  ;;  %v1931_v43 = vld [vmem:[#allocation2 + $0x40] sm:$0xf] }
 0x10b   : > { %v1397_v5 = vsel %vm562_vm7, %v1395_v28, %v1396_v32  ;;  %v1583_v22 = vmul.f32 %v3471_v15, %v1529_v13  ;;  %v1584_v39 = vmul.f32 %v3471_v15, %v1566_v8  ;;  %v1677_v2 = vmul.f32 %v3562_v59, %v1566_v8  ;;  %v2154_v32 = vld [vmem:[#allocation2 + $0x44] sm:$0x3]  ;;  %v2247_v8 = vld [vmem:[#allocation2 + $0x40] sm:$0xc] }
 0x10c   : > { %v1326_v33 = vadd.f32 %v1304_v37, %v1233_v35  ;;  %v1676_v26 = vmul.f32 %v3562_v59, %v1659_v42  ;;  %v2238_v54 = vadd.f32 %v2214_v12, %v2145_v47  ;;  %v1490_v36 = vsel %vm656_vm8, %v1488_v34, %v1489_v20  ;;  %v2061_v59 = vld [vmem:[#allocation2 + $0x40] sm:$0xe] }
 0x10d   : > { %v1752_v52 = vunpack.c.l.bf16 %v1744_v48  ;;  %v1769_v62 = vmul.f32 %v3577_v45, %v1659_v42  ;;  %v1619_v44 = vrot.slane %v1583_v22, 1  ;;  %v1620_v10 = vrot.slane %v1584_v39, 1 }
 0x10e   : > { %v1419_v56 = vadd.f32 %v1397_v5, %v1326_v33  ;;  %v1712_v58 = vrot.slane %v1676_v26, 2  ;;  %v2331_v16 = vadd.f32 %v2307_v19, %v2238_v54  ;;  %v1713_v1 = vrot.slane %v1677_v2, 2 }
 0x10f   : > { %v1770_v15 = vmul.f32 %v3577_v45, %v1752_v52  ;;  %v1845_v60 = vunpack.c.l.bf16 %v1837_v46  ;;  %v1542_v12 = vmul.f32 %v3455_v27, %v1529_v13  ;;  %v1805_v38 = vrot.slane %v1769_v62, 3  ;;  %v4439_v62 = vld [vmem:[#allocation53_spill] sm:$0xff] }
 0x110   : > { %v1512_v24 = vadd.f32 %v1490_v36, %v1419_v56  ;;  %v1863_v18 = vmul.f32 %v3597_v3, %v1752_v52  ;;  %v2339_v21 = vpack.c.bf16 %v2331_v16, %v2331_v16  ;;  %v1939_v31 = vunpack.c.l.bf16 %v1931_v43  ;;  %v4440_v56 = vld [vmem:[#allocation54_spill] sm:$0xff]  ;;  %v4441_v16 = vld [vmem:[#allocation51_spill] sm:$0xff] }
 0x111   : > { %v1806_v40 = vrot.slane %v1770_v15, 3  ;;  %v1862_v4 = vmul.f32 %v3597_v3, %v1845_v60  ;;  %v1621_v29 = vsel %vm374_vm4, %v1619_v44, %v1620_v10  ;;  %v1976_v28 = vunpack.c.l.bf16 %v1968_v57  ;;  %v4443_v15 = vld [vmem:[#allocation47_spill] sm:$0xff] }
 0x112   : > { %v1550_v55 = vadd.f32 %v1542_v12, %v1512_v24  ;;  %v2069_v45 = vunpack.c.l.bf16 %v2061_v59  ;;  %2347 = vst.msk [vmem:[%s3711_s27 + $0xc] sm:$0xf] %vm190_vm0, %v2339_v21  ;;  %v1714_v6 = vsel %vm468_vm5, %v1712_v58, %v1713_v1  ;;  %v1899_v27 = vrot.slane %v1863_v18, 4  ;;  %v4445_v21 = vld [vmem:[#allocation52_spill] sm:$0xff] }
 0x113   : > { %v1898_v34 = vrot.slane %v1862_v4, 4  ;;  %v1993_v20 = vmul.f32 %v3617_v23, %v1939_v31  ;;  %v1994_v19 = vmul.f32 %v3617_v23, %v1976_v28  ;;  %v2087_v35 = vmul.f32 %v3629_v0, %v1976_v28  ;;  %v4447_v4 = vld [vmem:[#allocation48_spill] sm:$0xff] }
 0x114   : > { %v1643_v13 = vadd.f32 %v1621_v29, %v1550_v55  ;;  %v2086_v3 = vmul.f32 %v3629_v0, %v2069_v45  ;;  %v1807_v42 = vsel %vm562_vm7, %v1805_v38, %v1806_v40  ;;  %v2162_v47 = vunpack.c.l.bf16 %v2154_v32 }
 0x115   : > { %v2029_v48 = vrot.slane %v1993_v20, 1  ;;  %v2179_v37 = vmul.f32 %v3643_v53, %v2069_v45  ;;  %v2030_v22 = vrot.slane %v1994_v19, 1  ;;  %v2123_v39 = vrot.slane %v2087_v35, 2 }
 0x116   : > { %v1736_v5 = vadd.f32 %v1714_v6, %v1643_v13  ;;  %v2122_v33 = vrot.slane %v2086_v3, 2  ;;  %v2180_v26 = vmul.f32 %v3643_v53, %v2162_v47  ;;  %v2255_v46 = vunpack.c.l.bf16 %v2247_v8  ;;  %v1559_v3 = vld [vmem:[#allocation2 + $0x44] sm:$0x1] }
 0x117   : > { %v2215_v2 = vrot.slane %v2179_v37, 3  ;;  %v2273_v23 = vmul.f32 %v3650_v51, %v2162_v47  ;;  %v1900_v36 = vsel %vm656_vm8, %v1898_v34, %v1899_v27  ;;  %v1952_v52 = vmul.f32 %v3636_v11, %v1939_v31  ;;  %v3943_v34 = vld [vmem:[%s4191_s1 + $0xd] ss:$0 sm:$0xff] }
 0x118   : > { %v1829_v54 = vadd.f32 %v1807_v42, %v1736_v5  ;;  %v918_v44 = vadd.f32 %v4440_v56, %v4439_v62  ;;  %v2031_v10 = vsel %vm374_vm4, %v2029_v48, %v2030_v22  ;;  %v2216_v58 = vrot.slane %v2180_v26, 3  ;;  %v3956_v42 = vld [vmem:[%s4191_s1 + $0xe] ss:$0 sm:$0xff]  ;;  %v1652_v22 = vld [vmem:[#allocation2 + $0x40] sm:$0xe] }
 0x119   : > { %v2272_v43 = vmul.f32 %v3650_v51, %v2255_v46  ;;  %v4442_v1 = vrot.slane %v4441_v16, 3  ;;  %v4444_v60 = vrot.slane %v4443_v15, 3  ;;  %v2124_v24 = vsel %vm468_vm5, %v2122_v33, %v2123_v39  ;;  %v4454_v48 = vld [vmem:[#allocation56_spill] sm:$0xff]  ;;  %v4457_v39 = vld [vmem:[#allocation59_spill] sm:$0xff] }
 0x11a   : > { %v1922_v59 = vadd.f32 %v1900_v36, %v1829_v54  ;;  %v2309_v12 = vrot.slane %v2273_v23, 4  ;;  %v2217_v11 = vsel %vm562_vm7, %v2215_v2, %v2216_v58  ;;  %v4446_v40 = vrot.slane %v4445_v21, 4  ;;  %v1745_v58 = vld [vmem:[#allocation2 + $0x44] sm:$0x3] }
 0x11b   : > { %v991_v57 = vsel %vm562_vm7, %v4444_v60, %v4442_v1  ;;  %v2308_v18 = vrot.slane %v2272_v43, 4  ;;  %v4448_v31 = vrot.slane %v4447_v4, 4  ;;  %v4449_v29 = vrot.slane %v3427_v7, 1  ;;  %v1522_v7 = vld [vmem:[#allocation2 + $0x40] sm:$0xf] }
 0x11c   : > { %v1011_v38 = vadd.f32 %v991_v57, %v918_v44  ;;  %v4450_v28 = vrot.slane %v3367_v25, 1  ;;  %v1960_v32 = vadd.f32 %v1952_v52, %v1922_v59  ;;  %v4451_v27 = vunpack.c.l.bf16 %v3333_v30  ;;  %v4453_v25 = vld [vmem:[#allocation60_spill] sm:$0xff]  ;;  %v3978_v57 = vld [vmem:[%s4191_s1 + $0x11] ss:$0 sm:$0xff] }
 0x11d   : > { %v1084_v55 = vsel %vm656_vm8, %v4448_v31, %v4446_v40  ;;  %v4452_v13 = vunpack.c.l.bf16 %v3402_v41  ;;  %v1305_v35 = vrot.slane %v4453_v25, 2  ;;  %v1306_v8 = vrot.slane %v3433_v14, 2  ;;  %v3986_v40 = vld [vmem:[%s4191_s1 + $0x12] ss:$0 sm:$0xff]  ;;  %v3993_v25 = vld [vmem:[%s4191_s1 + $0xf] ss:$0 sm:$0xff] }
 0x11e   : > { %v1214_v45 = vsel %vm374_vm4, %v4450_v28, %v4449_v29  ;;  %v1104_v6 = vadd.f32 %v1084_v55, %v1011_v38  ;;  %v1361_v20 = vmul.f32 %v3943_v34, %v4451_v27  ;;  %v4455_v47 = vunpack.c.l.bf16 %v4454_v48  ;;  %v1932_v28 = vld [vmem:[#allocation2 + $0x48] sm:$0xf] }
 0x11f   : > { %v1362_v19 = vmul.f32 %v3943_v34, %v4452_v13  ;;  %v4456_v37 = vmov %v4452_v13  ;;  %v2053_v33 = vadd.f32 %v2031_v10, %v1960_v32  ;;  %v1530_v54 = vunpack.c.l.bf16 %v1522_v7  ;;  %v3971_v10 = vld [vmem:[%s4191_s1 + $0x10] ss:$0 sm:$0xff]  ;;  %v2062_v13 = vld [vmem:[#allocation2 + $0x48] sm:$0xe] }
 0x120   : > { %v1454_v30 = vmul.f32 %v3956_v42, %v4455_v47  ;;  %v1455_v5 = vmul.f32 %v3956_v42, %v4456_v37  ;;  %v1141_v26 = vadd.f32 %v4457_v39, %v1104_v6  ;;  %v1398_v2 = vrot.slane %v1361_v20, 3 }
 0x121   : > { %v1399_v46 = vrot.slane %v1362_v19, 3  ;;  %v1567_v36 = vunpack.c.l.bf16 %v1559_v3  ;;  %v2146_v52 = vadd.f32 %v2124_v24, %v2053_v33  ;;  %v2310_v62 = vsel %vm656_vm8, %v2308_v18, %v2309_v12  ;;  %v1838_v12 = vld [vmem:[#allocation2 + $0x40] sm:$0xc]  ;;  %v2155_v19 = vld [vmem:[#allocation2 + $0x4c] sm:$0x3] }
 0x122   : > { %v1491_v14 = vrot.slane %v1454_v30, 4  ;;  %v1492_v23 = vrot.slane %v1455_v5, 4  ;;  %v1234_v56 = vadd.f32 %v1214_v45, %v1141_v26  ;;  %v1660_v44 = vunpack.c.l.bf16 %v1652_v22  ;;  %v1969_v45 = vld [vmem:[#allocation2 + $0x4c] sm:$0x1] }
 0x123   : > { %v1307_v41 = vsel %vm468_vm5, %v1305_v35, %v1306_v8  ;;  %v1400_v43 = vsel %vm562_vm7, %v1398_v2, %v1399_v46  ;;  %v1585_v16 = vmul.f32 %v3971_v10, %v1530_v54  ;;  %v1586_v1 = vmul.f32 %v3971_v10, %v1567_v36  ;;  %v3999_v8 = vld [vmem:[%s4191_s1 + $0x13] ss:$0 sm:$0xff] }
 0x124   : > { %v2239_v15 = vadd.f32 %v2217_v11, %v2146_v52  ;;  %v1327_v60 = vadd.f32 %v1307_v41, %v1234_v56  ;;  %v1678_v59 = vmul.f32 %v3978_v57, %v1660_v44  ;;  %v1679_v24 = vmul.f32 %v3978_v57, %v1567_v36  ;;  %v4019_v56 = vld [vmem:[%s4191_s1 + $0x16] ss:$0 sm:$0xff] }
 0x125   : > { %v1493_v38 = vsel %vm656_vm8, %v1491_v14, %v1492_v23  ;;  %v1622_v18 = vrot.slane %v1585_v16, 1  ;;  %v1753_v21 = vunpack.c.l.bf16 %v1745_v58  ;;  %v1771_v11 = vmul.f32 %v3986_v40, %v1660_v44  ;;  %v4011_v23 = vld [vmem:[%s4191_s1 + $0x15] ss:$0 sm:$0xff]  ;;  %v2248_v58 = vld [vmem:[#allocation2 + $0x48] sm:$0xc] }
 0x126   : > { %v2332_v4 = vadd.f32 %v2310_v62, %v2239_v15  ;;  %v1420_v31 = vadd.f32 %v1400_v43, %v1327_v60  ;;  %v1623_v55 = vrot.slane %v1586_v1, 1  ;;  %v1715_v29 = vrot.slane %v1678_v59, 2 }
 0x127   : > { %v1716_v32 = vrot.slane %v1679_v24, 2  ;;  %v1772_v6 = vmul.f32 %v3986_v40, %v1753_v21  ;;  %v1808_v27 = vrot.slane %v1771_v11, 3  ;;  %v1846_v20 = vunpack.c.l.bf16 %v1838_v12 }
 0x128   : > { %v2340_v7 = vpack.c.bf16 %v2332_v4, %v2332_v4  ;;  %v1513_v3 = vadd.f32 %v1493_v38, %v1420_v31  ;;  %v1543_v35 = vmul.f32 %v3993_v25, %v1530_v54  ;;  %v1865_v48 = vmul.f32 %v3999_v8, %v1753_v21  ;;  %v2558_v21 = vld [vmem:[%s4191_s1 + $0xc] ss:$0 sm:$0xff] }
 0x129   : > { %v1809_v47 = vrot.slane %v1772_v6, 3  ;;  %v1864_v30 = vmul.f32 %v3999_v8, %v1846_v20  ;;  %v1940_v37 = vunpack.c.l.bf16 %v1932_v28  ;;  %v1977_v5 = vunpack.c.l.bf16 %v1969_v45 }
 0x12a   : > { %2348 = vst.msk [vmem:[%s3711_s27 + $0x10] sm:$0xf] %vm190_vm0, %v2340_v7  ;;  %v1551_v22 = vadd.f32 %v1543_v35, %v1513_v3  ;;  %v1624_v33 = vsel %vm374_vm4, %v1622_v18, %v1623_v55  ;;  %v2070_v39 = vunpack.c.l.bf16 %v2062_v13  ;;  %v2163_v26 = vunpack.c.l.bf16 %v2155_v19  ;;  %v4463_v35 = vld [vmem:[#allocation61_spill] sm:$0xff] }
 0x12b   : > { %v1717_v2 = vsel %vm468_vm5, %v1715_v29, %v1716_v32  ;;  %v1810_v46 = vsel %vm562_vm7, %v1808_v27, %v1809_v47  ;;  %v1902_v14 = vrot.slane %v1865_v48, 4  ;;  %v1995_v54 = vmul.f32 %v4011_v23, %v1940_v37  ;;  %v4459_v32 = vld [vmem:[#allocation58_spill] sm:$0xff]  ;;  %v4461_v27 = vld [vmem:[#allocation55_spill] sm:$0xff]  ;;  %v4465_v47 = vld [vmem:[#allocation57_spill] sm:$0xff] }
 0x12c   : > { %v1644_v36 = vadd.f32 %v1624_v33, %v1551_v22  ;;  %v1996_v52 = vmul.f32 %v4011_v23, %v1977_v5  ;;  %v2088_v62 = vmul.f32 %v3629_v0, %v2070_v39  ;;  %v2089_v44 = vmul.f32 %v4019_v56, %v1977_v5 }
 0x12d   : > { %v1901_v41 = vrot.slane %v1864_v30, 4  ;;  %v2032_v43 = vrot.slane %v1995_v54, 1  ;;  %v2181_v16 = vmul.f32 %v3643_v53, %v2070_v39  ;;  %v2182_v1 = vmul.f32 %v3643_v53, %v2163_v26  ;;  %v4035_v53 = vld [vmem:[%s4191_s1 + $0x14] ss:$0 sm:$0xff] }
 0x12e   : > { %v1737_v15 = vadd.f32 %v1717_v2, %v1644_v36  ;;  %v2033_v60 = vrot.slane %v1996_v52, 1  ;;  %v2125_v59 = vrot.slane %v2088_v62, 2  ;;  %v2126_v24 = vrot.slane %v2089_v44, 2  ;;  %v4472_v52 = vld [vmem:[#allocation62_spill] sm:$0xff] }
 0x12f   : > { %v2218_v12 = vrot.slane %v2181_v16, 3  ;;  %v2219_v0 = vrot.slane %v2182_v1, 3  ;;  %v2256_v38 = vunpack.c.l.bf16 %v2248_v58  ;;  %v2275_v18 = vmul.f32 %v3650_v51, %v2163_v26  ;;  %v1523_v58 = vld [vmem:[#allocation2 + $0x48] sm:$0xf]  ;;  %v4475_v1 = vld [vmem:[#allocation73_spill] sm:$0xff] }
 0x130   : > { %v4458_v11 = vunpack.c.l.bf16 %v3566_v61  ;;  %v1830_v31 = vadd.f32 %v1810_v46, %v1737_v15  ;;  %v1953_v55 = vmul.f32 %v4035_v53, %v1940_v37  ;;  %v919_v29 = vadd.f32 %v3407_v17, %v3416_v49  ;;  %v4045_v61 = vld [vmem:[%s4191_s1 + $0x18] ss:$0 sm:$0xff] }
 0x131   : > { %v1903_v51 = vsel %vm656_vm8, %v1901_v41, %v1902_v14  ;;  %v2034_v28 = vsel %vm374_vm4, %v2032_v43, %v2033_v60  ;;  %v2274_v45 = vmul.f32 %v4045_v61, %v2256_v38  ;;  %v4460_v6 = vrot.slane %v4459_v32, 3  ;;  %v4470_v14 = vld [vmem:[#allocation68_spill] sm:$0xff]  ;;  %v4474_v43 = vld [vmem:[#allocation67_spill] sm:$0xff] }
 0x132   : > { %v4030_v4 = vmul.f32 %v2558_v21, %v4458_v11  ;;  %v4462_v20 = vrot.slane %v4461_v27, 3  ;;  %v1923_v19 = vadd.f32 %v1903_v51, %v1830_v31  ;;  %v2127_v17 = vsel %vm468_vm5, %v2125_v59, %v2126_v24  ;;  %v1653_v41 = vld [vmem:[#allocation2 + $0x48] sm:$0xe]  ;;  %v1746_v59 = vld [vmem:[#allocation2 + $0x4c] sm:$0x3] }
 0x133   : > { %v2220_v49 = vsel %vm562_vm7, %v2218_v12, %v2219_v0  ;;  %v2312_v3 = vrot.slane %v2275_v18, 4  ;;  %v4464_v48 = vrot.slane %v4463_v35, 4  ;;  %v4466_v30 = vrot.slane %v4465_v47, 4  ;;  %v4477_v12 = vld [vmem:[#allocation66_spill] sm:$0xff] }
 0x134   : > { %v994_v13 = vsel %vm562_vm7, %v4462_v20, %v4460_v6  ;;  %v4467_v5 = vrot.slane %v3553_v50, 1  ;;  %v4468_v22 = vrot.slane %v3531_v9, 1  ;;  %v4469_v39 = vunpack.c.l.bf16 %v3489_v63  ;;  %v1560_v50 = vld [vmem:[#allocation2 + $0x4c] sm:$0x1] }
 0x135   : > { %v1012_v7 = vadd.f32 %v994_v13, %v919_v29  ;;  %v1087_v37 = vsel %vm656_vm8, %v4466_v30, %v4464_v48  ;;  %v1961_v2 = vadd.f32 %v1953_v55, %v1923_v19  ;;  %v4471_v54 = vunpack.c.l.bf16 %v4470_v14  ;;  %v1839_v48 = vld [vmem:[#allocation2 + $0x48] sm:$0xc] }
 0x136   : > { %v1217_v33 = vsel %vm374_vm4, %v4468_v22, %v4467_v5  ;;  %v1363_v26 = vmul.f32 %v3943_v34, %v4469_v39  ;;  %v4473_v62 = vunpack.c.l.bf16 %v4472_v52  ;;  %v2311_v9 = vrot.slane %v2274_v45, 4  ;;  %v1933_v39 = vld [vmem:[#allocation2 + $0x50] sm:$0xf] }
 0x137   : > { %v1105_v46 = vadd.f32 %v1087_v37, %v1012_v7  ;;  %v1364_v36 = vmul.f32 %v3943_v34, %v4471_v54  ;;  %v1308_v16 = vrot.slane %v4474_v43, 2  ;;  %v1309_v63 = vrot.slane %v4475_v1, 2 }
 0x138   : > { %v1456_v44 = vmul.f32 %v3956_v42, %v4473_v62  ;;  %v4476_v15 = vmov %v4471_v54  ;;  %v2054_v24 = vadd.f32 %v2034_v28, %v1961_v2  ;;  %v1401_v38 = vrot.slane %v1363_v26, 3  ;;  %v2063_v54 = vld [vmem:[#allocation2 + $0x50] sm:$0xe] }
 0x139   : > { %v1457_v60 = vmul.f32 %v3956_v42, %v4476_v15  ;;  %v1142_v0 = vadd.f32 %v4477_v12, %v1105_v46  ;;  %v1402_v18 = vrot.slane %v1364_v36, 3  ;;  %v1531_v11 = vunpack.c.l.bf16 %v1523_v58  ;;  %v2156_v36 = vld [vmem:[#allocation2 + $0x54] sm:$0x3] }
 0x13a   : > { %v1494_v21 = vrot.slane %v1456_v44, 4  ;;  %v1568_v31 = vunpack.c.l.bf16 %v1560_v50  ;;  %v1661_v55 = vunpack.c.l.bf16 %v1653_v41  ;;  %v2147_v29 = vadd.f32 %v2127_v17, %v2054_v24 }
 0x13b   : > { %v1235_v51 = vadd.f32 %v1217_v33, %v1142_v0  ;;  %v1495_v45 = vrot.slane %v1457_v60, 4  ;;  %v1754_v32 = vunpack.c.l.bf16 %v1746_v59  ;;  %v2313_v6 = vsel %vm656_vm8, %v2311_v9, %v2312_v3 }
 0x13c   : > { %v1310_v27 = vsel %vm468_vm5, %v1308_v16, %v1309_v63  ;;  %v1587_v20 = vmul.f32 %v3971_v10, %v1531_v11  ;;  %v1588_v28 = vmul.f32 %v3971_v10, %v1568_v31  ;;  %v2240_v13 = vadd.f32 %v2220_v49, %v2147_v29  ;;  %v1970_v49 = vld [vmem:[#allocation2 + $0x54] sm:$0x1] }
 0x13d   : > { %v1328_v19 = vadd.f32 %v1310_v27, %v1235_v51  ;;  %v1680_v7 = vmul.f32 %v3978_v57, %v1661_v55  ;;  %v1681_v35 = vmul.f32 %v3978_v57, %v1568_v31  ;;  %v1403_v17 = vsel %vm562_vm7, %v1401_v38, %v1402_v18  ;;  %v2249_v31 = vld [vmem:[#allocation2 + $0x50] sm:$0xc] }
 0x13e   : > { %v1625_v47 = vrot.slane %v1587_v20, 1  ;;  %v1626_v30 = vrot.slane %v1588_v28, 1  ;;  %v1773_v37 = vmul.f32 %v3986_v40, %v1661_v55  ;;  %v2333_v3 = vadd.f32 %v2313_v6, %v2240_v13 }
 0x13f   : > { %v1421_v5 = vadd.f32 %v1403_v17, %v1328_v19  ;;  %v1496_v22 = vsel %vm656_vm8, %v1494_v21, %v1495_v45  ;;  %v1774_v33 = vmul.f32 %v3986_v40, %v1754_v32  ;;  %v1544_v26 = vmul.f32 %v3993_v25, %v1531_v11  ;;  %v4103_v21 = vld [vmem:[%s4191_s1 + $0x17] ss:$0 sm:$0xff] }
 0x140   : > { %v1718_v2 = vrot.slane %v1680_v7, 2  ;;  %v1719_v46 = vrot.slane %v1681_v35, 2  ;;  %v1847_v14 = vunpack.c.l.bf16 %v1839_v48  ;;  %v2341_v52 = vpack.c.bf16 %v2333_v3, %v2333_v3 }
 0x141   : > { %v1514_v62 = vadd.f32 %v1496_v22, %v1421_v5  ;;  %v1627_v44 = vsel %vm374_vm4, %v1625_v47, %v1626_v30  ;;  %v1867_v58 = vmul.f32 %v3999_v8, %v1754_v32  ;;  %v1811_v50 = vrot.slane %v1773_v37, 3  ;;  %v4478_v32 = vld [vmem:[#allocation79_spill] sm:$0xff]  ;;  %v4479_v30 = vld [vmem:[#allocation78_spill] sm:$0xff]  ;;  %v4480_v37 = vld [vmem:[#allocation77_spill] sm:$0xff] }
 0x142   : > { %v1866_v41 = vmul.f32 %v3999_v8, %v1847_v14  ;;  %v1941_v9 = vunpack.c.l.bf16 %v1933_v39  ;;  %v1978_v43 = vunpack.c.l.bf16 %v1970_v49  ;;  %2349 = vst.msk [vmem:[%s3711_s27 + $0x14] sm:$0xf] %vm190_vm0, %v2341_v52  ;;  %v1812_v1 = vrot.slane %v1774_v33, 3  ;;  %v4481_v39 = vld [vmem:[#allocation69_spill] sm:$0xff]  ;;  %v4485_v52 = vld [vmem:[#allocation75_spill] sm:$0xff] }
 0x143   : > { %v1552_v16 = vadd.f32 %v1544_v26, %v1514_v62  ;;  %v2071_v63 = vunpack.c.l.bf16 %v2063_v54  ;;  %v2164_v15 = vunpack.c.l.bf16 %v2156_v36  ;;  %v1905_v59 = vrot.slane %v1867_v58, 4  ;;  %v4483_v26 = vld [vmem:[#allocation63_spill] sm:$0xff] }
 0x144   : > { %v1904_v60 = vrot.slane %v1866_v41, 4  ;;  %v1997_v24 = vmul.f32 %v4011_v23, %v1941_v9  ;;  %v1998_v12 = vmul.f32 %v4011_v23, %v1978_v43  ;;  %v2091_v18 = vmul.f32 %v4019_v56, %v1978_v43 }
 0x145   : > { %v1645_v0 = vadd.f32 %v1627_v44, %v1552_v16  ;;  %v2090_v38 = vmul.f32 %v4019_v56, %v2071_v63  ;;  %v2183_v11 = vmul.f32 %v4103_v21, %v2071_v63  ;;  %v1720_v55 = vsel %vm468_vm5, %v1718_v2, %v1719_v46  ;;  %v4486_v44 = vld [vmem:[#allocation70_spill] sm:$0xff]  ;;  %v4490_v16 = vld [vmem:[#allocation64_spill] sm:$0xff] }
 0x146   : > { %v2035_v29 = vrot.slane %v1997_v24, 1  ;;  %v2036_v51 = vrot.slane %v1998_v12, 1  ;;  %v2184_v45 = vmul.f32 %v4103_v21, %v2164_v15  ;;  %v1219_v6 = vrot.slane %v4478_v32, 1 }
 0x147   : > { %v1738_v27 = vadd.f32 %v1720_v55, %v1645_v0  ;;  %v2128_v20 = vrot.slane %v2090_v38, 2  ;;  %v2129_v28 = vrot.slane %v2091_v18, 2  ;;  %v1813_v13 = vsel %vm562_vm7, %v1811_v50, %v1812_v1  ;;  %v4488_v50 = vld [vmem:[#allocation65_spill] sm:$0xff]  ;;  %v4494_v38 = vld [vmem:[#allocation72_spill] sm:$0xff] }
 0x148   : > { %v1906_v19 = vsel %vm656_vm8, %v1904_v60, %v1905_v59  ;;  %v1954_v7 = vmul.f32 %v4035_v53, %v1941_v9  ;;  %v2257_v35 = vunpack.c.l.bf16 %v2249_v31  ;;  %v2221_v17 = vrot.slane %v2183_v11, 3  ;;  %v1524_v31 = vld [vmem:[#allocation2 + $0x50] sm:$0xf]  ;;  %v1561_v55 = vld [vmem:[#allocation2 + $0x54] sm:$0x1] }
 0x149   : > { %v1831_v48 = vadd.f32 %v1813_v13, %v1738_v27  ;;  %v2222_v47 = vrot.slane %v2184_v45, 3  ;;  %v920_v3 = vadd.f32 %v4480_v37, %v4479_v30  ;;  %v2037_v5 = vsel %vm374_vm4, %v2035_v29, %v2036_v51  ;;  %v1654_v29 = vld [vmem:[#allocation2 + $0x50] sm:$0xe]  ;;  %v4496_v45 = vld [vmem:[#allocation71_spill] sm:$0xff] }
 0x14a   : > { %v2276_v22 = vmul.f32 %v4045_v61, %v2257_v35  ;;  %v2277_v33 = vmul.f32 %v4045_v61, %v2164_v15  ;;  %v4482_v49 = vrot.slane %v4481_v39, 3  ;;  %v4484_v2 = vrot.slane %v4483_v26, 3  ;;  %v4492_v15 = vld [vmem:[#allocation76_spill] sm:$0xff] }
 0x14b   : > { %v1924_v14 = vadd.f32 %v1906_v19, %v1831_v48  ;;  %v2130_v54 = vsel %vm468_vm5, %v2128_v20, %v2129_v28  ;;  %v1311_v62 = vrot.slane %v4485_v52, 2  ;;  %v4487_v58 = vrot.slane %v4486_v44, 4  ;;  %v1747_v28 = vld [vmem:[#allocation2 + $0x54] sm:$0x3]  ;;  %v4499_v19 = vld [vmem:[#allocation74_spill] sm:$0xff] }
 0x14c   : > { %v997_v46 = vsel %vm562_vm7, %v4484_v2, %v4482_v49  ;;  %v4489_v41 = vrot.slane %v4488_v50, 4  ;;  %v1312_v43 = vrot.slane %v4030_v4, 2  ;;  %v4491_v1 = vunpack.c.l.bf16 %v4490_v16  ;;  %v1934_v44 = vld [vmem:[#allocation2 + $0x58] sm:$0xf] }
 0x14d   : > { %v1013_v36 = vadd.f32 %v997_v46, %v920_v3  ;;  %v4493_v60 = vunpack.c.l.bf16 %v4492_v15  ;;  %v1962_v24 = vadd.f32 %v1954_v7, %v1924_v14  ;;  %v2223_v12 = vsel %vm562_vm7, %v2221_v17, %v2222_v47  ;;  %v1840_v14 = vld [vmem:[#allocation2 + $0x50] sm:$0xc] }
 0x14e   : > { %v1090_v9 = vsel %vm656_vm8, %v4489_v41, %v4487_v58  ;;  %v1365_v63 = vmul.f32 %v3943_v34, %v4491_v1  ;;  %v4495_v18 = vunpack.c.l.bf16 %v4494_v38  ;;  %v2314_v4 = vrot.slane %v2276_v22, 4 }
 0x14f   : > { %v1366_v59 = vmul.f32 %v3943_v34, %v4493_v60  ;;  %v1106_v0 = vadd.f32 %v1090_v9, %v1013_v36  ;;  %v2315_v51 = vrot.slane %v2277_v33, 4  ;;  %v4497_v32 = vrot.slane %v4496_v45, 1  ;;  %v1971_v9 = vld [vmem:[#allocation2 + $0x5c] sm:$0x1]  ;;  %v2250_v45 = vld [vmem:[#allocation2 + $0x58] sm:$0xc] }
 0x150   : > { %v1458_v11 = vmul.f32 %v3956_v42, %v4495_v18  ;;  %v4498_v20 = vmov %v4493_v60  ;;  %v2055_v13 = vadd.f32 %v2037_v5, %v1962_v24  ;;  %v1313_v35 = vsel %vm468_vm5, %v1311_v62, %v1312_v43  ;;  %v2064_v24 = vld [vmem:[#allocation2 + $0x58] sm:$0xe] }
 0x151   : > { %v1220_v27 = vsel %vm374_vm4, %v4497_v32, %v1219_v6  ;;  %v1459_v34 = vmul.f32 %v3956_v42, %v4498_v20  ;;  %v1143_v7 = vadd.f32 %v4499_v19, %v1106_v0  ;;  %v1404_v48 = vrot.slane %v1365_v63, 3 }
 0x152   : > { %v1405_v17 = vrot.slane %v1366_v59, 3  ;;  %v1532_v47 = vunpack.c.l.bf16 %v1524_v31  ;;  %v1569_v30 = vunpack.c.l.bf16 %v1561_v55  ;;  %v1662_v37 = vunpack.c.l.bf16 %v1654_v29 }
 0x153   : > { %v2148_v3 = vadd.f32 %v2130_v54, %v2055_v13  ;;  %v1236_v22 = vadd.f32 %v1220_v27, %v1143_v7  ;;  %v1497_v33 = vrot.slane %v1458_v11, 4  ;;  %v1755_v39 = vunpack.c.l.bf16 %v1747_v28 }
 0x154   : > { %v1498_v6 = vrot.slane %v1459_v34, 4  ;;  %v1589_v49 = vmul.f32 %v3971_v10, %v1532_v47  ;;  %v1590_v42 = vmul.f32 %v3971_v10, %v1569_v30  ;;  %v1682_v5 = vmul.f32 %v3978_v57, %v1662_v37 }
 0x155   : > { %v2241_v26 = vadd.f32 %v2223_v12, %v2148_v3  ;;  %v1329_v2 = vadd.f32 %v1313_v35, %v1236_v22  ;;  %v1683_v46 = vmul.f32 %v3978_v57, %v1569_v30  ;;  %v2316_v36 = vsel %vm656_vm8, %v2314_v4, %v2315_v51 }
 0x156   : > { %v1406_v52 = vsel %vm562_vm7, %v1404_v48, %v1405_v17  ;;  %v1628_v54 = vrot.slane %v1589_v49, 1  ;;  %v1629_v62 = vrot.slane %v1590_v42, 1  ;;  %v1775_v41 = vmul.f32 %v3986_v40, %v1662_v37 }
 0x157   : > { %v2334_v58 = vadd.f32 %v2316_v36, %v2241_v26  ;;  %v1422_v50 = vadd.f32 %v1406_v52, %v1329_v2  ;;  %v1776_v10 = vmul.f32 %v3986_v40, %v1755_v39  ;;  %v1499_v43 = vsel %vm656_vm8, %v1497_v33, %v1498_v6 }
 0x158   : > { %v1545_v57 = vmul.f32 %v3993_v25, %v1532_v47  ;;  %v1721_v16 = vrot.slane %v1682_v5, 2  ;;  %v1848_v1 = vunpack.c.l.bf16 %v1840_v14  ;;  %v1722_v60 = vrot.slane %v1683_v46, 2  ;;  %v2157_v25 = vld [vmem:[#allocation2 + $0x5c] sm:$0x3] }
 0x159   : > { %v2342_v63 = vpack.c.bf16 %v2334_v58, %v2334_v58  ;;  %v1515_v15 = vadd.f32 %v1499_v43, %v1422_v50  ;;  %v1942_v59 = vunpack.c.l.bf16 %v1934_v44  ;;  %v1630_v12 = vsel %vm374_vm4, %v1628_v54, %v1629_v62 }
 0x15a   : > { %v1868_v0 = vmul.f32 %v3999_v8, %v1848_v1  ;;  %v1869_v38 = vmul.f32 %v3999_v8, %v1755_v39  ;;  %v1979_v18 = vunpack.c.l.bf16 %v1971_v9  ;;  %v1814_v11 = vrot.slane %v1775_v41, 3 }
 0x15b   : > { %2350 = vst.msk [vmem:[%s3711_s27 + $0x18] sm:$0xf] %vm190_vm0, %v2342_v63  ;;  %v1553_v40 = vadd.f32 %v1545_v57, %v1515_v15  ;;  %v1815_v31 = vrot.slane %v1776_v10, 3  ;;  %v1999_v55 = vmul.f32 %v4011_v23, %v1942_v59  ;;  %v2072_v4 = vunpack.c.l.bf16 %v2064_v24 }
 0x15c   : > { %v2000_v29 = vmul.f32 %v4011_v23, %v1979_v18  ;;  %v1723_v32 = vsel %vm468_vm5, %v1721_v16, %v1722_v60  ;;  %v1907_v27 = vrot.slane %v1868_v0, 4  ;;  %v1908_v20 = vrot.slane %v1869_v38, 4 }
 0x15d   : > { %v1646_v51 = vadd.f32 %v1630_v12, %v1553_v40  ;;  %v2165_v34 = vunpack.c.l.bf16 %v2157_v25  ;;  %v1816_v28 = vsel %vm562_vm7, %v1814_v11, %v1815_v31  ;;  %v2093_v13 = vmul.f32 %v4019_v56, %v1979_v18 }
 0x15e   : > { %v2038_v19 = vrot.slane %v1999_v55, 1  ;;  %v2039_v7 = vrot.slane %v2000_v29, 1  ;;  %v2092_v35 = vmul.f32 %v4019_v56, %v2072_v4  ;;  %v2258_v48 = vunpack.c.l.bf16 %v2250_v45 }
 0x15f   : > { %v1739_v8 = vadd.f32 %v1723_v32, %v1646_v51  ;;  %v1909_v23 = vsel %vm656_vm8, %v1907_v27, %v1908_v20  ;;  %v2185_v47 = vmul.f32 %v4103_v21, %v2072_v4  ;;  %v2186_v30 = vmul.f32 %v4103_v21, %v2165_v34 }
 0x160   : > { %v1955_v3 = vmul.f32 %v4035_v53, %v1942_v59  ;;  %v2132_v22 = vrot.slane %v2093_v13, 2  ;;  %v2040_v33 = vsel %vm374_vm4, %v2038_v19, %v2039_v7  ;;  %v2131_v39 = vrot.slane %v2092_v35, 2 }
 0x161   : > { %v1832_v17 = vadd.f32 %v1816_v28, %v1739_v8  ;;  %v2278_v6 = vmul.f32 %v4045_v61, %v2258_v48  ;;  %v2279_v56 = vmul.f32 %v4045_v61, %v2165_v34  ;;  %v2224_v42 = vrot.slane %v2185_v47, 3 }
 0x162   : > { %v2225_v5 = vrot.slane %v2186_v30, 3  ;;  %v2133_v2 = vsel %vm468_vm5, %v2131_v39, %v2132_v22 }
 0x163   : > { %v1925_v37 = vadd.f32 %v1909_v23, %v1832_v17  ;;  %v2317_v46 = vrot.slane %v2278_v6, 4  ;;  %v2318_v21 = vrot.slane %v2279_v56, 4 }
 0x164   : > { %v2226_v53 = vsel %vm562_vm7, %v2224_v42, %v2225_v5 }
 0x165   : > { %v1963_v49 = vadd.f32 %v1955_v3, %v1925_v37  ;;  %v2319_v52 = vsel %vm656_vm8, %v2317_v46, %v2318_v21 }
 0x167   : > { %v2056_v26 = vadd.f32 %v2040_v33, %v1963_v49 }
 0x169   : > { %v2149_v14 = vadd.f32 %v2133_v2, %v2056_v26 }
 0x16b   : > { %v2242_v36 = vadd.f32 %v2226_v53, %v2149_v14 }
 0x16d   : > { %v2335_v54 = vadd.f32 %v2319_v52, %v2242_v36 }
 0x16f   : > { %v2343_v62 = vpack.c.bf16 %v2335_v54, %v2335_v54 }
 0x171   : > { %2351 = vst.msk [vmem:[%s3711_s27 + $0x1c] sm:$0xf] %vm190_vm0, %v2343_v62 }
 0x172 PF: > { %s12_s11 = sadd.s32 1, %s2584_s11   ;;  %s4500_s9 = smov %s2580_s10 }
 0x173   : > { %p9_p5 = scmp.ge.s32.totalorder %s12_s11, 4   ;;  %s4501_s10 = smov %s4503_s12 }
 0x175   :  { %11 = sbr.rel (!%p9_p5) target bundleno = 2 (0x2), region = 90 }

</bundles_post_ra>
